<compile_context>
chip_gen: v7x
topology: tpu7x:2x2x1
jax: 0.10.0
libtpu: 0.0.40
codegen_flags: <defaults>
</compile_context>

<pallas_src>
import jax
import jax.numpy as jnp
from jax import lax
from jax.experimental import pallas as pl
from jax.experimental.pallas import tpu as pltpu

_BN_EPS = 1e-5
_LANE = 128  # TPU lane width; Cout tiles are multiples of this.

_VMEM_LIMIT = None


def _round_up(x, m):
    return (x + m - 1) // m * m


def _vmem_limit_bytes():
    """~Half the physical VMEM: 64 MiB on v5e/v6e (128 MiB), 32 MiB on v7x."""
    global _VMEM_LIMIT
    if _VMEM_LIMIT is None:
        try:
            cap = int(getattr(pltpu.get_tpu_info(), "vmem_capacity_bytes", 0) or 0)
        except Exception:
            cap = 0
        if cap <= 0:
            cap = 64 * 1024 * 1024  # conservative fallback (v7x physical size)
        _VMEM_LIMIT = int(min(max(cap // 2, 32 * 1024 * 1024), 96 * 1024 * 1024))
    return _VMEM_LIMIT


def _fold_bn(gamma, beta, mean, var, eps=_BN_EPS):
    scale = gamma / jnp.sqrt(var + eps)
    shift = beta - mean * scale
    return scale, shift


def _make_conv3x3_kernel(H, W, stride, Ho, Wo, relu, shortcut_mode, use_im2col):
    """Fused 3x3 conv (pad=1, BN scale pre-folded into weights) + shift
    (+ fused shortcut) (+ ReLU) kernel.

    Refs per grid step (n, c):
      x_ref    : (1, H, W, Cin)   bf16 NHWC input tile (all input channels)
      w_ref    : (9*Cin, TC)      bf16 HWIO weights (BN scale folded), one Cout tile
      sh_ref   : (1, TC)          f32 folded BN shift
      [project]  xs_ref (1,Ho,Wo,Cs) bf16, wsc_ref (Cs,TC) bf16, hsc_ref (1,TC) f32
      [identity] res_ref (1, Ho, Wo, TC) bf16
      out_ref  : (1, Ho, Wo, TC)  lane-dense output tile
      pad_ref  : (H+2, W+2, Cin)  VMEM scratch: zero-padded halo, built once per
                                  image (c == 0) and reused across Cout tiles.
    """
    KH = KW = 3
    M = Ho * Wo

    def kernel(*refs):
        if shortcut_mode == "project":
            (x_ref, w_ref, sh_ref,
             xs_ref, wsc_ref, hsc_ref, out_ref, pad_ref) = refs
        elif shortcut_mode == "identity":
            x_ref, w_ref, sh_ref, res_ref, out_ref, pad_ref = refs
        else:
            x_ref, w_ref, sh_ref, out_ref, pad_ref = refs

        cin = x_ref.shape[-1]
        tc = out_ref.shape[-1]

        # ---- zero-padded halo, built once per image (c == 0) ---------------
        # Only the 1-pixel border is zero; one aligned full store, no full
        # zero-fill.  Requires the c axis to be sequential ("arbitrary").
        @pl.when(pl.program_id(1) == 0)
        def _():
            x0 = x_ref[0]
            zcol = jnp.zeros((H, 1, cin), pad_ref.dtype)
            zrow = jnp.zeros((1, W + 2, cin), pad_ref.dtype)
            mid = jnp.concatenate([zcol, x0, zcol], axis=1)          # (H, W+2, C)
            pad_ref[...] = jnp.concatenate([zrow, mid, zrow], axis=0)

        xpad = pad_ref[...]

        def tap(dy, dx):
            # TODO(synk): for stride > 1 move the subsampling onto the DMA
            # (polyphase index maps) instead of an in-VMEM strided slice.
            p = lax.slice(
                xpad,
                (dy, dx, 0),
                (dy + (Ho - 1) * stride + 1, dx + (Wo - 1) * stride + 1, cin),
                (stride, stride, 1))
            return p.reshape(M, cin)

        # ---- conv (bf16 operands, f32 accumulation) ------------------------
        if use_im2col and cin % _LANE == 0:
            # Optional deep-K im2col path (may help on v5e/v6e; off by default
            # since the patches slab costs vst slots / VMEM).
            patches = jnp.concatenate(
                [tap(dy, dx) for dy in range(KH) for dx in range(KW)], axis=-1)
            acc = jnp.dot(patches, w_ref[...],
                          preferred_element_type=jnp.float32)
        else:
            # Per-tap accumulation: 9 matmuls of K = Cin each.
            acc = jnp.zeros((M, tc), jnp.float32)
            t = 0
            for dy in range(KH):
                for dx in range(KW):
                    acc = acc + jnp.dot(
                        tap(dy, dx), w_ref[t * cin:(t + 1) * cin, :],
                        preferred_element_type=jnp.float32)
                    t += 1

        out = acc + sh_ref[...]          # BN scale already folded into weights

        # ---- fused shortcut -------------------------------------------------
        if shortcut_mode == "project":
            cs = xs_ref.shape[-1]
            xs = xs_ref[0].reshape(M, cs)
            out = out + jnp.dot(xs, wsc_ref[...],
                                preferred_element_type=jnp.float32) + hsc_ref[...]
        elif shortcut_mode == "identity":
            out = out + res_ref[0].reshape(M, tc).astype(jnp.float32)

        if relu:
            out = jnp.maximum(out, 0.0)
        out_ref[0] = out.reshape(Ho, Wo, tc).astype(out_ref.dtype)

    return kernel


def _conv3x3_bn(x, w2d, shift, *, stride, relu, out_dtype,
                residual=None, shortcut=None, use_im2col=False):
    """Fused 3x3 conv (pad=1) + BN (scale folded into w2d) (+ residual /
    1x1-projection shortcut) (+ ReLU).

    x        : (N, H, W, Cin)  bf16 NHWC activations (no spatial pre-padding).
    w2d      : (9*Cin, Cp)     bf16 scale-folded HWIO weights; Cp % 128 == 0.
    shift    : (1, Cp)         f32 folded BN shift (zero in padded channels).
    residual : (N, Ho, Wo, Cp) bf16 identity-shortcut tensor added before ReLU.
    shortcut : (xs, wsc2d, hsc) fused 1x1 projection shortcut,
               xs: (N, Ho, Wo, Cs) bf16, wsc2d: (Cs, Cp) bf16, hsc: (1, Cp) f32.
    Returns (N, Ho, Wo, Cp) in out_dtype.
    """
    N, H, W, Cin = x.shape
    K9, Cp = w2d.shape
    assert K9 == 9 * Cin and Cp % _LANE == 0
    Ho = (H - 1) // stride + 1
    Wo = (W - 1) // stride + 1
    TC = _LANE
    # TODO(synk): TC=256 on v6e/v7x when Cp >= 256; grid=(Cp//TC, N) for deep
    # layers so the weight tile stays resident across the batch loop.

    in_specs = [
        pl.BlockSpec((1, H, W, Cin), lambda n, c: (n, 0, 0, 0)),
        pl.BlockSpec((K9, TC), lambda n, c: (0, c)),
        pl.BlockSpec((1, TC), lambda n, c: (0, c)),
    ]
    args = [x, w2d, shift]
    mode = None
    if shortcut is not None:
        xs, wsc2d, hsc = shortcut
        Cs = xs.shape[-1]
        in_specs += [
            pl.BlockSpec((1, Ho, Wo, Cs), lambda n, c: (n, 0, 0, 0)),
            pl.BlockSpec((Cs, TC), lambda n, c: (0, c)),
            pl.BlockSpec((1, TC), lambda n, c: (0, c)),
        ]
        args += [xs, wsc2d, hsc]
        mode = "project"
    elif residual is not None:
        in_specs.append(
            pl.BlockSpec((1, Ho, Wo, TC), lambda n, c: (n, 0, 0, c)))
        args.append(residual)
        mode = "identity"

    kernel = _make_conv3x3_kernel(H, W, stride, Ho, Wo, relu, mode, use_im2col)
    return pl.pallas_call(
        kernel,
        out_shape=jax.ShapeDtypeStruct((N, Ho, Wo, Cp), out_dtype),
        grid_spec=pltpu.PrefetchScalarGridSpec(
            num_scalar_prefetch=0,
            grid=(N, Cp // TC),
            in_specs=in_specs,
            out_specs=pl.BlockSpec((1, Ho, Wo, TC), lambda n, c: (n, 0, 0, c)),
            scratch_shapes=[pltpu.VMEM((H + 2, W + 2, Cin), x.dtype)],
        ),
        compiler_params=pltpu.CompilerParams(
            # c axis must be "arbitrary": the halo-pad scratch is built at
            # c == 0 and reused across the Cout tiles of the same image.
            dimension_semantics=("parallel", "arbitrary"),
            vmem_limit_bytes=_vmem_limit_bytes(),
        ),
    )(*args)


def init_basic_block_params(key, in_planes, planes, stride):
    ks = jax.random.split(key, 6)

    def bn_params(k, c):
        k1, k2, k3, k4 = jax.random.split(k, 4)
        gamma = 1.0 + 0.1 * jax.random.normal(k1, (c,), jnp.float32)
        beta = 0.1 * jax.random.normal(k2, (c,), jnp.float32)
        mean = 0.1 * jax.random.normal(k3, (c,), jnp.float32)
        var = jax.random.uniform(k4, (c,), jnp.float32, 0.5, 1.5)
        return (gamma, beta, mean, var)

    # Conv weights stored in HWIO (== PyTorch OIHW weight transposed (2,3,1,0)).
    p = {
        "w1": 0.1 * jax.random.normal(ks[0], (3, 3, in_planes, planes), jnp.float32),
        "bn1": bn_params(ks[1], planes),
        "w2": 0.1 * jax.random.normal(ks[2], (3, 3, planes, planes), jnp.float32),
        "bn2": bn_params(ks[3], planes),
    }
    if stride != 1 or in_planes != planes:
        p["w_sc"] = 0.1 * jax.random.normal(ks[4], (1, 1, in_planes, planes), jnp.float32)
        p["bn_sc"] = bn_params(ks[5], planes)
    return p


def prepare_basic_block_params(params, in_channels=None):
    """One-time parameter transform (call once, outside the per-step forward):
    fold eval-mode BN scale into the conv weights, pad output channels to a
    multiple of 128, flatten HWIO -> (9*Cin, Cp), and cast weights to bf16.

    `in_channels` is the channel count of the activation the block will
    actually receive (>= in_planes; any extra channels are assumed zero)."""
    in_planes, planes = params["w1"].shape[-2], params["w1"].shape[-1]
    if in_channels is None:
        in_channels = in_planes
    Cp = _round_up(planes, _LANE)
    pad_out = Cp - planes
    pad_in = in_channels - in_planes

    def fold(w_hwio, bn):
        sc, sh = _fold_bn(*bn)
        return w_hwio * sc, sh           # scale along the output-channel axis

    def pad_shift(sh):
        return jnp.pad(sh, (0, pad_out)).reshape(1, Cp).astype(jnp.float32)

    w1, sh1 = fold(params["w1"], params["bn1"])
    w2, sh2 = fold(params["w2"], params["bn2"])

    w1 = jnp.pad(w1, ((0, 0), (0, 0), (0, pad_in), (0, pad_out)))
    w2 = jnp.pad(w2, ((0, 0), (0, 0), (0, pad_out), (0, pad_out)))
    prep = {
        "w1": w1.reshape(9 * in_channels, Cp).astype(jnp.bfloat16),
        "sh1": pad_shift(sh1),
        "w2": w2.reshape(9 * Cp, Cp).astype(jnp.bfloat16),
        "sh2": pad_shift(sh2),
    }
    if "w_sc" in params:
        wsc, shsc = fold(params["w_sc"], params["bn_sc"])
        wsc = jnp.pad(wsc, ((0, 0), (0, 0), (0, pad_in), (0, pad_out)))
        prep["w_sc"] = wsc.reshape(in_channels, Cp).astype(jnp.bfloat16)
        prep["sh_sc"] = pad_shift(shsc)
    return prep


def basic_block_forward_nhwc(x, prep, stride=1):
    """BasicBlock.forward in NHWC with prepared params.

    x: (N, H, W, C) where C equals the `in_channels` used in prepare_...().
    Returns (N, Ho, Wo, Cp) f32; channels [planes:Cp] are exactly zero, so the
    padded output can be fed straight into the next prepared block."""
    Cp = prep["w1"].shape[-1]
    x = x.astype(jnp.bfloat16)

    # out1 = relu(bn1(conv1(x)))   [bf16 intermediate, stays in HBM once]
    out1 = _conv3x3_bn(x, prep["w1"], prep["sh1"], stride=stride, relu=True,
                       out_dtype=jnp.bfloat16)

    # out = relu(bn2(conv2(out1)) + shortcut(x))  -- one fused pallas_call
    if "w_sc" in prep:
        # TODO(synk): express the stride-2 shortcut subsample via polyphase
        # index maps instead of an XLA strided slice.
        xs = x if stride == 1 else x[:, ::stride, ::stride, :]
        out = _conv3x3_bn(out1, prep["w2"], prep["sh2"], stride=1, relu=True,
                          shortcut=(xs, prep["w_sc"], prep["sh_sc"]),
                          out_dtype=jnp.float32)
    else:
        # Identity shortcut (stride == 1, in_planes == planes).  If activations
        # are kept Cp-padded end-to-end this pad is a no-op.
        res = x if x.shape[-1] == Cp else jnp.pad(
            x, ((0, 0), (0, 0), (0, 0), (0, Cp - x.shape[-1])))
        out = _conv3x3_bn(out1, prep["w2"], prep["sh2"], stride=1, relu=True,
                          residual=res, out_dtype=jnp.float32)
    return out


def basic_block_forward(x_nchw, prep, planes, stride=1):
    """PyTorch-facing wrapper: NCHW in / NCHW out (layout changes only here)."""
    x = jnp.transpose(x_nchw, (0, 2, 3, 1))
    out = basic_block_forward_nhwc(x, prep, stride=stride)
    out = out[..., :planes]
    return jnp.transpose(out, (0, 3, 1, 2)).astype(x_nchw.dtype)


def reference_forward(x_nchw, params, stride=1):
    """Pure-JAX reference (eval-mode BN, default MXU precision)."""
    x = jnp.transpose(x_nchw, (0, 2, 3, 1))

    def conv(x, w, s, pad):
        return lax.conv_general_dilated(
            x, w, (s, s), [(pad, pad), (pad, pad)],
            dimension_numbers=("NHWC", "HWIO", "NHWC"))

    def bn(x, p):
        sc, sh = _fold_bn(*p)
        return x * sc + sh

    out = jax.nn.relu(bn(conv(x, params["w1"], stride, 1), params["bn1"]))
    out = bn(conv(out, params["w2"], 1, 1), params["bn2"])
    if "w_sc" in params:
        short = bn(conv(x, params["w_sc"], stride, 0), params["bn_sc"])
    else:
        short = x
    out = jax.nn.relu(out + short)
    return jnp.transpose(out, (0, 3, 1, 2))


if __name__ == "__main__":
    key = jax.random.PRNGKey(0)
    kx, kp = jax.random.split(key)

    # Small shapes consistent with the module: batch=2, in_planes=4, planes=8,
    # spatial=16, stride=1 (in_planes != planes -> the fused 1x1-projection
    # shortcut path is exercised).
    N, in_planes, H, W = 2, 4, 16, 16
    planes, stride = 8, 1

    x = jax.random.normal(kx, (N, in_planes, H, W), jnp.float32)
    params = init_basic_block_params(kp, in_planes, planes, stride)
    prep = prepare_basic_block_params(params)        # one-time transform

    fwd = jax.jit(basic_block_forward, static_argnames=("planes", "stride"))
    y = jax.block_until_ready(fwd(x, prep, planes=planes, stride=stride))

    y_ref = reference_forward(x, params, stride=stride)
    assert y.shape == (N, planes, H // stride, W // stride)
    err = float(jnp.max(jnp.abs(y - y_ref)))
    # bf16 operands / bf16 intermediate with f32 accumulation => slightly
    # looser tolerance than a pure-f32 comparison.
    assert jnp.allclose(y, y_ref, atol=5e-2, rtol=5e-2), f"max abs err = {err}"

    print("KERNEL_OK")
</pallas_src>

<mosaic_0001>
module attributes {stable_mosaic.version = 11 : i64} {
  func.func @kernel(%arg0: i32, %arg1: i32, %arg2: memref<1x16x16x128xbf16, #tpu.memory_space<vmem>>, %arg3: memref<1152x128xbf16, #tpu.memory_space<vmem>>, %arg4: memref<1x128xf32, #tpu.memory_space<vmem>>, %arg5: memref<1x16x16x4xbf16, #tpu.memory_space<vmem>>, %arg6: memref<4x128xbf16, #tpu.memory_space<vmem>>, %arg7: memref<1x128xf32, #tpu.memory_space<vmem>>, %arg8: memref<1x16x16x128xf32, #tpu.memory_space<vmem>>, %arg9: memref<18x18x128xbf16, #tpu.memory_space<vmem>>) attributes {dimension_semantics = [#tpu.dimension_semantics<parallel>, #tpu.dimension_semantics<arbitrary>], iteration_bounds = array<i64: 2, 1>, scalar_prefetch = 0 : i64, scratch_operands = 1 : i64, tpu.core_type = #tpu.core_type<tc>, window_params = [{transform_indices = @transform_0, window_bounds = array<i64: 1, 16, 16, 128>}, {transform_indices = @transform_1, window_bounds = array<i64: 1152, 128>}, {transform_indices = @transform_2, window_bounds = array<i64: 1, 128>}, {transform_indices = @transform_3, window_bounds = array<i64: 1, 16, 16, 4>}, {transform_indices = @transform_4, window_bounds = array<i64: 4, 128>}, {transform_indices = @transform_5, window_bounds = array<i64: 1, 128>}, {transform_indices = @transform_6, window_bounds = array<i64: 1, 16, 16, 128>}]} {
    %c0_i32 = arith.constant 0 : i32
    %0 = arith.cmpi eq, %arg1, %c0_i32 : i32
    %1 = arith.extui %0 : i1 to i32
    %c0_i32_0 = arith.constant 0 : i32
    %2 = arith.cmpi ne, %1, %c0_i32_0 : i32
    scf.if %2 {
      %c0_38 = arith.constant 0 : index
      %c0_39 = arith.constant 0 : index
      %c0_40 = arith.constant 0 : index
      %c0_41 = arith.constant 0 : index
      %68 = vector.load %arg2[%c0_38, %c0_39, %c0_40, %c0_41] : memref<1x16x16x128xbf16, #tpu.memory_space<vmem>>, vector<1x16x16x128xbf16>
      %69 = vector.shape_cast %68 : vector<1x16x16x128xbf16> to vector<16x16x128xbf16>
      %cst_42 = arith.constant 0.000000e+00 : bf16
      %70 = vector.broadcast %cst_42 : bf16 to vector<16x1x128xbf16>
      %cst_43 = arith.constant 0.000000e+00 : bf16
      %71 = vector.broadcast %cst_43 : bf16 to vector<1x18x128xbf16>
      %72 = tpu.concatenate %70, %69, %70 in 1 : vector<16x1x128xbf16>, vector<16x16x128xbf16>, vector<16x1x128xbf16> -> vector<16x18x128xbf16>
      %73 = tpu.concatenate %71, %72, %71 in 0 : vector<1x18x128xbf16>, vector<16x18x128xbf16>, vector<1x18x128xbf16> -> vector<18x18x128xbf16>
      %c0_44 = arith.constant 0 : index
      %c0_45 = arith.constant 0 : index
      %c0_46 = arith.constant 0 : index
      %74 = vector.load %arg9[%c0_44, %c0_45, %c0_46] : memref<18x18x128xbf16, #tpu.memory_space<vmem>>, vector<18x18x128xbf16>
      tpu.vector_store %arg9[%c0_44, %c0_45, %c0_46], %73 {strides = array<i32>} : memref<18x18x128xbf16, #tpu.memory_space<vmem>>, vector<18x18x128xbf16>,
    } else {
    }
    %c0 = arith.constant 0 : index
    %c0_1 = arith.constant 0 : index
    %c0_2 = arith.constant 0 : index
    %3 = vector.load %arg9[%c0, %c0_1, %c0_2] : memref<18x18x128xbf16, #tpu.memory_space<vmem>>, vector<18x18x128xbf16>
    %cst = arith.constant 0.000000e+00 : f32
    %4 = vector.broadcast %cst : f32 to vector<256x128xf32>
    %5 = vector.extract_strided_slice %3 {offsets = [0, 0, 0], sizes = [16, 16, 128], strides = [1, 1, 1]} : vector<18x18x128xbf16> to vector<16x16x128xbf16>
    %6 = vector.shape_cast %5 : vector<16x16x128xbf16> to vector<256x128xbf16>
    %c0_3 = arith.constant 0 : index
    %c0_4 = arith.constant 0 : index
    %7 = vector.load %arg3[%c0_3, %c0_4] : memref<1152x128xbf16, #tpu.memory_space<vmem>>, vector<128x128xbf16>
    %cst_5 = arith.constant dense<0.000000e+00> : vector<256x128xf32>
    %8 = tpu.matmul %6, %7, %cst_5 {dimension_numbers = #tpu.dot_dimension_numbers<[1], [0], [0], [1], [0, 0, 1, 1], [], []>} : vector<256x128xbf16>, vector<128x128xbf16>, vector<256x128xf32> -> vector<256x128xf32>
    %9 = arith.addf %4, %8 : vector<256x128xf32>
    %10 = vector.extract_strided_slice %3 {offsets = [0, 1, 0], sizes = [16, 16, 128], strides = [1, 1, 1]} : vector<18x18x128xbf16> to vector<16x16x128xbf16>
    %11 = vector.shape_cast %10 : vector<16x16x128xbf16> to vector<256x128xbf16>
    %c128 = arith.constant 128 : index
    %c0_6 = arith.constant 0 : index
    %12 = vector.load %arg3[%c128, %c0_6] : memref<1152x128xbf16, #tpu.memory_space<vmem>>, vector<128x128xbf16>
    %cst_7 = arith.constant dense<0.000000e+00> : vector<256x128xf32>
    %13 = tpu.matmul %11, %12, %cst_7 {dimension_numbers = #tpu.dot_dimension_numbers<[1], [0], [0], [1], [0, 0, 1, 1], [], []>} : vector<256x128xbf16>, vector<128x128xbf16>, vector<256x128xf32> -> vector<256x128xf32>
    %14 = arith.addf %9, %13 : vector<256x128xf32>
    %15 = vector.extract_strided_slice %3 {offsets = [0, 2, 0], sizes = [16, 16, 128], strides = [1, 1, 1]} : vector<18x18x128xbf16> to vector<16x16x128xbf16>
    %16 = vector.shape_cast %15 : vector<16x16x128xbf16> to vector<256x128xbf16>
    %c256 = arith.constant 256 : index
    %c0_8 = arith.constant 0 : index
    %17 = vector.load %arg3[%c256, %c0_8] : memref<1152x128xbf16, #tpu.memory_space<vmem>>, vector<128x128xbf16>
    %cst_9 = arith.constant dense<0.000000e+00> : vector<256x128xf32>
    %18 = tpu.matmul %16, %17, %cst_9 {dimension_numbers = #tpu.dot_dimension_numbers<[1], [0], [0], [1], [0, 0, 1, 1], [], []>} : vector<256x128xbf16>, vector<128x128xbf16>, vector<256x128xf32> -> vector<256x128xf32>
    %19 = arith.addf %14, %18 : vector<256x128xf32>
    %20 = vector.extract_strided_slice %3 {offsets = [1, 0, 0], sizes = [16, 16, 128], strides = [1, 1, 1]} : vector<18x18x128xbf16> to vector<16x16x128xbf16>
    %21 = vector.shape_cast %20 : vector<16x16x128xbf16> to vector<256x128xbf16>
    %c384 = arith.constant 384 : index
    %c0_10 = arith.constant 0 : index
    %22 = vector.load %arg3[%c384, %c0_10] : memref<1152x128xbf16, #tpu.memory_space<vmem>>, vector<128x128xbf16>
    %cst_11 = arith.constant dense<0.000000e+00> : vector<256x128xf32>
    %23 = tpu.matmul %21, %22, %cst_11 {dimension_numbers = #tpu.dot_dimension_numbers<[1], [0], [0], [1], [0, 0, 1, 1], [], []>} : vector<256x128xbf16>, vector<128x128xbf16>, vector<256x128xf32> -> vector<256x128xf32>
    %24 = arith.addf %19, %23 : vector<256x128xf32>
    %25 = vector.extract_strided_slice %3 {offsets = [1, 1, 0], sizes = [16, 16, 128], strides = [1, 1, 1]} : vector<18x18x128xbf16> to vector<16x16x128xbf16>
    %26 = vector.shape_cast %25 : vector<16x16x128xbf16> to vector<256x128xbf16>
    %c512 = arith.constant 512 : index
    %c0_12 = arith.constant 0 : index
    %27 = vector.load %arg3[%c512, %c0_12] : memref<1152x128xbf16, #tpu.memory_space<vmem>>, vector<128x128xbf16>
    %cst_13 = arith.constant dense<0.000000e+00> : vector<256x128xf32>
    %28 = tpu.matmul %26, %27, %cst_13 {dimension_numbers = #tpu.dot_dimension_numbers<[1], [0], [0], [1], [0, 0, 1, 1], [], []>} : vector<256x128xbf16>, vector<128x128xbf16>, vector<256x128xf32> -> vector<256x128xf32>
    %29 = arith.addf %24, %28 : vector<256x128xf32>
    %30 = vector.extract_strided_slice %3 {offsets = [1, 2, 0], sizes = [16, 16, 128], strides = [1, 1, 1]} : vector<18x18x128xbf16> to vector<16x16x128xbf16>
    %31 = vector.shape_cast %30 : vector<16x16x128xbf16> to vector<256x128xbf16>
    %c640 = arith.constant 640 : index
    %c0_14 = arith.constant 0 : index
    %32 = vector.load %arg3[%c640, %c0_14] : memref<1152x128xbf16, #tpu.memory_space<vmem>>, vector<128x128xbf16>
    %cst_15 = arith.constant dense<0.000000e+00> : vector<256x128xf32>
    %33 = tpu.matmul %31, %32, %cst_15 {dimension_numbers = #tpu.dot_dimension_numbers<[1], [0], [0], [1], [0, 0, 1, 1], [], []>} : vector<256x128xbf16>, vector<128x128xbf16>, vector<256x128xf32> -> vector<256x128xf32>
    %34 = arith.addf %29, %33 : vector<256x128xf32>
    %35 = vector.extract_strided_slice %3 {offsets = [2, 0, 0], sizes = [16, 16, 128], strides = [1, 1, 1]} : vector<18x18x128xbf16> to vector<16x16x128xbf16>
    %36 = vector.shape_cast %35 : vector<16x16x128xbf16> to vector<256x128xbf16>
    %c768 = arith.constant 768 : index
    %c0_16 = arith.constant 0 : index
    %37 = vector.load %arg3[%c768, %c0_16] : memref<1152x128xbf16, #tpu.memory_space<vmem>>, vector<128x128xbf16>
    %cst_17 = arith.constant dense<0.000000e+00> : vector<256x128xf32>
    %38 = tpu.matmul %36, %37, %cst_17 {dimension_numbers = #tpu.dot_dimension_numbers<[1], [0], [0], [1], [0, 0, 1, 1], [], []>} : vector<256x128xbf16>, vector<128x128xbf16>, vector<256x128xf32> -> vector<256x128xf32>
    %39 = arith.addf %34, %38 : vector<256x128xf32>
    %40 = vector.extract_strided_slice %3 {offsets = [2, 1, 0], sizes = [16, 16, 128], strides = [1, 1, 1]} : vector<18x18x128xbf16> to vector<16x16x128xbf16>
    %41 = vector.shape_cast %40 : vector<16x16x128xbf16> to vector<256x128xbf16>
    %c896 = arith.constant 896 : index
    %c0_18 = arith.constant 0 : index
    %42 = vector.load %arg3[%c896, %c0_18] : memref<1152x128xbf16, #tpu.memory_space<vmem>>, vector<128x128xbf16>
    %cst_19 = arith.constant dense<0.000000e+00> : vector<256x128xf32>
    %43 = tpu.matmul %41, %42, %cst_19 {dimension_numbers = #tpu.dot_dimension_numbers<[1], [0], [0], [1], [0, 0, 1, 1], [], []>} : vector<256x128xbf16>, vector<128x128xbf16>, vector<256x128xf32> -> vector<256x128xf32>
    %44 = arith.addf %39, %43 : vector<256x128xf32>
    %45 = vector.extract_strided_slice %3 {offsets = [2, 2, 0], sizes = [16, 16, 128], strides = [1, 1, 1]} : vector<18x18x128xbf16> to vector<16x16x128xbf16>
    %46 = vector.shape_cast %45 : vector<16x16x128xbf16> to vector<256x128xbf16>
    %c1024 = arith.constant 1024 : index
    %c0_20 = arith.constant 0 : index
    %47 = vector.load %arg3[%c1024, %c0_20] : memref<1152x128xbf16, #tpu.memory_space<vmem>>, vector<128x128xbf16>
    %cst_21 = arith.constant dense<0.000000e+00> : vector<256x128xf32>
    %48 = tpu.matmul %46, %47, %cst_21 {dimension_numbers = #tpu.dot_dimension_numbers<[1], [0], [0], [1], [0, 0, 1, 1], [], []>} : vector<256x128xbf16>, vector<128x128xbf16>, vector<256x128xf32> -> vector<256x128xf32>
    %49 = arith.addf %44, %48 : vector<256x128xf32>
    %c0_22 = arith.constant 0 : index
    %c0_23 = arith.constant 0 : index
    %50 = vector.load %arg4[%c0_22, %c0_23] : memref<1x128xf32, #tpu.memory_space<vmem>>, vector<1x128xf32>
    %51 = vector.broadcast %50 : vector<1x128xf32> to vector<256x128xf32>
    %52 = arith.addf %49, %51 : vector<256x128xf32>
    %c0_24 = arith.constant 0 : index
    %c0_25 = arith.constant 0 : index
    %c0_26 = arith.constant 0 : index
    %c0_27 = arith.constant 0 : index
    %53 = vector.load %arg5[%c0_24, %c0_25, %c0_26, %c0_27] : memref<1x16x16x4xbf16, #tpu.memory_space<vmem>>, vector<1x16x16x4xbf16>
    %54 = vector.shape_cast %53 : vector<1x16x16x4xbf16> to vector<16x16x4xbf16>
    %55 = vector.shape_cast %54 : vector<16x16x4xbf16> to vector<256x4xbf16>
    %c0_28 = arith.constant 0 : index
    %c0_29 = arith.constant 0 : index
    %56 = vector.load %arg6[%c0_28, %c0_29] : memref<4x128xbf16, #tpu.memory_space<vmem>>, vector<4x128xbf16>
    %cst_30 = arith.constant dense<0.000000e+00> : vector<256x128xf32>
    %57 = tpu.matmul %55, %56, %cst_30 {dimension_numbers = #tpu.dot_dimension_numbers<[1], [0], [0], [1], [0, 0, 1, 1], [], []>} : vector<256x4xbf16>, vector<4x128xbf16>, vector<256x128xf32> -> vector<256x128xf32>
    %58 = arith.addf %52, %57 : vector<256x128xf32>
    %c0_31 = arith.constant 0 : index
    %c0_32 = arith.constant 0 : index
    %59 = vector.load %arg7[%c0_31, %c0_32] : memref<1x128xf32, #tpu.memory_space<vmem>>, vector<1x128xf32>
    %60 = vector.broadcast %59 : vector<1x128xf32> to vector<256x128xf32>
    %61 = arith.addf %58, %60 : vector<256x128xf32>
    %cst_33 = arith.constant 0.000000e+00 : f32
    %62 = vector.broadcast %cst_33 : f32 to vector<256x128xf32>
    %63 = arith.maximumf %61, %62 : vector<256x128xf32>
    %64 = vector.shape_cast %63 : vector<256x128xf32> to vector<16x16x128xf32>
    %c0_34 = arith.constant 0 : index
    %c0_35 = arith.constant 0 : index
    %c0_36 = arith.constant 0 : index
    %c0_37 = arith.constant 0 : index
    %65 = vector.load %arg8[%c0_34, %c0_35, %c0_36, %c0_37] : memref<1x16x16x128xf32, #tpu.memory_space<vmem>>, vector<1x16x16x128xf32>
    %66 = vector.shape_cast %65 : vector<1x16x16x128xf32> to vector<16x16x128xf32>
    %67 = vector.shape_cast %64 : vector<16x16x128xf32> to vector<1x16x16x128xf32>
    tpu.vector_store %arg8[%c0_34, %c0_35, %c0_36, %c0_37], %67 {strides = array<i32>} : memref<1x16x16x128xf32, #tpu.memory_space<vmem>>, vector<1x16x16x128xf32>,
    return
  }
  func.func @transform_0(%arg0: i32, %arg1: i32) -> (i32, i32, i32, i32) {
    %c0_i32 = arith.constant 0 : i32
    %c0_i32_0 = arith.constant 0 : i32
    %c0_i32_1 = arith.constant 0 : i32
    %c0_i32_2 = arith.constant 0 : i32
    return %arg0, %c0_i32, %c0_i32_0, %c0_i32_1 : i32, i32, i32, i32
  }
  func.func @transform_1(%arg0: i32, %arg1: i32) -> (i32, i32) {
    %c0_i32 = arith.constant 0 : i32
    %c0_i32_0 = arith.constant 0 : i32
    return %c0_i32, %arg1 : i32, i32
  }
  func.func @transform_2(%arg0: i32, %arg1: i32) -> (i32, i32) {
    %c0_i32 = arith.constant 0 : i32
    %c0_i32_0 = arith.constant 0 : i32
    return %c0_i32, %arg1 : i32, i32
  }
  func.func @transform_3(%arg0: i32, %arg1: i32) -> (i32, i32, i32, i32) {
    %c0_i32 = arith.constant 0 : i32
    %c0_i32_0 = arith.constant 0 : i32
    %c0_i32_1 = arith.constant 0 : i32
    %c0_i32_2 = arith.constant 0 : i32
    return %arg0, %c0_i32, %c0_i32_0, %c0_i32_1 : i32, i32, i32, i32
  }
  func.func @transform_4(%arg0: i32, %arg1: i32) -> (i32, i32) {
    %c0_i32 = arith.constant 0 : i32
    %c0_i32_0 = arith.constant 0 : i32
    return %c0_i32, %arg1 : i32, i32
  }
  func.func @transform_5(%arg0: i32, %arg1: i32) -> (i32, i32) {
    %c0_i32 = arith.constant 0 : i32
    %c0_i32_0 = arith.constant 0 : i32
    return %c0_i32, %arg1 : i32, i32
  }
  func.func @transform_6(%arg0: i32, %arg1: i32) -> (i32, i32, i32, i32) {
    %c0_i32 = arith.constant 0 : i32
    %c0_i32_0 = arith.constant 0 : i32
    %c0_i32_1 = arith.constant 0 : i32
    return %arg0, %c0_i32, %c0_i32_0, %arg1 : i32, i32, i32, i32
  }
}

module attributes {stable_mosaic.version = 11 : i64} {
  func.func @kernel(%arg0: i32, %arg1: i32, %arg2: memref<1x16x16x4xbf16, #tpu.memory_space<vmem>>, %arg3: memref<36x128xbf16, #tpu.memory_space<vmem>>, %arg4: memref<1x128xf32, #tpu.memory_space<vmem>>, %arg5: memref<1x16x16x128xbf16, #tpu.memory_space<vmem>>, %arg6: memref<18x18x4xbf16, #tpu.memory_space<vmem>>) attributes {dimension_semantics = [#tpu.dimension_semantics<parallel>, #tpu.dimension_semantics<arbitrary>], iteration_bounds = array<i64: 2, 1>, scalar_prefetch = 0 : i64, scratch_operands = 1 : i64, tpu.core_type = #tpu.core_type<tc>, window_params = [{transform_indices = @transform_0, window_bounds = array<i64: 1, 16, 16, 4>}, {transform_indices = @transform_1, window_bounds = array<i64: 36, 128>}, {transform_indices = @transform_2, window_bounds = array<i64: 1, 128>}, {transform_indices = @transform_3, window_bounds = array<i64: 1, 16, 16, 128>}]} {
    %c0_i32 = arith.constant 0 : i32
    %0 = arith.cmpi eq, %arg1, %c0_i32 : i32
    %1 = arith.extui %0 : i1 to i32
    %c0_i32_0 = arith.constant 0 : i32
    %2 = arith.cmpi ne, %1, %c0_i32_0 : i32
    scf.if %2 {
      %c0_29 = arith.constant 0 : index
      %c0_30 = arith.constant 0 : index
      %c0_31 = arith.constant 0 : index
      %c0_32 = arith.constant 0 : index
      %60 = vector.load %arg2[%c0_29, %c0_30, %c0_31, %c0_32] : memref<1x16x16x4xbf16, #tpu.memory_space<vmem>>, vector<1x16x16x4xbf16>
      %61 = vector.shape_cast %60 : vector<1x16x16x4xbf16> to vector<16x16x4xbf16>
      %cst_33 = arith.constant 0.000000e+00 : bf16
      %62 = vector.broadcast %cst_33 : bf16 to vector<16x1x4xbf16>
      %cst_34 = arith.constant 0.000000e+00 : bf16
      %63 = vector.broadcast %cst_34 : bf16 to vector<1x18x4xbf16>
      %64 = tpu.concatenate %62, %61, %62 in 1 : vector<16x1x4xbf16>, vector<16x16x4xbf16>, vector<16x1x4xbf16> -> vector<16x18x4xbf16>
      %65 = tpu.concatenate %63, %64, %63 in 0 : vector<1x18x4xbf16>, vector<16x18x4xbf16>, vector<1x18x4xbf16> -> vector<18x18x4xbf16>
      %c0_35 = arith.constant 0 : index
      %c0_36 = arith.constant 0 : index
      %c0_37 = arith.constant 0 : index
      %66 = vector.load %arg6[%c0_35, %c0_36, %c0_37] : memref<18x18x4xbf16, #tpu.memory_space<vmem>>, vector<18x18x4xbf16>
      tpu.vector_store %arg6[%c0_35, %c0_36, %c0_37], %65 {strides = array<i32>} : memref<18x18x4xbf16, #tpu.memory_space<vmem>>, vector<18x18x4xbf16>,
    } else {
    }
    %c0 = arith.constant 0 : index
    %c0_1 = arith.constant 0 : index
    %c0_2 = arith.constant 0 : index
    %3 = vector.load %arg6[%c0, %c0_1, %c0_2] : memref<18x18x4xbf16, #tpu.memory_space<vmem>>, vector<18x18x4xbf16>
    %cst = arith.constant 0.000000e+00 : f32
    %4 = vector.broadcast %cst : f32 to vector<256x128xf32>
    %5 = vector.extract_strided_slice %3 {offsets = [0, 0, 0], sizes = [16, 16, 4], strides = [1, 1, 1]} : vector<18x18x4xbf16> to vector<16x16x4xbf16>
    %6 = vector.shape_cast %5 : vector<16x16x4xbf16> to vector<256x4xbf16>
    %c0_3 = arith.constant 0 : index
    %c0_4 = arith.constant 0 : index
    %7 = vector.load %arg3[%c0_3, %c0_4] : memref<36x128xbf16, #tpu.memory_space<vmem>>, vector<4x128xbf16>
    %cst_5 = arith.constant dense<0.000000e+00> : vector<256x128xf32>
    %8 = tpu.matmul %6, %7, %cst_5 {dimension_numbers = #tpu.dot_dimension_numbers<[1], [0], [0], [1], [0, 0, 1, 1], [], []>} : vector<256x4xbf16>, vector<4x128xbf16>, vector<256x128xf32> -> vector<256x128xf32>
    %9 = arith.addf %4, %8 : vector<256x128xf32>
    %10 = vector.extract_strided_slice %3 {offsets = [0, 1, 0], sizes = [16, 16, 4], strides = [1, 1, 1]} : vector<18x18x4xbf16> to vector<16x16x4xbf16>
    %11 = vector.shape_cast %10 : vector<16x16x4xbf16> to vector<256x4xbf16>
    %c4 = arith.constant 4 : index
    %c0_6 = arith.constant 0 : index
    %12 = vector.load %arg3[%c4, %c0_6] : memref<36x128xbf16, #tpu.memory_space<vmem>>, vector<4x128xbf16>
    %cst_7 = arith.constant dense<0.000000e+00> : vector<256x128xf32>
    %13 = tpu.matmul %11, %12, %cst_7 {dimension_numbers = #tpu.dot_dimension_numbers<[1], [0], [0], [1], [0, 0, 1, 1], [], []>} : vector<256x4xbf16>, vector<4x128xbf16>, vector<256x128xf32> -> vector<256x128xf32>
    %14 = arith.addf %9, %13 : vector<256x128xf32>
    %15 = vector.extract_strided_slice %3 {offsets = [0, 2, 0], sizes = [16, 16, 4], strides = [1, 1, 1]} : vector<18x18x4xbf16> to vector<16x16x4xbf16>
    %16 = vector.shape_cast %15 : vector<16x16x4xbf16> to vector<256x4xbf16>
    %c8 = arith.constant 8 : index
    %c0_8 = arith.constant 0 : index
    %17 = vector.load %arg3[%c8, %c0_8] : memref<36x128xbf16, #tpu.memory_space<vmem>>, vector<4x128xbf16>
    %cst_9 = arith.constant dense<0.000000e+00> : vector<256x128xf32>
    %18 = tpu.matmul %16, %17, %cst_9 {dimension_numbers = #tpu.dot_dimension_numbers<[1], [0], [0], [1], [0, 0, 1, 1], [], []>} : vector<256x4xbf16>, vector<4x128xbf16>, vector<256x128xf32> -> vector<256x128xf32>
    %19 = arith.addf %14, %18 : vector<256x128xf32>
    %20 = vector.extract_strided_slice %3 {offsets = [1, 0, 0], sizes = [16, 16, 4], strides = [1, 1, 1]} : vector<18x18x4xbf16> to vector<16x16x4xbf16>
    %21 = vector.shape_cast %20 : vector<16x16x4xbf16> to vector<256x4xbf16>
    %c12 = arith.constant 12 : index
    %c0_10 = arith.constant 0 : index
    %22 = vector.load %arg3[%c12, %c0_10] : memref<36x128xbf16, #tpu.memory_space<vmem>>, vector<4x128xbf16>
    %cst_11 = arith.constant dense<0.000000e+00> : vector<256x128xf32>
    %23 = tpu.matmul %21, %22, %cst_11 {dimension_numbers = #tpu.dot_dimension_numbers<[1], [0], [0], [1], [0, 0, 1, 1], [], []>} : vector<256x4xbf16>, vector<4x128xbf16>, vector<256x128xf32> -> vector<256x128xf32>
    %24 = arith.addf %19, %23 : vector<256x128xf32>
    %25 = vector.extract_strided_slice %3 {offsets = [1, 1, 0], sizes = [16, 16, 4], strides = [1, 1, 1]} : vector<18x18x4xbf16> to vector<16x16x4xbf16>
    %26 = vector.shape_cast %25 : vector<16x16x4xbf16> to vector<256x4xbf16>
    %c16 = arith.constant 16 : index
    %c0_12 = arith.constant 0 : index
    %27 = vector.load %arg3[%c16, %c0_12] : memref<36x128xbf16, #tpu.memory_space<vmem>>, vector<4x128xbf16>
    %cst_13 = arith.constant dense<0.000000e+00> : vector<256x128xf32>
    %28 = tpu.matmul %26, %27, %cst_13 {dimension_numbers = #tpu.dot_dimension_numbers<[1], [0], [0], [1], [0, 0, 1, 1], [], []>} : vector<256x4xbf16>, vector<4x128xbf16>, vector<256x128xf32> -> vector<256x128xf32>
    %29 = arith.addf %24, %28 : vector<256x128xf32>
    %30 = vector.extract_strided_slice %3 {offsets = [1, 2, 0], sizes = [16, 16, 4], strides = [1, 1, 1]} : vector<18x18x4xbf16> to vector<16x16x4xbf16>
    %31 = vector.shape_cast %30 : vector<16x16x4xbf16> to vector<256x4xbf16>
    %c20 = arith.constant 20 : index
    %c0_14 = arith.constant 0 : index
    %32 = vector.load %arg3[%c20, %c0_14] : memref<36x128xbf16, #tpu.memory_space<vmem>>, vector<4x128xbf16>
    %cst_15 = arith.constant dense<0.000000e+00> : vector<256x128xf32>
    %33 = tpu.matmul %31, %32, %cst_15 {dimension_numbers = #tpu.dot_dimension_numbers<[1], [0], [0], [1], [0, 0, 1, 1], [], []>} : vector<256x4xbf16>, vector<4x128xbf16>, vector<256x128xf32> -> vector<256x128xf32>
    %34 = arith.addf %29, %33 : vector<256x128xf32>
    %35 = vector.extract_strided_slice %3 {offsets = [2, 0, 0], sizes = [16, 16, 4], strides = [1, 1, 1]} : vector<18x18x4xbf16> to vector<16x16x4xbf16>
    %36 = vector.shape_cast %35 : vector<16x16x4xbf16> to vector<256x4xbf16>
    %c24 = arith.constant 24 : index
    %c0_16 = arith.constant 0 : index
    %37 = vector.load %arg3[%c24, %c0_16] : memref<36x128xbf16, #tpu.memory_space<vmem>>, vector<4x128xbf16>
    %cst_17 = arith.constant dense<0.000000e+00> : vector<256x128xf32>
    %38 = tpu.matmul %36, %37, %cst_17 {dimension_numbers = #tpu.dot_dimension_numbers<[1], [0], [0], [1], [0, 0, 1, 1], [], []>} : vector<256x4xbf16>, vector<4x128xbf16>, vector<256x128xf32> -> vector<256x128xf32>
    %39 = arith.addf %34, %38 : vector<256x128xf32>
    %40 = vector.extract_strided_slice %3 {offsets = [2, 1, 0], sizes = [16, 16, 4], strides = [1, 1, 1]} : vector<18x18x4xbf16> to vector<16x16x4xbf16>
    %41 = vector.shape_cast %40 : vector<16x16x4xbf16> to vector<256x4xbf16>
    %c28 = arith.constant 28 : index
    %c0_18 = arith.constant 0 : index
    %42 = vector.load %arg3[%c28, %c0_18] : memref<36x128xbf16, #tpu.memory_space<vmem>>, vector<4x128xbf16>
    %cst_19 = arith.constant dense<0.000000e+00> : vector<256x128xf32>
    %43 = tpu.matmul %41, %42, %cst_19 {dimension_numbers = #tpu.dot_dimension_numbers<[1], [0], [0], [1], [0, 0, 1, 1], [], []>} : vector<256x4xbf16>, vector<4x128xbf16>, vector<256x128xf32> -> vector<256x128xf32>
    %44 = arith.addf %39, %43 : vector<256x128xf32>
    %45 = vector.extract_strided_slice %3 {offsets = [2, 2, 0], sizes = [16, 16, 4], strides = [1, 1, 1]} : vector<18x18x4xbf16> to vector<16x16x4xbf16>
    %46 = vector.shape_cast %45 : vector<16x16x4xbf16> to vector<256x4xbf16>
    %c32 = arith.constant 32 : index
    %c0_20 = arith.constant 0 : index
    %47 = vector.load %arg3[%c32, %c0_20] : memref<36x128xbf16, #tpu.memory_space<vmem>>, vector<4x128xbf16>
    %cst_21 = arith.constant dense<0.000000e+00> : vector<256x128xf32>
    %48 = tpu.matmul %46, %47, %cst_21 {dimension_numbers = #tpu.dot_dimension_numbers<[1], [0], [0], [1], [0, 0, 1, 1], [], []>} : vector<256x4xbf16>, vector<4x128xbf16>, vector<256x128xf32> -> vector<256x128xf32>
    %49 = arith.addf %44, %48 : vector<256x128xf32>
    %c0_22 = arith.constant 0 : index
    %c0_23 = arith.constant 0 : index
    %50 = vector.load %arg4[%c0_22, %c0_23] : memref<1x128xf32, #tpu.memory_space<vmem>>, vector<1x128xf32>
    %51 = vector.broadcast %50 : vector<1x128xf32> to vector<256x128xf32>
    %52 = arith.addf %49, %51 : vector<256x128xf32>
    %cst_24 = arith.constant 0.000000e+00 : f32
    %53 = vector.broadcast %cst_24 : f32 to vector<256x128xf32>
    %54 = arith.maximumf %52, %53 : vector<256x128xf32>
    %55 = vector.shape_cast %54 : vector<256x128xf32> to vector<16x16x128xf32>
    %56 = arith.truncf %55 : vector<16x16x128xf32> to vector<16x16x128xbf16>
    %c0_25 = arith.constant 0 : index
    %c0_26 = arith.constant 0 : index
    %c0_27 = arith.constant 0 : index
    %c0_28 = arith.constant 0 : index
    %57 = vector.load %arg5[%c0_25, %c0_26, %c0_27, %c0_28] : memref<1x16x16x128xbf16, #tpu.memory_space<vmem>>, vector<1x16x16x128xbf16>
    %58 = vector.shape_cast %57 : vector<1x16x16x128xbf16> to vector<16x16x128xbf16>
    %59 = vector.shape_cast %56 : vector<16x16x128xbf16> to vector<1x16x16x128xbf16>
    tpu.vector_store %arg5[%c0_25, %c0_26, %c0_27, %c0_28], %59 {strides = array<i32>} : memref<1x16x16x128xbf16, #tpu.memory_space<vmem>>, vector<1x16x16x128xbf16>,
    return
  }
  func.func @transform_0(%arg0: i32, %arg1: i32) -> (i32, i32, i32, i32) {
    %c0_i32 = arith.constant 0 : i32
    %c0_i32_0 = arith.constant 0 : i32
    %c0_i32_1 = arith.constant 0 : i32
    %c0_i32_2 = arith.constant 0 : i32
    return %arg0, %c0_i32, %c0_i32_0, %c0_i32_1 : i32, i32, i32, i32
  }
  func.func @transform_1(%arg0: i32, %arg1: i32) -> (i32, i32) {
    %c0_i32 = arith.constant 0 : i32
    %c0_i32_0 = arith.constant 0 : i32
    return %c0_i32, %arg1 : i32, i32
  }
  func.func @transform_2(%arg0: i32, %arg1: i32) -> (i32, i32) {
    %c0_i32 = arith.constant 0 : i32
    %c0_i32_0 = arith.constant 0 : i32
    return %c0_i32, %arg1 : i32, i32
  }
  func.func @transform_3(%arg0: i32, %arg1: i32) -> (i32, i32, i32, i32) {
    %c0_i32 = arith.constant 0 : i32
    %c0_i32_0 = arith.constant 0 : i32
    %c0_i32_1 = arith.constant 0 : i32
    return %arg0, %c0_i32, %c0_i32_0, %arg1 : i32, i32, i32, i32
  }
}

</mosaic_0001>

<bundles_post_ra>
// kernel: basic_block_forward.2
= control target key start
LH: loop header
LB: loop body
LE: loop exit
PB: predicated region body
PF: predicated region fallthrough
CT: control target
= control target key end

     0   :  { %8 = vsyncpa [#allocation4], 0  ;;  %s6442_s0 = inlined_call_operand.vmem [shape: bf16[2,16,16,4], index: 0, kind: input, shape index: {}]   ;;  %s6443_s1 = inlined_call_operand.hbm [shape: bf16[36,128], index: 1, kind: input, shape index: {}]   ;;  %s6444_s2 = inlined_call_operand.hbm [shape: f32[1,128], index: 2, kind: input, shape index: {}]   ;;  %s6445_s3 = inlined_call_operand.vmem [shape: bf16[2,16,16,128], index: 3, kind: output, shape index: {}]  }
   0x1   :  { %9 = vsyncpa [#allocation6], 0  ;;  %s5207_s12 = smov 0   ;;  %s5209_s13 = smov 0  }
   0x2   :  { %s5211_s14 = smov 0  }
   0x3 LB: > { %s3826_s15 = sadd.s32 4294967295, %s5180_s14   ;;  %s27_s16 = sadd.s32 1, %s5176_s13  ;;  %s5180_s14 = sphi %s5211_s14, %s15_s14   ;;  %s5176_s13 = sphi %s5209_s13, %s6510_s13   ;;  %s5172_s12 = sphi %s5207_s12, %s6509_s12  }
   0x4   : > { %p29_p0 = scmp.ge.s32.totalorder %s27_s16, 2  ;;  %p3828_p1 = scmp.ge.s32.totalorder %s5180_s14, 1 }
   0x5   : > { %p138_p2 = scmp.lt.s32.totalorder %s5180_s14, 3  ;;  %p5232_p4 = scmp.eq.s32.totalorder %s3826_s15, 0 }
   0x6   : > { %s6512_s16 = smov (%p29_p0, %s27_s16), 0  ;;  %s5182_s19 = smov [#allocation3]  }
   0x7   : > { %p5228_p3 = pnand %p3828_p1, %p138_p2  ;;  %s152_s20 = sshll.u32 %s5182_s19, 4  ;;  %s153_s20 = int_to_ptr.vmem [resolvable:$true] %s152_s20 }
   0x8   : > { %s6471_s18 = scalar_select %p5232_p4, 1, 0 }
   0x9   : > { %s6470_s17 = scalar_select %p5228_p3, 1, 0 }
   0xa   : > { %p5024_p5 = pneg %p5228_p3  ;;  %s5183_s22 = smov [#allocation5]  }
   0xb   : > { %s168_s23 = sshll.u32 %s5183_s22, 4  ;;  %s5094_s26 = scalar_lea.hbm %s6443_s1, 320  ;;  %s5244_s23 = int_to_ptr.vmem [resolvable:$true] %s168_s23 }
   0xc   : > { %p5240_p6 = pnand %p5232_p4, %p5024_p5  ;;  %p5095_p7 = scmp.ne.s32.totalorder %s6443_s1, %s5094_s26 }
   0xd   : > { %p5101_p11 = scmp.lt.u32.totalorder %s5094_s26, %s6443_s1 }
   0xe   : > { %p5096_p8 = pneg %p5240_p6 }
  0x10   : > { %p5097_p9 = pnand %p5096_p8, %p5095_p7 }
  0x12   : > { %p5098_p10 = pneg %p5097_p9 }
  0x14   : > { %p5103_p12 = pnand %p5101_p11, %p5098_p10 }
  0x16   : > { %5106 = shalt.err (!%p5103_p12)
}
  0x17   : > { %s5107_s4 = scalar_lea.vmem %s153_s20, 320  ;;  %p5115_p2 = scmp.lt.s32.totalorder %s153_s20, %s153_s20 }
  0x18   : > { %p5108_p13 = scmp.ne.s32.totalorder %s153_s20, %s5107_s4  ;;  %p5116_p5 = scmp.lt.s32.totalorder %s5107_s4, %s5107_s4 }
  0x1a   : > { %p5110_p0 = pnand %p5108_p13, %p5096_p8  ;;  %p5117_p4 = por %p5116_p5, %p5115_p2 }
  0x1c   : > { %p5111_p1 = pneg %p5110_p0 }
  0x1e   : > { %p5118_p3 = pnand %p5117_p4, %p5111_p1 }
  0x20   : > { %5121 = shalt.err (!%p5118_p3)
}
  0x21   : > { %s5184_s5 = smov 64   ;;  %s5185_s6 = smov 4  }
  0x22   : > { %5027 = dma.hbm_to_vmem [thread:$0]  (!%p5240_p6), %s6443_s1, 320, %s153_s20, [#allocation4], %s5184_s5, %s5184_s5, %s5185_s6  }
  0x23   : > { %s5122_s11 = scalar_lea.hbm %s6444_s2, 16 }
  0x24   : > { %p5123_p7 = scmp.ne.s32.totalorder %s6444_s2, %s5122_s11  ;;  %p5129_p9 = scmp.lt.u32.totalorder %s5122_s11, %s6444_s2 }
  0x26   : > { %p5125_p3 = pnand %p5123_p7, %p5096_p8 }
  0x28   : > { %p5126_p4 = pneg %p5125_p3 }
  0x2a   : > { %p5131_p10 = pnand %p5129_p9, %p5126_p4 }
  0x2c   : > { %5134 = shalt.err (!%p5131_p10)
}
  0x2d   : > { %s5135_s20 = scalar_lea.vmem %s5244_s23, 16  ;;  %s5142_s25 = scalar_lea.vmem %s5244_s23, 32 }
  0x2e   : > { %p5136_p11 = scmp.ne.s32.totalorder %s5244_s23, %s5135_s20  ;;  %p5143_p0 = scmp.lt.s32.totalorder %s5244_s23, %s5244_s23 }
  0x2f   : > { %p5144_p1 = scmp.lt.s32.totalorder %s5142_s25, %s5135_s20 }
  0x30   : > { %p5138_p12 = pnand %p5136_p11, %p5096_p8 }
  0x31   : > { %p5145_p2 = por %p5144_p1, %p5143_p0 }
  0x32   : > { %p5139_p13 = pneg %p5138_p12 }
  0x34   : > { %p5146_p5 = pnand %p5145_p2, %p5139_p13 }
  0x36   : > { %5149 = shalt.err (!%p5146_p5)
}
  0x37   : > { %5030 = dma.hbm_to_vmem [thread:$0]  (!%p5240_p6), %s6444_s2, 16, %s5244_s23, [#allocation6]  }
  0x38   : > { %p6473_p7 = scmp.ne.s32.totalorder %s6470_s17, 0 }
  0x3a   : > { %189 = sbr.rel (%p6473_p7) target bundleno = 659 (0x293), region = 32 }
  0x41   : > { %p6474_p8 = scmp.ne.s32.totalorder %s6471_s18, 0 }
  0x43   : > { %5163 = dma.done.wait (%p6474_p8), [#allocation4], 320  }
  0x44   : > { %5165 = vsyncadd (%p6474_p8), [#allocation4], 4294966976 }
  0x45   : > { %5167 = dma.done.wait (%p6474_p8), [#allocation6], 16  }
  0x46   : > { %5169 = vsyncadd (%p6474_p8), [#allocation6], 4294967280  ;;  %vm712_vm0 = vcmask 27648   ;;  %vm715_vm1 = vcmask 24576   ;;  %v5186_v0 = vmov 0   ;;  %p220_p6 = scmp.lt.s32.totalorder %s5172_s12, 1 }
  0x47   : > { %v3855_v1 = vcombine.low %v5186_v0, %v5186_v0  ;;  %v3856_v2 = vcombine.high %v5186_v0, %v5186_v0  ;;  %vm823_vm2 = vsmask.f32 3328  ;;  %vm1312_vm3 = vcmask 1041408   ;;  %v5064_v3 = vld [vmem:[#allocation3] ss:$0 sps:$4 sm:$0xcc]  }
  0x48   : > { %s6514_s12 = smov (!%p220_p6, %s5172_s12), 1  ;;  %vm824_vm4 = vsmask.f32 7440  ;;  %vm494_vm5 = vcmask 1040384   ;;  %vm495_vm6 = vsmask.f32 256 }
  0x49   : > { %713 = vst.msk [vmem:[#allocation2] sm:$0xf] %vm712_vm0, %v3855_v1  ;;  %714 = vst.msk [vmem:[#allocation2 + $0x4] sm:$0xf] %vm712_vm0, %v3856_v2  ;;  %s4160_s17 = sshll.u32 %s6514_s12, 7  ;;  %v1262_v6 = vrot.slane %v5064_v3, 2 }
  0x4a   : > { %716 = vst.msk [vmem:[#allocation2 + $0x8] sm:$0x1] %vm715_vm1, %v3855_v1  ;;  %767 = vst.msk [vmem:[#allocation2 + $0xd4] sm:$0x1] %vm715_vm1, %v3855_v1  ;;  %s5320_s23 = scalar_lea.vmem %s6442_s0, %s4160_s17  ;;  %v2426_v5 = vld [vmem:[#allocation3 + $0x8] sm:$0x3]  ;;  %s6383_s30 = scalar_lea.vmem %s6445_s3, %s4160_s17 }
  0x4b   : > { %765 = vst.msk [vmem:[#allocation2 + $0xcc] sm:$0xf] %vm712_vm0, %v3855_v1  ;;  %766 = vst.msk [vmem:[#allocation2 + $0xd0] sm:$0xf] %vm712_vm0, %v3856_v2  ;;  %v5065_v4 = vld [vmem:[%s5320_s23] sm:$0xff]   ;;  %5010 = vmatprep.subr.msk.bf16.mxu0 %vm1312_vm3, %v2426_v5  ;;  %v5325_v7 = vsel %vm1312_vm3, %v2426_v5, 0  ;;  %5006 = vmatprep.subr.msk.bf16.mxu1 %vm1312_vm3, %v1262_v6 }
  0x4c   : > { %6475 = vst [vmem:[#allocation9_spill] sm:$0xff] %v5325_v7  ;;  %v351_v8 = vshrl.u32 %v5065_v4, 16  ;;  %v354_v9 = vshll.u32 %v5065_v4, 16  ;;  %v5327_v10 = vld [vmem:[#allocation3] sm:$0x3]  ;;  %4579 = vmatpush3.bf16.msra.mxu0 %v5325_v7  ;;  %v1314_v14 = vsel %vm1312_vm3, %v1262_v6, 0  ;;  %vm5334_vm7 = vmand %vm494_vm5, %vm495_vm6 }
  0x4d   : > { %4443 = vmatpush3.bf16.msra.mxu1 %v1314_v14  ;;  %v5340_v25 = vld [vmem:[#allocation3 + $0x8] ss:$0 sps:$4 sm:$0xcc]   ;;  %v5067_v29 = vld [vmem:[%s5320_s23 + $0x8] sm:$0xff]   ;;  %vm5348_vm8 = vmor %vm823_vm2, %vm824_vm4  ;;  %vm1263_vm9 = vcmask 31744   ;;  %vm1785_vm10 = vcmask 1042432  }
  0x4e   : > { %v353_v20 = vrot.slane %v351_v8, 7  ;;  %5007 = vmatprep.subr.msk.bf16.mxu1 %vm1312_vm3, %v5327_v10  ;;  %v2644_v33 = vrot.slane %v5340_v25, 2  ;;  %v358_v37 = vshrl.u32 %v5067_v29, 16  ;;  %v361_v38 = vshll.u32 %v5067_v29, 16  ;;  %v5068_v39 = vld [vmem:[%s5320_s23 + $0x10] sm:$0xff]   ;;  %v5069_v43 = vld [vmem:[%s5320_s23 + $0x18] sm:$0xff]  }
  0x4f   : > { %v5070_v44 = vld [vmem:[%s5320_s23 + $0x20] sm:$0xff]   ;;  %v365_v47 = vshrl.u32 %v5068_v39, 16  ;;  %v368_v48 = vshll.u32 %v5068_v39, 16  ;;  %v372_v50 = vshrl.u32 %v5069_v43, 16  ;;  %v375_v51 = vshll.u32 %v5069_v43, 16 }
  0x50   : > { %v768_v11 = vld [vmem:[#allocation2] sm:$0xf]  ;;  %v769_v12 = vld [vmem:[#allocation2 + $0x4] sm:$0xf]  ;;  %v356_v27 = vor.u32 %v354_v9, %v353_v20  ;;  %v513_v28 = vsel %vm5334_vm7, %v353_v20, 0  ;;  %5012 = vmatprep.subr.msk.bf16.mxu0 %vm1312_vm3, %v2644_v33  ;;  %v360_v46 = vrot.slane %v358_v37, 7 }
  0x51   : > { %v770_v13 = vld [vmem:[#allocation2 + $0x8] sm:$0x1]  ;;  %v827_v15 = vshrl.u32 %v768_v11, 16  ;;  %v830_v16 = vshll.u32 %v768_v11, 16  ;;  %v836_v17 = vshll.u32 %v769_v12, 16  ;;  %v840_v18 = vshrl.u32 %v769_v12, 16 }
  0x52   : > { %v846_v19 = vshll.u32 %v770_v13, 16  ;;  %v3859_v32 = vcombine.low %v513_v28, %v513_v28  ;;  %v497_v36 = vsel %vm5334_vm7, 0, %v356_v27  ;;  %v379_v52 = vshrl.u32 %v5070_v44, 16 }
  0x53   : > { %v829_v21 = vrot.slane %v827_v15, 4  ;;  %v832_v22 = vrot.slane %v830_v16, 5  ;;  %v838_v23 = vrot.slane %v836_v17, 5  ;;  %v842_v26 = vrot.slane %v840_v18, 4  ;;  %v5390_v16 = vld [vmem:[%s5320_s23 + $0x28] sm:$0xff]  }
  0x54   : > { %v848_v31 = vrot.slane %v846_v19, 5  ;;  %v3857_v41 = vcombine.low %v497_v36, %v497_v36  ;;  %v3858_v42 = vcombine.high %v497_v36, %v497_v36  ;;  %719 = vst.msk [vmem:[#allocation2 + $0x14] sm:$0x1] %vm715_vm1, %v3859_v32  ;;  %v363_v54 = vor.u32 %v361_v38, %v360_v46 }
  0x55   : > { %v833_v30 = vor.u32 %v832_v22, %v829_v21  ;;  %v843_v35 = vor.u32 %v842_v26, %v838_v23  ;;  %v514_v55 = vsel %vm5334_vm7, %v360_v46, 0  ;;  %v367_v56 = vrot.slane %v365_v47, 7 }
  0x56   : > { %717 = vst.msk [vmem:[#allocation2 + $0xc] sm:$0xf] %vm712_vm0, %v3857_v41  ;;  %718 = vst.msk [vmem:[#allocation2 + $0x10] sm:$0xf] %vm712_vm0, %v3858_v42  ;;  %v3862_v58 = vcombine.low %v514_v55, %v514_v55  ;;  %v374_v59 = vrot.slane %v372_v50, 7  ;;  %v381_v60 = vrot.slane %v379_v52, 7 }
  0x57   : > { %v834_v40 = vrot.slane %v833_v30, 4  ;;  %v844_v45 = vrot.slane %v843_v35, 4  ;;  %v498_v61 = vsel %vm5334_vm7, 0, %v363_v54  ;;  %v370_v62 = vor.u32 %v368_v48, %v367_v56 }
  0x58   : > { %v515_v63 = vsel %vm5334_vm7, %v367_v56, 0  ;;  %v382_v0 = vshll.u32 %v5070_v44, 16  ;;  %v3860_v1 = vcombine.low %v498_v61, %v498_v61  ;;  %v3861_v2 = vcombine.high %v498_v61, %v498_v61  ;;  %722 = vst.msk [vmem:[#allocation2 + $0x20] sm:$0x1] %vm715_vm1, %v3862_v58 }
  0x59   : > { %v839_v49 = vsel %vm5348_vm8, %v834_v40, %v838_v23  ;;  %v849_v53 = vsel %vm5348_vm8, %v844_v45, %v848_v31  ;;  %v3865_v3 = vcombine.low %v515_v63, %v515_v63  ;;  %v377_v4 = vor.u32 %v375_v51, %v374_v59  ;;  %v5399_v23 = vld [vmem:[%s5320_s23 + $0x30] sm:$0xff]  }
  0x5a   : > { %v3905_v57 = vcombine.low %v839_v49, %v849_v53  ;;  %v499_v6 = vsel %vm5334_vm7, 0, %v370_v62  ;;  %v516_v8 = vsel %vm5334_vm7, %v374_v59, 0  ;;  %v384_v9 = vor.u32 %v382_v0, %v381_v60  ;;  %720 = vst.msk [vmem:[#allocation2 + $0x18] sm:$0xf] %vm712_vm0, %v3860_v1  ;;  %721 = vst.msk [vmem:[#allocation2 + $0x1c] sm:$0xf] %vm712_vm0, %v3861_v2 }
  0x5b   : > { %v5375_v5 = vld [vmem:[#allocation2 + $0x14] sm:$0x1]  ;;  %v517_v11 = vsel %vm5334_vm7, %v381_v60, 0  ;;  %v3863_v13 = vcombine.low %v499_v6, %v499_v6  ;;  %v3864_v14 = vcombine.high %v499_v6, %v499_v6  ;;  %725 = vst.msk [vmem:[#allocation2 + $0x2c] sm:$0x1] %vm715_vm1, %v3865_v3  ;;  %v500_v15 = vsel %vm5334_vm7, 0, %v377_v4 }
  0x5c   : > { %4444 = vmatprep.mubr.msk.bf16.mxu1 %vm1263_vm9, %v3905_v57  ;;  %v870_v12 = vshll.u32 %v5375_v5, 16  ;;  %v3866_v19 = vcombine.low %v500_v15, %v500_v15  ;;  %v3867_v20 = vcombine.high %v500_v15, %v500_v15  ;;  %v3868_v21 = vcombine.low %v516_v8, %v516_v8 }
  0x5d   : > { %v5392_v17 = vld [vmem:[#allocation2 + $0xc] sm:$0xf]  ;;  %v5394_v18 = vld [vmem:[#allocation2 + $0x10] sm:$0xf]  ;;  %v501_v22 = vsel %vm5334_vm7, 0, %v384_v9  ;;  %v1606_v30 = vsel %vm1312_vm3, %v5327_v10, 0  ;;  %v3871_v35 = vcombine.low %v517_v11, %v517_v11 }
  0x5e   : > { %v851_v26 = vshrl.u32 %v5392_v17, 16  ;;  %v854_v27 = vshll.u32 %v5392_v17, 16  ;;  %v860_v28 = vshll.u32 %v5394_v18, 16  ;;  %v864_v29 = vshrl.u32 %v5394_v18, 16  ;;  %723 = vst.msk [vmem:[#allocation2 + $0x24] sm:$0xf] %vm712_vm0, %v3863_v13 }
  0x5f   : > { %724 = vst.msk [vmem:[#allocation2 + $0x28] sm:$0xf] %vm712_vm0, %v3864_v14  ;;  %726 = vst.msk [vmem:[#allocation2 + $0x30] sm:$0xf] %vm712_vm0, %v3866_v19  ;;  %v3869_v31 = vcombine.low %v501_v22, %v501_v22  ;;  %v3870_v32 = vcombine.high %v501_v22, %v501_v22  ;;  %v872_v40 = vrot.slane %v870_v12, 5  ;;  %v5417_v10 = vsel %vm1312_vm3, %v2644_v33, 0 }
  0x60   : > { %727 = vst.msk [vmem:[#allocation2 + $0x34] sm:$0xf] %vm712_vm0, %v3867_v20  ;;  %v853_v36 = vrot.slane %v851_v26, 4  ;;  %v856_v37 = vrot.slane %v854_v27, 5  ;;  %v862_v38 = vrot.slane %v860_v28, 5  ;;  %v866_v39 = vrot.slane %v864_v29, 4 }
  0x61   : > { %728 = vst.msk [vmem:[#allocation2 + $0x38] sm:$0x1] %vm715_vm1, %v3868_v21  ;;  %v5412_v41 = vld [vmem:[#allocation2 + $0x20] sm:$0x1]  ;;  %731 = vst.msk [vmem:[#allocation2 + $0x44] sm:$0x1] %vm715_vm1, %v3871_v35  ;;  %v5434_v50 = vcombine.low %v5392_v17, %v5394_v18 }
  0x62   : > { %729 = vst.msk [vmem:[#allocation2 + $0x3c] sm:$0xf] %vm712_vm0, %v3869_v31  ;;  %730 = vst.msk [vmem:[#allocation2 + $0x40] sm:$0xf] %vm712_vm0, %v3870_v32  ;;  %v386_v42 = vshrl.u32 %v5390_v16, 16  ;;  %v389_v43 = vshll.u32 %v5390_v16, 16  ;;  %v857_v44 = vor.u32 %v856_v37, %v853_v36  ;;  %v867_v45 = vor.u32 %v866_v39, %v862_v38 }
  0x63   : > { %v894_v46 = vshll.u32 %v5412_v41, 16  ;;  %v393_v47 = vshrl.u32 %v5399_v23, 16  ;;  %v5426_v25 = vld [vmem:[#allocation2 + $0x18] sm:$0xf]  ;;  %v5428_v33 = vld [vmem:[#allocation2 + $0x1c] sm:$0xf] }
  0x64   : > { %v1807_v48 = vrot.slane %v5412_v41, 5  ;;  %v396_v49 = vshll.u32 %v5399_v23, 16  ;;  %v858_v51 = vrot.slane %v857_v44, 4  ;;  %v868_v52 = vrot.slane %v867_v45, 4  ;;  %v5438_v55 = vld [vmem:[#allocation2 + $0x2c] sm:$0x1] }
  0x65   : > { %v875_v53 = vshrl.u32 %v5426_v25, 16  ;;  %v878_v54 = vshll.u32 %v5426_v25, 16  ;;  %v884_v56 = vshll.u32 %v5428_v33, 16  ;;  %v888_v57 = vshrl.u32 %v5428_v33, 16  ;;  %v5443_v60 = vld [vmem:[#allocation2 + $0x24] sm:$0xf] }
  0x66   : > { %v896_v58 = vrot.slane %v894_v46, 5  ;;  %v1804_v59 = vrot.slane %v5428_v33, 5  ;;  %v863_v61 = vsel %vm5348_vm8, %v858_v51, %v862_v38  ;;  %v873_v62 = vsel %vm5348_vm8, %v868_v52, %v872_v40  ;;  %v5449_v1 = vld [vmem:[#allocation2 + $0x28] sm:$0xf]  ;;  %v5451_v2 = vld [vmem:[#allocation2 + $0x30] sm:$0xf] }
  0x67   : > { %v877_v63 = vrot.slane %v875_v53, 4  ;;  %v880_v0 = vrot.slane %v878_v54, 5  ;;  %v3906_v3 = vcombine.low %v863_v61, %v873_v62  ;;  %v886_v4 = vrot.slane %v884_v56, 5  ;;  %v5457_v14 = vld [vmem:[#allocation2 + $0x34] sm:$0xf] }
  0x68   : > { %v890_v6 = vrot.slane %v888_v57, 4  ;;  %v899_v8 = vshrl.u32 %v5443_v60, 16  ;;  %v902_v11 = vshll.u32 %v5443_v60, 16  ;;  %v908_v12 = vshll.u32 %v5449_v1, 16  ;;  %v5462_v21 = vld [vmem:[#allocation2 + $0x38] sm:$0x1] }
  0x69   : > { %v881_v9 = vor.u32 %v880_v0, %v877_v63  ;;  %v912_v13 = vshrl.u32 %v5449_v1, 16  ;;  %4445 = vmatmul.mubr.msk.bf16.vlgmr.msra.gmra.mrb[0].mxu1 %vm1263_vm9, %v3906_v3  ;;  %4580 = vmatprep.mubr.msk.bf16.mxu0 %vm1263_vm9, %v3906_v3  ;;  %v918_v20 = vshll.u32 %v5438_v55, 16  ;;  %v923_v22 = vshrl.u32 %v5451_v2, 16  ;;  %v5465_v31 = vld [vmem:[#allocation2 + $0x3c] sm:$0xf] }
  0x6a   : > { %v891_v15 = vor.u32 %v890_v6, %v886_v4  ;;  %v901_v19 = vrot.slane %v899_v8, 4  ;;  %4477 = vmatpush3.bf16.msra.mxu1 %v1606_v30  ;;  %v904_v27 = vrot.slane %v902_v11, 5  ;;  %v910_v28 = vrot.slane %v908_v12, 5  ;;  %v5468_v38 = vld [vmem:[#allocation2 + $0x40] sm:$0xf] }
  0x6b   : > { %v882_v26 = vrot.slane %v881_v9, 4  ;;  %v914_v29 = vrot.slane %v912_v13, 4  ;;  %v920_v35 = vrot.slane %v918_v20, 5  ;;  %v925_v36 = vrot.slane %v923_v22, 4  ;;  %v5477_v53 = vld [vmem:[#allocation2 + $0x44] sm:$0x1] }
  0x6c   : > { %v892_v32 = vrot.slane %v891_v15, 4  ;;  %v926_v37 = vshll.u32 %v5451_v2, 16  ;;  %v905_v40 = vor.u32 %v904_v27, %v901_v19  ;;  %v932_v30 = vshll.u32 %v5457_v14, 16  ;;  %v5479_v54 = vld [vmem:[#allocation3 + $0xc] sm:$0x3] }
  0x6d   : > { %v887_v39 = vsel %vm5348_vm8, %v882_v26, %v886_v4  ;;  %v915_v44 = vor.u32 %v914_v29, %v910_v28  ;;  %v936_v51 = vshrl.u32 %v5457_v14, 16  ;;  %v942_v52 = vshll.u32 %v5462_v21, 16  ;;  %v5497_v12 = vld [vmem:[#allocation3 + $0x4] sm:$0x3]  ;;  %v5088_v24 = vld [vmem:[#allocation2 + $0x30] sm:$0xf] }
  0x6e   : > { %v897_v45 = vsel %vm5348_vm8, %v892_v32, %v896_v58  ;;  %v928_v46 = vrot.slane %v926_v37, 5  ;;  %v906_v57 = vrot.slane %v905_v40, 4  ;;  %v934_v62 = vrot.slane %v932_v30, 5  ;;  %v5485_v58 = vld [vmem:[%s5320_s23 + $0x38] sm:$0xff]   ;;  %5008 = vmatprep.subr.msk.bf16.mxu1 %vm1312_vm3, %v5497_v12 }
  0x6f   : > { %v5481_v56 = vcombine.low %v887_v39, %v897_v45  ;;  %v916_v61 = vrot.slane %v915_v44, 4  ;;  %v938_v0 = vrot.slane %v936_v51, 4  ;;  %v944_v3 = vrot.slane %v942_v52, 5 }
  0x70   : > { %v929_v63 = vor.u32 %v928_v46, %v925_v36  ;;  %v947_v4 = vshrl.u32 %v5465_v31, 16  ;;  %v911_v6 = vsel %vm5348_vm8, %v906_v57, %v910_v28  ;;  %v950_v9 = vshll.u32 %v5465_v31, 16  ;;  %v5074_v57 = vld [vmem:[%s5320_s23 + $0x40] sm:$0xff]  }
  0x71   : > { %4581 = vmatmul.mubr.msk.bf16.vlgmr.msra.gmra.mrb[0].mxu0 %vm1263_vm9, %v5481_v56  ;;  %4448 = vmatprep.mubr.msk.bf16.mxu1 %vm1263_vm9, %v5481_v56  ;;  %v921_v8 = vsel %vm5348_vm8, %v916_v61, %v920_v35  ;;  %v956_v11 = vshll.u32 %v5468_v38, 16  ;;  %v939_v19 = vor.u32 %v938_v0, %v934_v62  ;;  %vm1786_vm11 = vcmask 1046532  }
  0x72   : > { %4613 = vmatpush3.bf16.msra.mxu0 %v5417_v10  ;;  %v5500_v13 = vcombine.low %v911_v6, %v921_v8  ;;  %v930_v15 = vrot.slane %v929_v63, 4  ;;  %v949_v20 = vrot.slane %v947_v4, 4  ;;  %v952_v22 = vrot.slane %v950_v9, 5  ;;  %v5545_v9 = vld [vmem:[%s5320_s23 + $0x48] sm:$0xff]   ;;  %vm5561_vm12 = vmor %vm1785_vm10, %vm1786_vm11 }
  0x73   : > { %v958_v26 = vrot.slane %v956_v11, 5  ;;  %v960_v27 = vshrl.u32 %v5468_v38, 16  ;;  %v966_v28 = vshll.u32 %v5477_v53, 16  ;;  %5013 = vmatprep.subr.msk.bf16.mxu0 %vm1312_vm3, %v5479_v54  ;;  %v940_v29 = vrot.slane %v939_v19, 4 }
  0x74   : > { %6480 = vst [vmem:[#allocation10_spill] sm:$0xff] %v5500_v13  ;;  %4449 = vmatmul.mubr.msk.bf16.gmra.mrb[4].mxu1 %vm1263_vm9, %v5500_v13  ;;  %4584 = vmatprep.mubr.msk.bf16.mxu0 %vm1263_vm9, %v5500_v13  ;;  %v935_v10 = vsel %vm5348_vm8, %v930_v15, %v934_v62  ;;  %v388_v32 = vrot.slane %v386_v42, 7  ;;  %v395_v35 = vrot.slane %v393_v47, 7  ;;  %v953_v36 = vor.u32 %v952_v22, %v949_v20 }
  0x75   : > { %v962_v37 = vrot.slane %v960_v27, 4  ;;  %v968_v39 = vrot.slane %v966_v28, 5  ;;  %v400_v40 = vshrl.u32 %v5485_v58, 16  ;;  %v945_v44 = vsel %vm5348_vm8, %v940_v29, %v944_v3 }
  0x76   : > { %v391_v30 = vor.u32 %v389_v43, %v388_v32  ;;  %v518_v45 = vsel %vm5334_vm7, %v388_v32, 0  ;;  %v398_v42 = vor.u32 %v396_v49, %v395_v35  ;;  %v5527_v46 = vcombine.low %v935_v10, %v945_v44 }
  0x77   : > { %v954_v47 = vrot.slane %v953_v36, 4  ;;  %v963_v51 = vor.u32 %v962_v37, %v958_v26  ;;  %v3874_v52 = vcombine.low %v518_v45, %v518_v45  ;;  %v519_v43 = vsel %vm5334_vm7, %v395_v35, 0 }
  0x78   : > { %6481 = vst [vmem:[#allocation11_spill] sm:$0xff] %v5527_v46  ;;  %v502_v61 = vsel %vm5334_vm7, 0, %v391_v30  ;;  %v503_v16 = vsel %vm5334_vm7, 0, %v398_v42  ;;  %v402_v62 = vrot.slane %v400_v40, 7  ;;  %4452 = vmatprep.mubr.msk.bf16.mxu1 %vm1263_vm9, %v5527_v46  ;;  %v3877_v6 = vcombine.low %v519_v43, %v519_v43 }
  0x79   : > { %4585 = vmatmul.mubr.msk.bf16.gmra.mrb[4].mxu0 %vm1263_vm9, %v5527_v46  ;;  %v959_v23 = vsel %vm5348_vm8, %v954_v47, %v958_v26  ;;  %v964_v49 = vrot.slane %v963_v51, 4  ;;  %v3872_v63 = vcombine.low %v502_v61, %v502_v61  ;;  %v3873_v0 = vcombine.high %v502_v61, %v502_v61  ;;  %734 = vst.msk [vmem:[#allocation2 + $0x50] sm:$0x1] %vm715_vm1, %v3874_v52 }
  0x7a   : > { %v3875_v3 = vcombine.low %v503_v16, %v503_v16  ;;  %v3876_v4 = vcombine.high %v503_v16, %v503_v16  ;;  %v403_v8 = vshll.u32 %v5485_v58, 16  ;;  %v520_v15 = vsel %vm5334_vm7, %v402_v62, 0  ;;  %737 = vst.msk [vmem:[#allocation2 + $0x5c] sm:$0x1] %vm715_vm1, %v3877_v6 }
  0x7b   : > { %v969_v11 = vsel %vm5348_vm8, %v964_v49, %v968_v39  ;;  %732 = vst.msk [vmem:[#allocation2 + $0x48] sm:$0xf] %vm712_vm0, %v3872_v63  ;;  %733 = vst.msk [vmem:[#allocation2 + $0x4c] sm:$0xf] %vm712_vm0, %v3873_v0  ;;  %v407_v19 = vshrl.u32 %v5074_v57, 16  ;;  %v410_v20 = vshll.u32 %v5074_v57, 16  ;;  %v3880_v26 = vcombine.low %v520_v15, %v520_v15 }
  0x7c   : > { %v5553_v22 = vcombine.low %v959_v23, %v969_v11  ;;  %735 = vst.msk [vmem:[#allocation2 + $0x54] sm:$0xf] %vm712_vm0, %v3875_v3  ;;  %736 = vst.msk [vmem:[#allocation2 + $0x58] sm:$0xf] %vm712_vm0, %v3876_v4  ;;  %v405_v58 = vor.u32 %v403_v8, %v402_v62  ;;  %v3971_v27 = vrot.slane %v5392_v17, 9  ;;  %v1797_v29 = vrot.slane %v5394_v18, 5 }
  0x7d   : > { %v409_v28 = vrot.slane %v407_v19, 7  ;;  %v1800_v32 = vrot.slane %v5375_v5, 5  ;;  %v3972_v35 = vrot.slane %v5426_v25, 9  ;;  %740 = vst.msk [vmem:[#allocation2 + $0x68] sm:$0x1] %vm715_vm1, %v3880_v26  ;;  %v1806_v36 = vrot.slane %v1804_v59, 4 }
  0x7e   : > { %6482 = vst [vmem:[#allocation12_spill] sm:$0xff] %v5553_v22  ;;  %4453 = vmatmul.mubr.msk.bf16.gmra.mrb[8].mxu1 %vm1263_vm9, %v5553_v22  ;;  %4588 = vmatprep.mubr.msk.bf16.mxu0 %vm1263_vm9, %v5553_v22  ;;  %v504_v17 = vsel %vm5334_vm7, 0, %v405_v58  ;;  %v5579_v18 = vsel %vm1312_vm3, %v5479_v54, 0  ;;  %v414_v5 = vshrl.u32 %v5545_v9, 16  ;;  %v1798_v42 = vsel %vm5561_vm12, %v3971_v27, %v1797_v29 }
  0x7f   : > { %v3878_v37 = vcombine.low %v504_v17, %v504_v17  ;;  %v3879_v39 = vcombine.high %v504_v17, %v504_v17  ;;  %v412_v40 = vor.u32 %v410_v20, %v409_v28  ;;  %v521_v44 = vsel %vm5334_vm7, %v409_v28, 0 }
  0x80   : > { %v5584_v30 = vld [vmem:[#allocation2 + $0x50] sm:$0x1]  ;;  %v3883_v45 = vcombine.low %v521_v44, %v521_v44  ;;  %v1799_v47 = vrot.slane %v1797_v29, 4  ;;  %v1805_v54 = vsel %vm5561_vm12, %v3972_v35, %v1804_v59  ;;  %v1808_v57 = vsel %vm5561_vm12, %v1806_v36, %v1807_v48 }
  0x81   : > { %v990_v51 = vshll.u32 %v5584_v30, 16  ;;  %738 = vst.msk [vmem:[#allocation2 + $0x60] sm:$0xf] %vm712_vm0, %v3878_v37  ;;  %739 = vst.msk [vmem:[#allocation2 + $0x64] sm:$0xf] %vm712_vm0, %v3879_v39  ;;  %v505_v52 = vsel %vm5334_vm7, 0, %v412_v40  ;;  %v5610_v49 = vcombine.low %v1805_v54, %v1808_v57  ;;  %v5629_v19 = vcombine.low %v5426_v25, %v5428_v33 }
  0x82   : > { %v5601_v61 = vrot.slane %v414_v5, 7  ;;  %v5603_v16 = vld [vmem:[#allocation2 + $0x48] sm:$0xf]  ;;  %v5605_v43 = vld [vmem:[#allocation2 + $0x4c] sm:$0xf]  ;;  %v3881_v59 = vcombine.low %v505_v52, %v505_v52  ;;  %v3882_v62 = vcombine.high %v505_v52, %v505_v52  ;;  %v1801_v23 = vsel %vm5561_vm12, %v1799_v47, %v1800_v32 }
  0x83   : > { %743 = vst.msk [vmem:[#allocation2 + $0x74] sm:$0x1] %vm715_vm1, %v3883_v45  ;;  %v971_v41 = vshrl.u32 %v5603_v16, 16  ;;  %v974_v63 = vshll.u32 %v5603_v16, 16  ;;  %v980_v48 = vshll.u32 %v5605_v43, 16  ;;  %v984_v0 = vshrl.u32 %v5605_v43, 16 }
  0x84   : > { %v5616_v3 = vld [vmem:[#allocation2 + $0x54] sm:$0xf]  ;;  %v992_v4 = vrot.slane %v990_v51, 5  ;;  %v5618_v6 = vld [vmem:[#allocation2 + $0x58] sm:$0xf]  ;;  %v5625_v15 = vcombine.low %v1798_v42, %v1801_v23  ;;  %v417_v45 = vshll.u32 %v5545_v9, 16 }
  0x85   : > { %v5620_v8 = vld [vmem:[#allocation2 + $0x5c] sm:$0x1]  ;;  %v995_v11 = vshrl.u32 %v5616_v3, 16  ;;  %741 = vst.msk [vmem:[#allocation2 + $0x6c] sm:$0xf] %vm712_vm0, %v3881_v59  ;;  %v973_v20 = vrot.slane %v971_v41, 4 }
  0x86   : > { %742 = vst.msk [vmem:[#allocation2 + $0x70] sm:$0xf] %vm712_vm0, %v3882_v62  ;;  %v976_v58 = vrot.slane %v974_v63, 5  ;;  %v982_v26 = vrot.slane %v980_v48, 5  ;;  %v986_v27 = vrot.slane %v984_v0, 4  ;;  %v998_v32 = vshll.u32 %v5616_v3, 16 }
  0x87   : > { %v5631_v28 = vld [vmem:[#allocation2 + $0x68] sm:$0x1]  ;;  %v997_v29 = vrot.slane %v995_v11, 4  ;;  %v1004_v35 = vshll.u32 %v5618_v6, 16  ;;  %v1008_v17 = vshrl.u32 %v5618_v6, 16  ;;  %v1014_v37 = vshll.u32 %v5620_v8, 16 }
  0x88   : > { %v977_v36 = vor.u32 %v976_v58, %v973_v20  ;;  %v987_v5 = vor.u32 %v986_v27, %v982_v26  ;;  %v1038_v25 = vshll.u32 %v5631_v28, 16  ;;  %v1000_v33 = vrot.slane %v998_v32, 5  ;;  %v5638_v44 = vld [vmem:[#allocation2 + $0x60] sm:$0xf]  ;;  %v5641_v51 = vld [vmem:[#allocation2 + $0x64] sm:$0xf] }
  0x89   : > { %v1006_v39 = vrot.slane %v1004_v35, 5  ;;  %v1010_v40 = vrot.slane %v1008_v17, 4  ;;  %v1016_v54 = vrot.slane %v1014_v37, 5  ;;  %v1019_v52 = vshrl.u32 %v5638_v44, 16 }
  0x8a   : > { %v978_v42 = vrot.slane %v977_v36, 4  ;;  %v988_v47 = vrot.slane %v987_v5, 4  ;;  %v1001_v57 = vor.u32 %v1000_v33, %v997_v29  ;;  %v1022_v62 = vshll.u32 %v5638_v44, 16 }
  0x8b   : > { %v1011_v59 = vor.u32 %v1010_v40, %v1006_v39  ;;  %v1028_v23 = vshll.u32 %v5641_v51, 16  ;;  %v1021_v9 = vrot.slane %v1019_v52, 4  ;;  %v1032_v48 = vshrl.u32 %v5641_v51, 16  ;;  %v5076_v52 = vld [vmem:[%s5320_s23 + $0x50] sm:$0xff]  }
  0x8c   : > { %v983_v41 = vsel %vm5348_vm8, %v978_v42, %v982_v26  ;;  %v993_v63 = vsel %vm5348_vm8, %v988_v47, %v992_v4  ;;  %v5651_v0 = vld [vmem:[#allocation2 + $0x6c] sm:$0xf]  ;;  %v1002_v20 = vrot.slane %v1001_v57, 4  ;;  %v1024_v27 = vrot.slane %v1022_v62, 5  ;;  %v5657_v26 = vld [vmem:[#allocation2 + $0x74] sm:$0x1] }
  0x8d   : > { %v5653_v11 = vcombine.low %v983_v41, %v993_v63  ;;  %v1012_v58 = vrot.slane %v1011_v59, 4  ;;  %v5655_v29 = vld [vmem:[#allocation2 + $0x70] sm:$0xf]  ;;  %v1030_v32 = vrot.slane %v1028_v23, 5  ;;  %v1034_v35 = vrot.slane %v1032_v48, 4 }
  0x8e   : > { %v1040_v17 = vrot.slane %v1038_v25, 5  ;;  %v1043_v4 = vshrl.u32 %v5651_v0, 16  ;;  %v1007_v36 = vsel %vm5348_vm8, %v1002_v20, %v1006_v39  ;;  %v1025_v37 = vor.u32 %v1024_v27, %v1021_v9 }
  0x8f   : > { %6485 = vst [vmem:[#allocation13_spill] sm:$0xff] %v5653_v11  ;;  %4589 = vmatmul.mubr.msk.bf16.gmra.mrb[8].mxu0 %vm1263_vm9, %v5653_v11  ;;  %4456 = vmatprep.mubr.msk.bf16.mxu1 %vm1263_vm9, %v5653_v11  ;;  %v1017_v5 = vsel %vm5348_vm8, %v1012_v58, %v1016_v54  ;;  %v1046_v33 = vshll.u32 %v5651_v0, 16  ;;  %v1035_v40 = vor.u32 %v1034_v35, %v1030_v32  ;;  %v1052_v47 = vshll.u32 %v5655_v29, 16 }
  0x90   : > { %v5669_v25 = vcombine.low %v1007_v36, %v1017_v5  ;;  %v1045_v42 = vrot.slane %v1043_v4, 4  ;;  %v1026_v57 = vrot.slane %v1025_v37, 4  ;;  %v1056_v62 = vshrl.u32 %v5655_v29, 16 }
  0x91   : > { %v1048_v59 = vrot.slane %v1046_v33, 5  ;;  %v1062_v23 = vshll.u32 %v5657_v26, 16  ;;  %v1036_v39 = vrot.slane %v1035_v40, 4  ;;  %v1054_v54 = vrot.slane %v1052_v47, 5 }
  0x92   : > { %6486 = vst [vmem:[#allocation14_spill] sm:$0xff] %v5669_v25  ;;  %4457 = vmatmul.mubr.msk.bf16.gmra.mrb[12].mxu1 %vm1263_vm9, %v5669_v25  ;;  %4592 = vmatprep.mubr.msk.bf16.mxu0 %vm1263_vm9, %v5669_v25  ;;  %v419_v41 = vor.u32 %v417_v45, %v5601_v61  ;;  %v522_v63 = vsel %vm5334_vm7, %v5601_v61, 0  ;;  %v1031_v9 = vsel %vm5348_vm8, %v1026_v57, %v1030_v32  ;;  %v1058_v20 = vrot.slane %v1056_v62, 4 }
  0x93   : > { %v1049_v48 = vor.u32 %v1048_v59, %v1045_v42  ;;  %v1064_v58 = vrot.slane %v1062_v23, 5  ;;  %v1041_v27 = vsel %vm5348_vm8, %v1036_v39, %v1040_v17  ;;  %v3886_v4 = vcombine.low %v522_v63, %v522_v63 }
  0x94   : > { %v506_v35 = vsel %vm5334_vm7, 0, %v419_v41  ;;  %v421_v36 = vshrl.u32 %v5076_v52, 16  ;;  %v5689_v5 = vcombine.low %v1031_v9, %v1041_v27  ;;  %v1059_v37 = vor.u32 %v1058_v20, %v1054_v54  ;;  %v5078_v41 = vld [vmem:[%s5320_s23 + $0x60] sm:$0xff]  }
  0x95   : > { %v1050_v45 = vrot.slane %v1049_v48, 4  ;;  %v3884_v33 = vcombine.low %v506_v35, %v506_v35  ;;  %v3885_v61 = vcombine.high %v506_v35, %v506_v35  ;;  %746 = vst.msk [vmem:[#allocation2 + $0x80] sm:$0x1] %vm715_vm1, %v3886_v4  ;;  %v424_v40 = vshll.u32 %v5076_v52, 16 }
  0x96   : > { %6487 = vst [vmem:[#allocation15_spill] sm:$0xff] %v5689_v5  ;;  %v423_v32 = vrot.slane %v421_v36, 7  ;;  %v3973_v42 = vrot.slane %v5443_v60, 9  ;;  %4460 = vmatprep.mubr.msk.bf16.mxu1 %vm1263_vm9, %v5689_v5  ;;  %v1060_v47 = vrot.slane %v1059_v37, 4  ;;  %v1811_v57 = vrot.slane %v5449_v1, 5 }
  0x97   : > { %4593 = vmatmul.mubr.msk.bf16.gmra.mrb[12].mxu0 %vm1263_vm9, %v5689_v5  ;;  %v1055_v17 = vsel %vm5348_vm8, %v1050_v45, %v1054_v54  ;;  %744 = vst.msk [vmem:[#allocation2 + $0x78] sm:$0xf] %vm712_vm0, %v3884_v33  ;;  %v1814_v59 = vrot.slane %v5438_v55, 5  ;;  %745 = vst.msk [vmem:[#allocation2 + $0x7c] sm:$0xf] %vm712_vm0, %v3885_v61  ;;  %v3974_v23 = vrot.slane %v5451_v2, 9 }
  0x98   : > { %4614 = vmatprep.mubr.msk.bf16.mxu0 %vm1263_vm9, %v5625_v15  ;;  %v426_v52 = vor.u32 %v424_v40, %v423_v32  ;;  %v523_v62 = vsel %vm5334_vm7, %v423_v32, 0  ;;  %v1818_v39 = vrot.slane %v5457_v14, 5  ;;  %v5077_v54 = vld [vmem:[%s5320_s23 + $0x58] sm:$0xff]   ;;  %v1065_v63 = vsel %vm5348_vm8, %v1060_v47, %v1064_v58 }
  0x99   : > { %v3889_v9 = vcombine.low %v523_v62, %v523_v62  ;;  %v1812_v55 = vsel %vm5561_vm12, %v3973_v42, %v1811_v57  ;;  %v1813_v48 = vrot.slane %v1811_v57, 4  ;;  %v5715_v20 = vcombine.low %v1055_v17, %v1065_v63 }
  0x9a   : > { %v507_v27 = vsel %vm5334_vm7, 0, %v426_v52  ;;  %v1819_v2 = vsel %vm5561_vm12, %v3974_v23, %v1818_v39  ;;  %v1820_v35 = vrot.slane %v1818_v39, 4  ;;  %v1821_v36 = vrot.slane %v5462_v21, 5 }
  0x9b   : > { %6488 = vst [vmem:[#allocation16_spill] sm:$0xff] %v5715_v20  ;;  %v3887_v14 = vcombine.low %v507_v27, %v507_v27  ;;  %v3888_v4 = vcombine.high %v507_v27, %v507_v27  ;;  %749 = vst.msk [vmem:[#allocation2 + $0x8c] sm:$0x1] %vm715_vm1, %v3889_v9  ;;  %v1815_v58 = vsel %vm5561_vm12, %v1813_v48, %v1814_v59  ;;  %4461 = vmatmul.mubr.msk.bf16.gmra.mrb[16].mxu1 %vm1263_vm9, %v5715_v20 }
  0x9c   : > { %v5727_v45 = vcombine.low %v1812_v55, %v1815_v58  ;;  %v428_v37 = vshrl.u32 %v5077_v54, 16  ;;  %v431_v33 = vshll.u32 %v5077_v54, 16  ;;  %v435_v61 = vshrl.u32 %v5078_v41, 16  ;;  %v5729_v32 = vld [vmem:[#allocation2 + $0x80] sm:$0x1] }
  0x9d   : > { %747 = vst.msk [vmem:[#allocation2 + $0x84] sm:$0xf] %vm712_vm0, %v3887_v14  ;;  %748 = vst.msk [vmem:[#allocation2 + $0x88] sm:$0xf] %vm712_vm0, %v3888_v4  ;;  %v1822_v40 = vsel %vm5561_vm12, %v1820_v35, %v1821_v36  ;;  %v438_v42 = vshll.u32 %v5078_v41, 16  ;;  %v3975_v21 = vrot.slane %v5465_v31, 9 }
  0x9e   : > { %v1825_v17 = vrot.slane %v5468_v38, 5  ;;  %v5737_v47 = vld [vmem:[#allocation2 + $0x78] sm:$0xf]  ;;  %v1086_v57 = vshll.u32 %v5729_v32, 16  ;;  %v5740_v59 = vcombine.low %v1819_v2, %v1822_v40  ;;  %v430_v52 = vrot.slane %v428_v37, 7 }
  0x9f   : > { %v437_v62 = vrot.slane %v435_v61, 7  ;;  %4615 = vmatmul.mubr.msk.bf16.vlgmr.msra.gmra.mrb[0].mxu0 %vm1263_vm9, %v5610_v49  ;;  %v5744_v23 = vld [vmem:[#allocation2 + $0x7c] sm:$0xf]  ;;  %v1067_v39 = vshrl.u32 %v5737_v47, 16  ;;  %v1070_v54 = vshll.u32 %v5737_v47, 16 }
  0xa0   : > { %v5750_v31 = vsel %vm5561_vm12, %v3975_v21, %v1825_v17  ;;  %v5752_v38 = vrot.slane %v1825_v17, 4  ;;  %4647 = vmatpush3.bf16.msra.mxu0 %v5579_v18  ;;  %v1076_v41 = vshll.u32 %v5744_v23, 16  ;;  %v1080_v63 = vshrl.u32 %v5744_v23, 16  ;;  %4618 = vmatprep.mubr.msk.bf16.mxu0 %vm1263_vm9, %v5727_v45 }
  0xa1   : > { %v1088_v9 = vrot.slane %v1086_v57, 5  ;;  %v433_v55 = vor.u32 %v431_v33, %v430_v52  ;;  %v1069_v48 = vrot.slane %v1067_v39, 4  ;;  %v1072_v27 = vrot.slane %v1070_v54, 5 }
  0xa2   : > { %v524_v2 = vsel %vm5334_vm7, %v430_v52, 0  ;;  %v440_v35 = vor.u32 %v438_v42, %v437_v62  ;;  %v1078_v14 = vrot.slane %v1076_v41, 5  ;;  %v1082_v4 = vrot.slane %v1080_v63, 4  ;;  %v5761_v58 = vld [vmem:[#allocation2 + $0x8c] sm:$0x1] }
  0xa3   : > { %v508_v18 = vsel %vm5334_vm7, 0, %v433_v55  ;;  %v3892_v36 = vcombine.low %v524_v2, %v524_v2  ;;  %v1073_v37 = vor.u32 %v1072_v27, %v1069_v48  ;;  %v1110_v61 = vshll.u32 %v5761_v58, 16 }
  0xa4   : > { %v3890_v40 = vcombine.low %v508_v18, %v508_v18  ;;  %v3891_v21 = vcombine.high %v508_v18, %v508_v18  ;;  %v1083_v33 = vor.u32 %v1082_v4, %v1078_v14  ;;  %v5766_v17 = vld [vmem:[#allocation2 + $0x84] sm:$0xf]  ;;  %v5768_v57 = vld [vmem:[#allocation2 + $0x88] sm:$0xf]  ;;  %v509_v42 = vsel %vm5334_vm7, 0, %v440_v35 }
  0xa5   : > { %752 = vst.msk [vmem:[#allocation2 + $0x98] sm:$0x1] %vm715_vm1, %v3892_v36  ;;  %v525_v52 = vsel %vm5334_vm7, %v437_v62, 0  ;;  %v5777_v39 = vcombine.low %v5443_v60, %v5449_v1  ;;  %v1074_v54 = vrot.slane %v1073_v37, 4  ;;  %v1091_v41 = vshrl.u32 %v5766_v17, 16  ;;  %v5786_v35 = vld [vmem:[%s5320_s23 + $0x68] sm:$0xff]  }
  0xa6   : > { %v1094_v63 = vshll.u32 %v5766_v17, 16  ;;  %v1100_v55 = vshll.u32 %v5768_v57, 16  ;;  %750 = vst.msk [vmem:[#allocation2 + $0x90] sm:$0xf] %vm712_vm0, %v3890_v40  ;;  %751 = vst.msk [vmem:[#allocation2 + $0x94] sm:$0xf] %vm712_vm0, %v3891_v21  ;;  %v3893_v2 = vcombine.low %v509_v42, %v509_v42  ;;  %v3894_v21 = vcombine.high %v509_v42, %v509_v42 }
  0xa7   : > { %v1084_v48 = vrot.slane %v1083_v33, 4  ;;  %v1104_v27 = vshrl.u32 %v5768_v57, 16  ;;  %v1112_v62 = vrot.slane %v1110_v61, 5  ;;  %v1079_v60 = vsel %vm5348_vm8, %v1074_v54, %v1078_v14  ;;  %4619 = vmatmul.mubr.msk.bf16.gmra.mrb[4].mxu0 %vm1263_vm9, %v5740_v59  ;;  %v5793_v36 = vld [vmem:[%s5320_s23 + $0x70] sm:$0xff]  }
  0xa8   : > { %v1093_v1 = vrot.slane %v1091_v41, 4  ;;  %v1096_v4 = vrot.slane %v1094_v63, 5  ;;  %v1102_v18 = vrot.slane %v1100_v55, 5  ;;  %v3895_v61 = vcombine.low %v525_v52, %v525_v52  ;;  %753 = vst.msk [vmem:[#allocation2 + $0x9c] sm:$0xf] %vm712_vm0, %v3893_v2 }
  0xa9   : > { %v1089_v37 = vsel %vm5348_vm8, %v1084_v48, %v1088_v9  ;;  %v1106_v40 = vrot.slane %v1104_v27, 4  ;;  %v1828_v14 = vrot.slane %v5477_v53, 5  ;;  %v3976_v54 = vrot.slane %v5603_v16, 9  ;;  %754 = vst.msk [vmem:[#allocation2 + $0xa0] sm:$0xf] %vm712_vm0, %v3894_v21 }
  0xaa   : > { %v5798_v33 = vcombine.low %v1079_v60, %v1089_v37  ;;  %v1097_v7 = vor.u32 %v1096_v4, %v1093_v1  ;;  %755 = vst.msk [vmem:[#allocation2 + $0xa4] sm:$0x1] %vm715_vm1, %v3895_v61  ;;  %v1832_v63 = vrot.slane %v5605_v43, 5  ;;  %v1835_v9 = vrot.slane %v5584_v30, 5 }
  0xab   : > { %v1107_v41 = vor.u32 %v1106_v40, %v1102_v18  ;;  %v442_v42 = vshrl.u32 %v5786_v35, 16  ;;  %v1829_v53 = vsel %vm5561_vm12, %v5752_v38, %v1828_v14  ;;  %v445_v48 = vshll.u32 %v5786_v35, 16 }
  0xac   : > { %6489 = vst [vmem:[#allocation17_spill] sm:$0xff] %v5798_v33  ;;  %4464 = vmatprep.mubr.msk.bf16.mxu1 %vm1263_vm9, %v5798_v33  ;;  %v1098_v52 = vrot.slane %v1097_v7, 4  ;;  %v5809_v55 = vld [vmem:[#allocation2 + $0x98] sm:$0x1]  ;;  %v449_v27 = vshrl.u32 %v5793_v36, 16  ;;  %v5822_v4 = vcombine.low %v5750_v31, %v1829_v53  ;;  %v1833_v7 = vsel %vm5561_vm12, %v3976_v54, %v1832_v63 }
  0xad   : > { %v1108_v2 = vrot.slane %v1107_v41, 4  ;;  %v5816_v60 = vld [vmem:[#allocation2 + $0x90] sm:$0xf]  ;;  %v5818_v30 = vld [vmem:[#allocation2 + $0x94] sm:$0xf]  ;;  %v1134_v1 = vshll.u32 %v5809_v55, 16 }
  0xae   : > { %v1103_v38 = vsel %vm5348_vm8, %v1098_v52, %v1102_v18  ;;  %v1115_v35 = vshrl.u32 %v5816_v60, 16  ;;  %v1118_v37 = vshll.u32 %v5816_v60, 16  ;;  %v1124_v40 = vshll.u32 %v5818_v30, 16  ;;  %4622 = vmatprep.mubr.msk.bf16.mxu0 %vm1263_vm9, %v5822_v4 }
  0xaf   : > { %v1113_v21 = vsel %vm5348_vm8, %v1108_v2, %v1112_v62  ;;  %v1128_v61 = vshrl.u32 %v5818_v30, 16  ;;  %v1136_v14 = vrot.slane %v1134_v1, 5  ;;  %v1834_v31 = vrot.slane %v1832_v63, 4  ;;  %v5838_v53 = vld [vmem:[#allocation2 + $0x9c] sm:$0xf] }
  0xb0   : > { %v5836_v54 = vcombine.low %v1103_v38, %v1113_v21  ;;  %v1117_v41 = vrot.slane %v1115_v35, 4  ;;  %v1120_v18 = vrot.slane %v1118_v37, 5  ;;  %v1126_v52 = vrot.slane %v1124_v40, 5  ;;  %v5846_v63 = vld [vmem:[#allocation2 + $0xa0] sm:$0xf] }
  0xb1   : > { %v1130_v33 = vrot.slane %v1128_v61, 4  ;;  %v1139_v20 = vshrl.u32 %v5838_v53, 16  ;;  %v1142_v5 = vshll.u32 %v5838_v53, 16  ;;  %v1836_v62 = vsel %vm5561_vm12, %v1834_v31, %v1835_v9  ;;  %v5848_v1 = vld [vmem:[#allocation2 + $0xa4] sm:$0x1] }
  0xb2   : > { %6490 = vst [vmem:[#allocation18_spill] sm:$0xff] %v5836_v54  ;;  %4465 = vmatmul.mubr.msk.bf16.gmra.mrb[20].mxu1 %vm1263_vm9, %v5836_v54  ;;  %v1121_v2 = vor.u32 %v1120_v18, %v1117_v41  ;;  %v5850_v38 = vcombine.low %v1833_v7, %v1836_v62  ;;  %v444_v35 = vrot.slane %v442_v42, 7  ;;  %v451_v37 = vrot.slane %v449_v27, 7 }
  0xb3   : > { %v1131_v40 = vor.u32 %v1130_v33, %v1126_v52  ;;  %v1141_v21 = vrot.slane %v1139_v20, 4  ;;  %v1144_v61 = vrot.slane %v1142_v5, 5  ;;  %v1148_v25 = vshll.u32 %v5846_v63, 16 }
  0xb4   : > { %v1122_v11 = vrot.slane %v1121_v2, 4  ;;  %v1152_v9 = vshrl.u32 %v5846_v63, 16  ;;  %v1158_v31 = vshll.u32 %v5848_v1, 16  ;;  %4623 = vmatmul.mubr.msk.bf16.gmra.mrb[8].mxu0 %vm1263_vm9, %v5850_v38  ;;  %v447_v41 = vor.u32 %v445_v48, %v444_v35 }
  0xb5   : > { %v1132_v18 = vrot.slane %v1131_v40, 4  ;;  %v1145_v54 = vor.u32 %v1144_v61, %v1141_v21  ;;  %v1150_v7 = vrot.slane %v1148_v25, 5  ;;  %v526_v42 = vsel %vm5334_vm7, %v444_v35, 0 }
  0xb6   : > { %v1127_v5 = vsel %vm5348_vm8, %v1122_v11, %v1126_v52  ;;  %v1154_v20 = vrot.slane %v1152_v9, 4  ;;  %v1160_v33 = vrot.slane %v1158_v31, 5  ;;  %v510_v27 = vsel %vm5334_vm7, 0, %v447_v41 }
  0xb7   : > { %v1137_v62 = vsel %vm5348_vm8, %v1132_v18, %v1136_v14  ;;  %v1146_v2 = vrot.slane %v1145_v54, 4  ;;  %v3896_v22 = vcombine.low %v510_v27, %v510_v27  ;;  %v3897_v48 = vcombine.high %v510_v27, %v510_v27 }
  0xb8   : > { %v5865_v40 = vcombine.low %v1127_v5, %v1137_v62  ;;  %v1155_v25 = vor.u32 %v1154_v20, %v1150_v7  ;;  %v3898_v21 = vcombine.low %v526_v42, %v526_v42  ;;  %v452_v35 = vshll.u32 %v5793_v36, 16 }
  0xb9   : > { %v1151_v11 = vsel %vm5348_vm8, %v1146_v2, %v1150_v7  ;;  %756 = vst.msk [vmem:[#allocation2 + $0xa8] sm:$0xf] %vm712_vm0, %v3896_v22  ;;  %757 = vst.msk [vmem:[#allocation2 + $0xac] sm:$0xf] %vm712_vm0, %v3897_v48  ;;  %v527_v52 = vsel %vm5334_vm7, %v451_v37, 0  ;;  %v3977_v14 = vrot.slane %v5616_v3, 9 }
  0xba   : > { %6491 = vst [vmem:[#allocation19_spill] sm:$0xff] %v5865_v40  ;;  %v1839_v54 = vrot.slane %v5618_v6, 5  ;;  %4468 = vmatprep.mubr.msk.bf16.mxu1 %vm1263_vm9, %v5865_v40  ;;  %v1156_v61 = vrot.slane %v1155_v25, 4  ;;  %758 = vst.msk [vmem:[#allocation2 + $0xb0] sm:$0x1] %vm715_vm1, %v3898_v21  ;;  %v454_v36 = vor.u32 %v452_v35, %v451_v37  ;;  %v3901_v9 = vcombine.low %v527_v52, %v527_v52 }
  0xbb   : > { %v1842_v31 = vrot.slane %v5620_v8, 5  ;;  %v3978_v18 = vrot.slane %v5638_v44, 9  ;;  %v1846_v7 = vrot.slane %v5641_v51, 5  ;;  %v1849_v37 = vrot.slane %v5631_v28, 5 }
  0xbc   : > { %v1840_v22 = vsel %vm5561_vm12, %v3977_v14, %v1839_v54  ;;  %v1841_v41 = vrot.slane %v1839_v54, 4  ;;  %v1161_v42 = vsel %vm5348_vm8, %v1156_v61, %v1160_v33  ;;  %v511_v5 = vsel %vm5334_vm7, 0, %v454_v36  ;;  %761 = vst.msk [vmem:[#allocation2 + $0xbc] sm:$0x1] %vm715_vm1, %v3901_v9 }
  0xbd   : > { %v3979_v8 = vrot.slane %v5651_v0, 9  ;;  %v5891_v20 = vcombine.low %v1151_v11, %v1161_v42  ;;  %v3899_v27 = vcombine.low %v511_v5, %v511_v5  ;;  %v3900_v62 = vcombine.high %v511_v5, %v511_v5 }
  0xbe   : > { %v1843_v2 = vsel %vm5561_vm12, %v1841_v41, %v1842_v31  ;;  %v1848_v25 = vrot.slane %v1846_v7, 4  ;;  %v1853_v33 = vrot.slane %v5655_v29, 5  ;;  %v1847_v28 = vsel %vm5561_vm12, %v3978_v18, %v1846_v7 }
  0xbf   : > { %6492 = vst [vmem:[#allocation20_spill] sm:$0xff] %v5891_v20  ;;  %v5895_v48 = vcombine.low %v1840_v22, %v1843_v2  ;;  %4469 = vmatmul.mubr.msk.bf16.gmra.mrb[24].mxu1 %vm1263_vm9, %v5891_v20  ;;  %759 = vst.msk [vmem:[#allocation2 + $0xb4] sm:$0xf] %vm712_vm0, %v3899_v27  ;;  %v1856_v21 = vrot.slane %v5657_v26, 5  ;;  %v3980_v35 = vrot.slane %v5737_v47, 9  ;;  %v1860_v36 = vrot.slane %v5744_v23, 5 }
  0xc0   : > { %760 = vst.msk [vmem:[#allocation2 + $0xb8] sm:$0xf] %vm712_vm0, %v3900_v62  ;;  %v5906_v11 = vld [vmem:[#allocation2 + $0xa8] sm:$0xf]  ;;  %v5908_v52 = vld [vmem:[#allocation2 + $0xac] sm:$0xf]  ;;  %v1850_v14 = vsel %vm5561_vm12, %v1848_v25, %v1849_v37  ;;  %v1854_v54 = vsel %vm5561_vm12, %v3979_v8, %v1853_v33 }
  0xc1   : > { %4626 = vmatprep.mubr.msk.bf16.mxu0 %vm1263_vm9, %v5895_v48  ;;  %v1855_v61 = vrot.slane %v1853_v33, 4  ;;  %v5917_v9 = vld [vmem:[#allocation2 + $0xb0] sm:$0x1]  ;;  %v1163_v26 = vshrl.u32 %v5906_v11, 16  ;;  %v1166_v31 = vshll.u32 %v5906_v11, 16  ;;  %v1172_v22 = vshll.u32 %v5908_v52, 16 }
  0xc2   : > { %v1176_v41 = vshrl.u32 %v5908_v52, 16  ;;  %v1182_v18 = vshll.u32 %v5917_v9, 16  ;;  %v5924_v7 = vcombine.low %v1847_v28, %v1850_v14  ;;  %v1863_v5 = vrot.slane %v5729_v32, 5 }
  0xc3   : > { %v1857_v42 = vsel %vm5561_vm12, %v1855_v61, %v1856_v21  ;;  %v1165_v37 = vrot.slane %v1163_v26, 4  ;;  %v1168_v8 = vrot.slane %v1166_v31, 5  ;;  %v1174_v27 = vrot.slane %v1172_v22, 5  ;;  %v5929_v2 = vld [vmem:[#allocation2 + $0xbc] sm:$0x1] }
  0xc4   : > { %6493 = vst [vmem:[#allocation21_spill] sm:$0xff] %v5924_v7  ;;  %v1178_v62 = vrot.slane %v1176_v41, 4  ;;  %v1184_v25 = vrot.slane %v1182_v18, 5  ;;  %4627 = vmatmul.mubr.msk.bf16.gmra.mrb[12].mxu0 %vm1263_vm9, %v5924_v7  ;;  %v5933_v33 = vcombine.low %v1854_v54, %v1857_v42  ;;  %v1861_v28 = vsel %vm5561_vm12, %v3980_v35, %v1860_v36 }
  0xc5   : > { %v1862_v14 = vrot.slane %v1860_v36, 4  ;;  %v1169_v20 = vor.u32 %v1168_v8, %v1165_v37  ;;  %v1206_v32 = vshll.u32 %v5929_v2, 16  ;;  %v3981_v61 = vrot.slane %v5766_v17, 9 }
  0xc6   : > { %6494 = vst [vmem:[#allocation22_spill] sm:$0xff] %v5933_v33  ;;  %v1179_v21 = vor.u32 %v1178_v62, %v1174_v27  ;;  %v5939_v26 = vld [vmem:[#allocation2 + $0xb4] sm:$0xf]  ;;  %4630 = vmatprep.mubr.msk.bf16.mxu0 %vm1263_vm9, %v5933_v33  ;;  %v1867_v22 = vrot.slane %v5768_v57, 5  ;;  %v1870_v35 = vrot.slane %v5761_v58, 5 }
  0xc7   : > { %v5941_v31 = vld [vmem:[#allocation2 + $0xb8] sm:$0xf]  ;;  %v1864_v54 = vsel %vm5561_vm12, %v1862_v14, %v1863_v5  ;;  %v1170_v36 = vrot.slane %v1169_v20, 4  ;;  %v1187_v18 = vshrl.u32 %v5939_v26, 16  ;;  %v1190_v42 = vshll.u32 %v5939_v26, 16 }
  0xc8   : > { %v1180_v41 = vrot.slane %v1179_v21, 4  ;;  %v1196_v37 = vshll.u32 %v5941_v31, 16  ;;  %v1200_v8 = vshrl.u32 %v5941_v31, 16  ;;  %v5953_v62 = vcombine.low %v1861_v28, %v1864_v54 }
  0xc9   : > { %v1868_v40 = vsel %vm5561_vm12, %v3981_v61, %v1867_v22  ;;  %v1175_v5 = vsel %vm5348_vm8, %v1170_v36, %v1174_v27  ;;  %v1189_v20 = vrot.slane %v1187_v18, 4  ;;  %v1192_v14 = vrot.slane %v1190_v42, 5 }
  0xca   : > { %v1185_v58 = vsel %vm5348_vm8, %v1180_v41, %v1184_v25  ;;  %v1198_v33 = vrot.slane %v1196_v37, 5  ;;  %v1202_v46 = vrot.slane %v1200_v8, 4  ;;  %v1869_v7 = vrot.slane %v1867_v22, 4 }
  0xcb   : > { %v5961_v21 = vcombine.low %v1175_v5, %v1185_v58  ;;  %v1193_v13 = vor.u32 %v1192_v14, %v1189_v20  ;;  %v3982_v28 = vrot.slane %v5816_v60, 9  ;;  %v1874_v54 = vrot.slane %v5818_v30, 5  ;;  %v5981_v5 = vld [vmem:[#allocation2] sm:$0xf]  ;;  %v5081_v58 = vld [vmem:[%s5320_s23 + $0x78] sm:$0xff]  }
  0xcc   : > { %v1877_v61 = vrot.slane %v5809_v55, 5  ;;  %v1203_v27 = vor.u32 %v1202_v46, %v1198_v33  ;;  %v1208_v36 = vrot.slane %v1206_v32, 5  ;;  %4631 = vmatmul.mubr.msk.bf16.gmra.mrb[16].mxu0 %vm1263_vm9, %v5953_v62  ;;  %v1871_v25 = vsel %vm5561_vm12, %v1869_v7, %v1870_v35  ;;  %v5983_v7 = vld [vmem:[#allocation2 + $0x4] sm:$0xf] }
  0xcd   : > { %4472 = vmatprep.mubr.msk.bf16.mxu1 %vm1263_vm9, %v5961_v21  ;;  %v3983_v22 = vrot.slane %v5838_v53, 9  ;;  %v1194_v41 = vrot.slane %v1193_v13, 4  ;;  %v5973_v18 = vcombine.low %v1868_v40, %v1871_v25  ;;  %v1875_v55 = vsel %vm5561_vm12, %v3982_v28, %v1874_v54 }
  0xce   : > { %v1876_v42 = vrot.slane %v1874_v54, 4  ;;  %v1204_v37 = vrot.slane %v1203_v27, 4  ;;  %v1881_v46 = vrot.slane %v5846_v63, 5  ;;  %v1884_v32 = vrot.slane %v5848_v1, 5 }
  0xcf   : > { %v1199_v8 = vsel %vm5348_vm8, %v1194_v41, %v1198_v33  ;;  %v3938_v13 = vcombine.low %v5981_v5, %v5983_v7  ;;  %4634 = vmatprep.mubr.msk.bf16.mxu0 %vm1263_vm9, %v5973_v18  ;;  %v1888_v35 = vrot.slane %v5908_v52, 5  ;;  %v3984_v54 = vrot.slane %v5906_v11, 9  ;;  %v6002_v27 = vld [vmem:[#allocation3 + $0xc] ss:$0 sps:$4 sm:$0xcc]  }
  0xd0   : > { %v1878_v40 = vsel %vm5561_vm12, %v1876_v42, %v1877_v61  ;;  %v1209_v1 = vsel %vm5348_vm8, %v1204_v37, %v1208_v36  ;;  %v1882_v20 = vsel %vm5561_vm12, %v3983_v22, %v1881_v46  ;;  %v1883_v14 = vrot.slane %v1881_v46, 4 }
  0xd1   : > { %v5995_v33 = vcombine.low %v1875_v55, %v1878_v40  ;;  %v5999_v28 = vcombine.low %v1199_v8, %v1209_v1  ;;  %v1890_v25 = vrot.slane %v1888_v35, 4  ;;  %v1891_v41 = vrot.slane %v5917_v9, 5  ;;  %v6022_v1 = vld [vmem:[#allocation3 + $0x4] ss:$0 sps:$4 sm:$0xcc]  }
  0xd2   : > { %v1885_v61 = vsel %vm5561_vm12, %v1883_v14, %v1884_v32  ;;  %v1895_v36 = vrot.slane %v5941_v31, 5  ;;  %v3985_v22 = vrot.slane %v5939_v26, 9  ;;  %v1898_v42 = vrot.slane %v5929_v2, 5 }
  0xd3   : > { %4473 = vmatmul.mubr.msk.bf16.gmra.mrb[28].mxu1 %vm1263_vm9, %v5999_v28  ;;  %v6010_v55 = vcombine.low %v1882_v20, %v1885_v61  ;;  %v456_v37 = vshrl.u32 %v5081_v58, 16  ;;  %v459_v32 = vshll.u32 %v5081_v58, 16  ;;  %v1889_v9 = vsel %vm5561_vm12, %v3984_v54, %v1888_v35 }
  0xd4   : > { %4478 = vmatprep.mubr.msk.bf16.mxu1 %vm1263_vm9, %v3938_v13  ;;  %4635 = vmatmul.mubr.msk.bf16.gmra.mrb[20].mxu0 %vm1263_vm9, %v5995_v33  ;;  %v1897_v46 = vrot.slane %v1895_v36, 4  ;;  %v3080_v40 = vrot.slane %v6002_v27, 2  ;;  %v1892_v2 = vsel %vm5561_vm12, %v1890_v25, %v1891_v41  ;;  %v6028_v13 = vcombine.low %v5737_v47, %v5744_v23 }
  0xd5   : > { %4638 = vmatprep.mubr.msk.bf16.mxu0 %vm1263_vm9, %v6010_v55  ;;  %v458_v8 = vrot.slane %v456_v37, 7  ;;  %v6032_v58 = vcombine.low %v5766_v17, %v5768_v57  ;;  %v6036_v20 = vcombine.low %v5816_v60, %v5818_v30  ;;  %v1896_v35 = vsel %vm5561_vm12, %v3985_v22, %v1895_v36 }
  0xd6   : > { %v1899_v14 = vsel %vm5561_vm12, %v1897_v46, %v1898_v42  ;;  %5014 = vmatprep.subr.msk.bf16.mxu0 %vm1312_vm3, %v3080_v40  ;;  %v6049_v23 = vcombine.low %v5838_v53, %v5846_v63  ;;  %v6053_v17 = vcombine.low %v5906_v11, %v5908_v52  ;;  %v6057_v57 = vcombine.low %v5939_v26, %v5941_v31 }
  0xd7   : > { %v461_v54 = vor.u32 %v459_v32, %v458_v8  ;;  %v528_v61 = vsel %vm5334_vm7, %v458_v8, 0  ;;  %v1998_v60 = vsel %vm1312_vm3, %v5497_v12, 0  ;;  %v6061_v30 = vcombine.low %v1889_v9, %v1892_v2  ;;  %v5089_v12 = vld [vmem:[#allocation2 + $0x34] sm:$0xf]  ;;  %v5090_v9 = vld [vmem:[#allocation2 + $0x3c] sm:$0xf] }
  0xd8   : > { %v3904_v47 = vcombine.low %v528_v61, %v528_v61  ;;  %v2202_v41 = vrot.slane %v6022_v1, 2  ;;  %v6066_v53 = vcombine.low %v1896_v35, %v1899_v14  ;;  %v6082_v11 = vcombine.low %v5088_v24, %v5089_v12  ;;  %v5091_v8 = vld [vmem:[#allocation2 + $0x40] sm:$0xf] }
  0xd9   : > { %v512_v25 = vsel %vm5334_vm7, 0, %v461_v54  ;;  %v6096_v2 = vcombine.low %v5090_v9, %v5091_v8  ;;  %v6100_v35 = vcombine.low %v5603_v16, %v5605_v43  ;;  %v6124_v9 = vcombine.low %v5638_v44, %v5641_v51  ;;  %v5092_v44 = vld [vmem:[#allocation2 + $0x8] sm:$0x1] }
  0xda   : > { %v3902_v63 = vcombine.low %v512_v25, %v512_v25  ;;  %v3903_v36 = vcombine.high %v512_v25, %v512_v25  ;;  %764 = vst.msk [vmem:[#allocation2 + $0xc8] sm:$0x1] %vm715_vm1, %v3904_v47  ;;  %v1793_v51 = vrot.slane %v5092_v44, 5 }
  0xdb   : > { %4479 = vmatmul.mubr.msk.bf16.vlgmr.msra.gmra.mrb[0].mxu1 %vm1263_vm9, %v5434_v50 }
  0xdc   : > { %4511 = vmatpush3.bf16.msra.mxu1 %v1998_v60  ;;  %4482 = vmatprep.mubr.msk.bf16.mxu1 %vm1263_vm9, %v5629_v19  ;;  %762 = vst.msk [vmem:[#allocation2 + $0xc0] sm:$0xf] %vm712_vm0, %v3902_v63  ;;  %763 = vst.msk [vmem:[#allocation2 + $0xc4] sm:$0xf] %vm712_vm0, %v3903_v36 }
  0xdd   : > { %4639 = vmatmul.mubr.msk.bf16.gmra.mrb[24].mxu0 %vm1263_vm9, %v6061_v30  ;;  %5009 = vmatprep.subr.msk.bf16.mxu1 %vm1312_vm3, %v2202_v41 }
  0xde   : > { %4642 = vmatprep.mubr.msk.bf16.mxu0 %vm1263_vm9, %v6066_v53 }
  0xe1   : > { %v818_v52 = vld [vmem:[#allocation2 + $0xc8] sm:$0x1] }
  0xe2   : > { %v2635_v37 = vrot.slane %v818_v52, 5  ;;  %v2422_v12 = vshll.u32 %v818_v52, 16 }
  0xe3   : > { %4483 = vmatmul.mubr.msk.bf16.gmra.mrb[4].mxu1 %vm1263_vm9, %v5777_v39  ;;  %v6086_v26 = vld [vmem:[#allocation2 + $0xc0] sm:$0xf]  ;;  %v6088_v31 = vld [vmem:[#allocation2 + $0xc4] sm:$0xf] }
  0xe4   : > { %4486 = vmatprep.mubr.msk.bf16.mxu1 %vm1263_vm9, %v6082_v11  ;;  %v4053_v22 = vrot.slane %v6086_v26, 9  ;;  %v2632_v42 = vrot.slane %v6088_v31, 5  ;;  %v2403_v54 = vshrl.u32 %v6086_v26, 16  ;;  %v2406_v61 = vshll.u32 %v6086_v26, 16 }
  0xe5   : > { %v2412_v47 = vshll.u32 %v6088_v31, 16  ;;  %v2416_v25 = vshrl.u32 %v6088_v31, 16  ;;  %v6199_v1 = vcombine.low %v6086_v26, %v6088_v31 }
  0xe6   : > { %v2633_v46 = vsel %vm5561_vm12, %v4053_v22, %v2632_v42  ;;  %v2634_v32 = vrot.slane %v2632_v42, 4  ;;  %v2405_v63 = vrot.slane %v2403_v54, 4  ;;  %v2408_v36 = vrot.slane %v2406_v61, 5  ;;  %v3288_v54 = vld [vmem:[#allocation3 + $0x10] sm:$0x3] }
  0xe7   : > { %v2414_v24 = vrot.slane %v2412_v47, 5  ;;  %v2418_v16 = vrot.slane %v2416_v25, 4  ;;  %v5093_v47 = vld [vmem:[#allocation3 + $0x8] sm:$0x3]  ;;  %v3296_v31 = vsel %vm1312_vm3, %v3288_v54, 0  ;;  %v6495_v25 = vld [vmem:[#allocation10_spill] sm:$0xff] }
  0xe8   : > { %v2636_v14 = vsel %vm5561_vm12, %v2634_v32, %v2635_v37  ;;  %v2409_v43 = vor.u32 %v2408_v36, %v2405_v63  ;;  %v2424_v37 = vrot.slane %v2422_v12, 5  ;;  %v6496_v63 = vld [vmem:[#allocation21_spill] sm:$0xff]  ;;  %v6497_v36 = vld [vmem:[#allocation11_spill] sm:$0xff] }
  0xe9   : > { %v6107_v60 = vcombine.low %v2633_v46, %v2636_v14  ;;  %v2419_v22 = vor.u32 %v2418_v16, %v2414_v24  ;;  %v6120_v46 = vcombine.low %v5616_v3, %v5618_v6  ;;  %v3085_v14 = vsel %vm1312_vm3, %v3080_v40, 0  ;;  %v6499_v16 = vld [vmem:[#allocation12_spill] sm:$0xff]  ;;  %v6502_v12 = vld [vmem:[#allocation15_spill] sm:$0xff] }
  0xea   : > { %v2410_v42 = vrot.slane %v2409_v43, 4  ;;  %v6146_v3 = vcombine.low %v5651_v0, %v5655_v29  ;;  %v1790_v6 = vrot.slane %v5983_v7, 5  ;;  %v3970_v0 = vrot.slane %v5981_v5, 9  ;;  %v6501_v43 = vld [vmem:[#allocation14_spill] sm:$0xff] }
  0xeb   : > { %4487 = vmatmul.mubr.msk.bf16.gmra.mrb[8].mxu1 %vm1263_vm9, %v6096_v2  ;;  %4643 = vmatmul.mubr.msk.bf16.gmra.mrb[28].mxu0 %vm1263_vm9, %v6107_v60  ;;  %v2420_v32 = vrot.slane %v2419_v22, 4  ;;  %v2207_v40 = vsel %vm1312_vm3, %v2202_v41, 0  ;;  %v6211_v41 = vld [vmem:[#allocation2 + $0xd0] sm:$0xf]  ;;  %v6503_v22 = vld [vmem:[#allocation16_spill] sm:$0xff] }
  0xec   : > { %4490 = vmatprep.mubr.msk.bf16.mxu1 %vm1263_vm9, %v6100_v35  ;;  %4648 = vmatprep.mubr.msk.bf16.mxu0 %vm1263_vm9, %v5629_v19  ;;  %v2415_v8 = vsel %vm5348_vm8, %v2410_v42, %v2414_v24  ;;  %v1792_v29 = vrot.slane %v1790_v6, 4  ;;  %v1791_v7 = vsel %vm5561_vm12, %v3970_v0, %v1790_v6  ;;  %v6498_v24 = vld [vmem:[#allocation22_spill] sm:$0xff]  ;;  %v6504_v42 = vld [vmem:[#allocation17_spill] sm:$0xff]  ;;  %v3283_v34 = vrot.slane %v6211_v41, 5 }
  0xed   : > { %v2425_v52 = vsel %vm5348_vm8, %v2420_v32, %v2424_v37  ;;  %v6505_v37 = vld [vmem:[#allocation18_spill] sm:$0xff] }
  0xee   : > { %v6133_v61 = vcombine.low %v2415_v8, %v2425_v52  ;;  %v1794_v27 = vsel %vm5561_vm12, %v1792_v29, %v1793_v51  ;;  %v6506_v52 = vld [vmem:[#allocation19_spill] sm:$0xff]  ;;  %v821_v29 = vld [vmem:[#allocation2 + $0xd4] sm:$0x1] }
  0xef   : > { %v3986_v5 = vcombine.low %v1791_v7, %v1794_v27  ;;  %v6507_v7 = vld [vmem:[#allocation20_spill] sm:$0xff]  ;;  %v6508_v27 = vld [vmem:[#allocation9_spill] sm:$0xff] }
  0xf3   : > { %4491 = vmatmul.mubr.msk.bf16.gmra.mrb[12].mxu1 %vm1263_vm9, %v6120_v46  ;;  %4649 = vmatmul.mubr.msk.bf16.vlgmr.msra.gmra.mrb[0].mxu0 %vm1263_vm9, %v5777_v39 }
  0xf4   : > { %4494 = vmatprep.mubr.msk.bf16.mxu1 %vm1263_vm9, %v6124_v9  ;;  %4681 = vmatpush3.bf16.msra.mxu0 %v3085_v14  ;;  %v3063_v14 = vshrl.u32 %v6211_v41, 16 }
  0xf5   : > { %4652 = vmatprep.mubr.msk.bf16.mxu0 %vm1263_vm9, %v6082_v11  ;;  %5015 = vmatprep.subr.msk.bf16.mxu0 %vm1312_vm3, %v3288_v54  ;;  %v3059_v54 = vshll.u32 %v6211_v41, 16 }
  0xf6   : > { %v3065_v0 = vrot.slane %v3063_v14, 4 }
  0xf7   : > { %v3061_v51 = vrot.slane %v3059_v54, 5 }
  0xfb   : > { %4495 = vmatmul.mubr.msk.bf16.gmra.mrb[16].mxu1 %vm1263_vm9, %v6146_v3  ;;  %4653 = vmatmul.mubr.msk.bf16.gmra.mrb[4].mxu0 %vm1263_vm9, %v6096_v2 }
  0xfc   : > { %4498 = vmatprep.mubr.msk.bf16.mxu1 %vm1263_vm9, %v6028_v13  ;;  %4656 = vmatprep.mubr.msk.bf16.mxu0 %vm1263_vm9, %v6100_v35 }
 0x103   : > { %4499 = vmatmul.mubr.msk.bf16.gmra.mrb[20].mxu1 %vm1263_vm9, %v6032_v58  ;;  %4657 = vmatmul.mubr.msk.bf16.gmra.mrb[8].mxu0 %vm1263_vm9, %v6120_v46 }
 0x104   : > { %4502 = vmatprep.mubr.msk.bf16.mxu1 %vm1263_vm9, %v6036_v20  ;;  %4660 = vmatprep.mubr.msk.bf16.mxu0 %vm1263_vm9, %v6124_v9 }
 0x10b   : > { %4503 = vmatmul.mubr.msk.bf16.gmra.mrb[24].mxu1 %vm1263_vm9, %v6049_v23  ;;  %4661 = vmatmul.mubr.msk.bf16.gmra.mrb[12].mxu0 %vm1263_vm9, %v6146_v3 }
 0x10c   : > { %4506 = vmatprep.mubr.msk.bf16.mxu1 %vm1263_vm9, %v6053_v17  ;;  %4664 = vmatprep.mubr.msk.bf16.mxu0 %vm1263_vm9, %v6028_v13 }
 0x113   : > { %4507 = vmatmul.mubr.msk.bf16.gmra.mrb[28].mxu1 %vm1263_vm9, %v6057_v57  ;;  %4665 = vmatmul.mubr.msk.bf16.gmra.mrb[16].mxu0 %vm1263_vm9, %v6032_v58 }
 0x114   : > { %4512 = vmatprep.mubr.msk.bf16.mxu1 %vm1263_vm9, %v3986_v5  ;;  %4668 = vmatprep.mubr.msk.bf16.mxu0 %vm1263_vm9, %v6036_v20  ;;  %v3066_v5 = vor.u32 %v3065_v0, %v3061_v51 }
 0x11b   : > { %4513 = vmatmul.mubr.msk.bf16.vlgmr.msra.gmra.mrb[0].mxu1 %vm1263_vm9, %v5625_v15  ;;  %4669 = vmatmul.mubr.msk.bf16.gmra.mrb[20].mxu0 %vm1263_vm9, %v6049_v23  ;;  %v6209_v15 = vld [vmem:[#allocation2 + $0xcc] sm:$0xf] }
 0x11c   : > { %4545 = vmatpush3.bf16.msra.mxu1 %v2207_v40  ;;  %4516 = vmatprep.mubr.msk.bf16.mxu1 %vm1263_vm9, %v5610_v49  ;;  %v4072_v26 = vcombine.low %v6209_v15, %v6211_v41  ;;  %v3050_v32 = vshrl.u32 %v6209_v15, 16  ;;  %v3053_v8 = vshll.u32 %v6209_v15, 16  ;;  %v3069_v40 = vshll.u32 %v821_v29, 16 }
 0x11d   : > { %4672 = vmatprep.mubr.msk.bf16.mxu0 %vm1263_vm9, %v6053_v17  ;;  %5011 = vmatprep.subr.msk.bf16.mxu1 %vm1312_vm3, %v5093_v47 }
 0x11e   : > { %v3052_v6 = vrot.slane %v3050_v32, 4  ;;  %v3055_v44 = vrot.slane %v3053_v8, 5 }
 0x123   : > { %4517 = vmatmul.mubr.msk.bf16.gmra.mrb[4].mxu1 %vm1263_vm9, %v5727_v45  ;;  %4673 = vmatmul.mubr.msk.bf16.gmra.mrb[24].mxu0 %vm1263_vm9, %v6057_v57 }
 0x124   : > { %4520 = vmatprep.mubr.msk.bf16.mxu1 %vm1263_vm9, %v5740_v59  ;;  %4676 = vmatprep.mubr.msk.bf16.mxu0 %vm1263_vm9, %v6199_v1 }
 0x12b   : > { %4521 = vmatmul.mubr.msk.bf16.gmra.mrb[8].mxu1 %vm1263_vm9, %v5822_v4  ;;  %4677 = vmatmul.mubr.msk.bf16.gmra.mrb[28].mxu0 %vm1263_vm9, %v4072_v26  ;;  %v3067_v26 = vrot.slane %v3066_v5, 4 }
 0x12c   : > { %4524 = vmatprep.mubr.msk.bf16.mxu1 %vm1263_vm9, %v5850_v38  ;;  %4682 = vmatprep.mubr.msk.bf16.mxu0 %vm1263_vm9, %v5481_v56  ;;  %v6500_v56 = vld [vmem:[#allocation13_spill] sm:$0xff] }
 0x133   : > { %4525 = vmatmul.mubr.msk.bf16.gmra.mrb[12].mxu1 %vm1263_vm9, %v5895_v48  ;;  %4683 = vmatmul.mubr.msk.bf16.vlgmr.msra.gmra.mrb[0].mxu0 %vm1263_vm9, %v6495_v25 }
 0x134   : > { %4528 = vmatprep.mubr.msk.bf16.mxu1 %vm1263_vm9, %v6496_v63  ;;  %4715 = vmatpush3.bf16.msra.mxu0 %v3296_v31  ;;  %v3071_v31 = vrot.slane %v3069_v40, 5 }
 0x135   : > { %4686 = vmatprep.mubr.msk.bf16.mxu0 %vm1263_vm9, %v6497_v36 }
 0x13b   : > { %4529 = vmatmul.mubr.msk.bf16.gmra.mrb[16].mxu1 %vm1263_vm9, %v6498_v24  ;;  %4687 = vmatmul.mubr.msk.bf16.gmra.mrb[4].mxu0 %vm1263_vm9, %v6499_v16 }
 0x13c   : > { %4532 = vmatprep.mubr.msk.bf16.mxu1 %vm1263_vm9, %v5953_v62  ;;  %4690 = vmatprep.mubr.msk.bf16.mxu0 %vm1263_vm9, %v6500_v56 }
 0x143   : > { %4533 = vmatmul.mubr.msk.bf16.gmra.mrb[20].mxu1 %vm1263_vm9, %v5973_v18  ;;  %4691 = vmatmul.mubr.msk.bf16.gmra.mrb[8].mxu0 %vm1263_vm9, %v6501_v43 }
 0x144   : > { %4536 = vmatprep.mubr.msk.bf16.mxu1 %vm1263_vm9, %v5995_v33  ;;  %4694 = vmatprep.mubr.msk.bf16.mxu0 %vm1263_vm9, %v6502_v12 }
 0x14b   : > { %4537 = vmatmul.mubr.msk.bf16.gmra.mrb[24].mxu1 %vm1263_vm9, %v6010_v55  ;;  %4695 = vmatmul.mubr.msk.bf16.gmra.mrb[12].mxu0 %vm1263_vm9, %v6503_v22 }
 0x14c   : > { %4540 = vmatprep.mubr.msk.bf16.mxu1 %vm1263_vm9, %v6061_v30  ;;  %4698 = vmatprep.mubr.msk.bf16.mxu0 %vm1263_vm9, %v6504_v42 }
 0x153   : > { %4541 = vmatmul.mubr.msk.bf16.gmra.mrb[28].mxu1 %vm1263_vm9, %v6066_v53  ;;  %4699 = vmatmul.mubr.msk.bf16.gmra.mrb[16].mxu0 %vm1263_vm9, %v6505_v37 }
 0x154   : > { %4546 = vmatprep.mubr.msk.bf16.mxu1 %vm1263_vm9, %v5434_v50  ;;  %4702 = vmatprep.mubr.msk.bf16.mxu0 %vm1263_vm9, %v6506_v52  ;;  %v3056_v50 = vor.u32 %v3055_v44, %v3052_v6 }
 0x156   : > { %v3057_v47 = vrot.slane %v3056_v50, 4 }
 0x15b   : > { %4547 = vmatmul.mubr.msk.bf16.vlgmr.msra.gmra.mrb[0].mxu1 %vm1263_vm9, %v5629_v19  ;;  %4703 = vmatmul.mubr.msk.bf16.gmra.mrb[20].mxu0 %vm1263_vm9, %v6507_v7  ;;  %v3062_v19 = vsel %vm5348_vm8, %v3057_v47, %v3061_v51 }
 0x15c   : > { %4749 = vmatpush3.bf16.msra.mxu1 %v6508_v27  ;;  %4550 = vmatprep.mubr.msk.bf16.mxu1 %vm1263_vm9, %v5777_v39  ;;  %v3072_v39 = vsel %vm5348_vm8, %v3067_v26, %v3071_v31 }
 0x15d   : > { %4706 = vmatprep.mubr.msk.bf16.mxu0 %vm1263_vm9, %v5961_v21  ;;  %v4089_v25 = vcombine.low %v3062_v19, %v3072_v39 }
 0x163   : > { %4551 = vmatmul.mubr.msk.bf16.gmra.mrb[4].mxu1 %vm1263_vm9, %v6082_v11  ;;  %4707 = vmatmul.mubr.msk.bf16.gmra.mrb[24].mxu0 %vm1263_vm9, %v5999_v28  ;;  %v6366_v11 = vld [vmem:[#allocation5] ss:$0 sm:$0xff] }
 0x164   : > { %4554 = vmatprep.mubr.msk.bf16.mxu1 %vm1263_vm9, %v6096_v2  ;;  %4710 = vmatprep.mubr.msk.bf16.mxu0 %vm1263_vm9, %v6133_v61 }
 0x16b   : > { %4555 = vmatmul.mubr.msk.bf16.gmra.mrb[8].mxu1 %vm1263_vm9, %v6100_v35  ;;  %4711 = vmatmul.mubr.msk.bf16.gmra.mrb[28].mxu0 %vm1263_vm9, %v4089_v25 }
 0x16c   : > { %4558 = vmatprep.mubr.msk.bf16.mxu1 %vm1263_vm9, %v6120_v46  ;;  %4716 = vmatprep.mubr.msk.bf16.mxu0 %vm1263_vm9, %v5610_v49  ;;  %v4107_v49 = vrot.slane %v6209_v15, 9 }
 0x173   : > { %4559 = vmatmul.mubr.msk.bf16.gmra.mrb[12].mxu1 %vm1263_vm9, %v6124_v9  ;;  %4717 = vmatmul.mubr.msk.bf16.vlgmr.msra.gmra.mrb[0].mxu0 %vm1263_vm9, %v5727_v45  ;;  %v3285_v45 = vrot.slane %v3283_v34, 4 }
 0x174   : > { %4562 = vmatprep.mubr.msk.bf16.mxu1 %vm1263_vm9, %v6146_v3  ;;  %4720 = vmatprep.mubr.msk.bf16.mxu0 %vm1263_vm9, %v5740_v59  ;;  %v3286_v59 = vrot.slane %v821_v29, 5 }
 0x17b   : > { %4563 = vmatmul.mubr.msk.bf16.gmra.mrb[16].mxu1 %vm1263_vm9, %v6028_v13  ;;  %4721 = vmatmul.mubr.msk.bf16.gmra.mrb[4].mxu0 %vm1263_vm9, %v5822_v4  ;;  %v3284_v4 = vsel %vm5561_vm12, %v4107_v49, %v3283_v34 }
 0x17c   : > { %4566 = vmatprep.mubr.msk.bf16.mxu1 %vm1263_vm9, %v6032_v58  ;;  %4724 = vmatprep.mubr.msk.bf16.mxu0 %vm1263_vm9, %v5850_v38  ;;  %v3287_v38 = vsel %vm5561_vm12, %v3285_v45, %v3286_v59 }
 0x183   : > { %4567 = vmatmul.mubr.msk.bf16.gmra.mrb[20].mxu1 %vm1263_vm9, %v6036_v20  ;;  %4725 = vmatmul.mubr.msk.bf16.gmra.mrb[8].mxu0 %vm1263_vm9, %v5895_v48  ;;  %v4108_v48 = vcombine.low %v3284_v4, %v3287_v38 }
 0x184   : > { %4570 = vmatprep.mubr.msk.bf16.mxu1 %vm1263_vm9, %v6049_v23  ;;  %4728 = vmatprep.mubr.msk.bf16.mxu0 %vm1263_vm9, %v6496_v63 }
 0x18b   : > { %4571 = vmatmul.mubr.msk.bf16.gmra.mrb[24].mxu1 %vm1263_vm9, %v6053_v17  ;;  %4729 = vmatmul.mubr.msk.bf16.gmra.mrb[12].mxu0 %vm1263_vm9, %v6498_v24 }
 0x18c   : > { %4574 = vmatprep.mubr.msk.bf16.mxu1 %vm1263_vm9, %v6057_v57  ;;  %4732 = vmatprep.mubr.msk.bf16.mxu0 %vm1263_vm9, %v5953_v62 }
 0x193   : > { %4575 = vmatmul.mubr.msk.bf16.gmra.mrb[28].mxu1 %vm1263_vm9, %v6199_v1  ;;  %4733 = vmatmul.mubr.msk.bf16.gmra.mrb[16].mxu0 %vm1263_vm9, %v5973_v18 }
 0x194   : > { %4596 = vmatprep.mubr.msk.bf16.mxu1 %vm1263_vm9, %v6503_v22  ;;  %4736 = vmatprep.mubr.msk.bf16.mxu0 %vm1263_vm9, %v5995_v33 }
 0x19b   : > { %4597 = vmatmul.mubr.msk.bf16.vlgmr.msra.gmra.mrb[16].mxu1 %vm1263_vm9, %v6504_v42  ;;  %4737 = vmatmul.mubr.msk.bf16.gmra.mrb[20].mxu0 %vm1263_vm9, %v6010_v55 }
 0x19c   : > { %4600 = vmatprep.mubr.msk.bf16.mxu1 %vm1263_vm9, %v6505_v37  ;;  %4740 = vmatprep.mubr.msk.bf16.mxu0 %vm1263_vm9, %v6061_v30 }
 0x1a3   : > { %4601 = vmatmul.mubr.msk.bf16.gmra.mrb[20].mxu1 %vm1263_vm9, %v6506_v52  ;;  %4741 = vmatmul.mubr.msk.bf16.gmra.mrb[24].mxu0 %vm1263_vm9, %v6066_v53 }
 0x1a4   : > { %4604 = vmatprep.mubr.msk.bf16.mxu1 %vm1263_vm9, %v6507_v7  ;;  %4744 = vmatprep.mubr.msk.bf16.mxu0 %vm1263_vm9, %v6107_v60 }
 0x1ab   : > { %4605 = vmatmul.mubr.msk.bf16.gmra.mrb[24].mxu1 %vm1263_vm9, %v5961_v21  ;;  %4745 = vmatmul.mubr.msk.bf16.gmra.mrb[28].mxu0 %vm1263_vm9, %v4108_v48 }
 0x1ac   : > { %4608 = vmatprep.mubr.msk.bf16.mxu1 %vm1263_vm9, %v5999_v28 }
 0x1b3   : > { %4609 = vmatmul.mubr.msk.bf16.gmra.mrb[28].mxu1 %vm1263_vm9, %v6133_v61 }
 0x22e   : > { %v4548_v62 = vpop.f32.mrb[0].mxu1 }
 0x22f   : > { %v2243_v18 = vpop.f32.mrb[1].mxu1 }
 0x230   : > { %v4549_v33 = vpop.f32.mrb[2].mxu1 }
 0x231   : > { %v2246_v55 = vpop.f32.mrb[3].mxu1 }
 0x236   : > { %v4552_v13 = vpop.f32.mrb[4].mxu1 }
 0x237   : > { %v2259_v58 = vpop.f32.mrb[5].mxu1 }
 0x238   : > { %v4553_v10 = vpop.f32.mrb[6].mxu1 }
 0x239   : > { %v2262_v20 = vpop.f32.mrb[7].mxu1 }
 0x23e   : > { %v4556_v23 = vpop.f32.mrb[8].mxu1 }
 0x23f   : > { %v2275_v17 = vpop.f32.mrb[9].mxu1 }
 0x240   : > { %v4557_v57 = vpop.f32.mrb[10].mxu1 }
 0x241   : > { %v2278_v21 = vpop.f32.mrb[11].mxu1 }
 0x246   : > { %v6364_v30 = vpop.f32.mrb[12].mxu1  ;;  %v4718_v53 = vpop.f32.mrb[0].mxu0 }
 0x247   : > { %v6368_v28 = vpop.f32.mrb[13].mxu1  ;;  %v4750_v2 = vadd.f32 %v4718_v53, %v4548_v62  ;;  %v3332_v35 = vpop.f32.mrb[1].mxu0 }
 0x248   : > { %v6370_v60 = vpop.f32.mrb[14].mxu1  ;;  %v4751_v46 = vadd.f32 %v3332_v35, %v2243_v18  ;;  %v4719_v9 = vpop.f32.mrb[2].mxu0 }
 0x249   : > { %v6372_v61 = vpop.f32.mrb[15].mxu1  ;;  %v3500_v3 = vadd.f32 %v4750_v2, %v6366_v11  ;;  %v4752_v1 = vadd.f32 %v4719_v9, %v4549_v33  ;;  %v3335_v15 = vpop.f32.mrb[3].mxu0 }
 0x24a   : > { %v3498_v41 = vadd.f32 %v4751_v46, %v6366_v11  ;;  %v4753_v63 = vadd.f32 %v3335_v15, %v2246_v55 }
 0x24b   : > { %v3501_v36 = vadd.f32 %v4752_v1, %v6366_v11  ;;  %v3532_v16 = vmax.f32 %v3500_v3, 0.0 }
 0x24c   : > { %v3499_v24 = vadd.f32 %v4753_v63, %v6366_v11  ;;  %v3530_v43 = vmax.f32 %v3498_v41, 0.0 }
 0x24d   : > { %v3533_v56 = vmax.f32 %v3501_v36, 0.0 }
 0x24e   : > { %v3531_v12 = vmax.f32 %v3499_v24, 0.0  ;;  %v4722_v22 = vpop.f32.mrb[4].mxu0 }
 0x24f   : > { %v4202_v42 = vpack.c.bf16 %v3533_v56, %v3532_v16  ;;  %v4754_v37 = vadd.f32 %v4722_v22, %v4552_v13  ;;  %v3348_v32 = vpop.f32.mrb[5].mxu0 }
 0x250   : > { %v4197_v8 = vpack.c.bf16 %v3531_v12, %v3530_v43  ;;  %v4755_v14 = vadd.f32 %v3348_v32, %v2259_v58  ;;  %v4723_v52 = vpop.f32.mrb[6].mxu0 }
 0x251   : > { %4274 = vst [vmem:[%s6383_s30 + $0x8] sm:$0xff] %v4202_v42   ;;  %v3504_v54 = vadd.f32 %v4754_v37, %v6366_v11  ;;  %v4756_v6 = vadd.f32 %v4723_v52, %v4553_v10  ;;  %v3351_v44 = vpop.f32.mrb[7].mxu0 }
 0x252   : > { %4198 = vst [vmem:[%s6383_s30] sm:$0xff] %v4197_v8   ;;  %v3502_v51 = vadd.f32 %v4755_v14, %v6366_v11  ;;  %v4757_v0 = vadd.f32 %v3351_v44, %v2262_v20 }
 0x253   : > { %v3505_v29 = vadd.f32 %v4756_v6, %v6366_v11  ;;  %v3536_v27 = vmax.f32 %v3504_v54, 0.0 }
 0x254   : > { %v3503_v7 = vadd.f32 %v4757_v0, %v6366_v11  ;;  %v3534_v5 = vmax.f32 %v3502_v51, 0.0 }
 0x255   : > { %v3537_v50 = vmax.f32 %v3505_v29, 0.0 }
 0x256   : > { %v3535_v40 = vmax.f32 %v3503_v7, 0.0  ;;  %v4726_v47 = vpop.f32.mrb[8].mxu0 }
 0x257   : > { %v4212_v26 = vpack.c.bf16 %v3537_v50, %v3536_v27  ;;  %v4758_v31 = vadd.f32 %v4726_v47, %v4556_v23  ;;  %v3364_v19 = vpop.f32.mrb[9].mxu0 }
 0x258   : > { %v4207_v39 = vpack.c.bf16 %v3535_v40, %v3534_v5  ;;  %v4759_v25 = vadd.f32 %v3364_v19, %v2275_v17  ;;  %v4727_v34 = vpop.f32.mrb[10].mxu0 }
 0x259   : > { %4276 = vst [vmem:[%s6383_s30 + $0x18] sm:$0xff] %v4212_v26   ;;  %v3508_v49 = vadd.f32 %v4758_v31, %v6366_v11  ;;  %v4760_v45 = vadd.f32 %v4727_v34, %v4557_v57  ;;  %v3367_v59 = vpop.f32.mrb[11].mxu0 }
 0x25a   : > { %4275 = vst [vmem:[%s6383_s30 + $0x10] sm:$0xff] %v4207_v39   ;;  %v3506_v4 = vadd.f32 %v4759_v25, %v6366_v11  ;;  %v4761_v38 = vadd.f32 %v3367_v59, %v2278_v21 }
 0x25b   : > { %v3509_v48 = vadd.f32 %v4760_v45, %v6366_v11  ;;  %v3540_v18 = vmax.f32 %v3508_v49, 0.0 }
 0x25c   : > { %v3507_v62 = vadd.f32 %v4761_v38, %v6366_v11  ;;  %v3538_v55 = vmax.f32 %v3506_v4, 0.0 }
 0x25d   : > { %v3541_v33 = vmax.f32 %v3509_v48, 0.0 }
 0x25e   : > { %v3539_v13 = vmax.f32 %v3507_v62, 0.0  ;;  %v4730_v58 = vpop.f32.mrb[12].mxu0 }
 0x25f   : > { %v4222_v10 = vpack.c.bf16 %v3541_v33, %v3540_v18  ;;  %v4762_v20 = vadd.f32 %v4730_v58, %v6364_v30  ;;  %v3380_v23 = vpop.f32.mrb[13].mxu0 }
 0x260   : > { %v4217_v17 = vpack.c.bf16 %v3539_v13, %v3538_v55  ;;  %v4763_v57 = vadd.f32 %v3380_v23, %v6368_v28  ;;  %v4731_v53 = vpop.f32.mrb[14].mxu0 }
 0x261   : > { %4278 = vst [vmem:[%s6383_s30 + $0x28] sm:$0xff] %v4222_v10   ;;  %v3512_v21 = vadd.f32 %v4762_v20, %v6366_v11  ;;  %v4764_v2 = vadd.f32 %v4731_v53, %v6370_v60  ;;  %v3383_v35 = vpop.f32.mrb[15].mxu0 }
 0x262   : > { %4277 = vst [vmem:[%s6383_s30 + $0x20] sm:$0xff] %v4217_v17   ;;  %v3510_v46 = vadd.f32 %v4763_v57, %v6366_v11  ;;  %v4765_v9 = vadd.f32 %v3383_v35, %v6372_v61 }
 0x263   : > { %v3513_v30 = vadd.f32 %v4764_v2, %v6366_v11  ;;  %v3544_v1 = vmax.f32 %v3512_v21, 0.0 }
 0x264   : > { %v3511_v3 = vadd.f32 %v4765_v9, %v6366_v11  ;;  %v3542_v15 = vmax.f32 %v3510_v46, 0.0 }
 0x265   : > { %v3545_v28 = vmax.f32 %v3513_v30, 0.0 }
 0x266   : > { %v3543_v41 = vmax.f32 %v3511_v3, 0.0  ;;  %v4734_v63 = vpop.f32.mrb[16].mxu0 }
 0x267   : > { %v4232_v36 = vpack.c.bf16 %v3545_v28, %v3544_v1  ;;  %v3396_v24 = vpop.f32.mrb[17].mxu0 }
 0x268   : > { %v4227_v60 = vpack.c.bf16 %v3543_v41, %v3542_v15  ;;  %v4735_v16 = vpop.f32.mrb[18].mxu0 }
 0x269   : > { %4280 = vst [vmem:[%s6383_s30 + $0x38] sm:$0xff] %v4232_v36   ;;  %v3399_v56 = vpop.f32.mrb[19].mxu0 }
 0x26a   : > { %4279 = vst [vmem:[%s6383_s30 + $0x30] sm:$0xff] %v4227_v60  }
 0x26e   : > { %v4598_v43 = vpop.f32.mrb[16].mxu1  ;;  %v4738_v12 = vpop.f32.mrb[20].mxu0 }
 0x26f   : > { %v2534_v22 = vpop.f32.mrb[17].mxu1  ;;  %v4766_v61 = vadd.f32 %v4734_v63, %v4598_v43  ;;  %v3412_v42 = vpop.f32.mrb[21].mxu0 }
 0x270   : > { %v4599_v37 = vpop.f32.mrb[18].mxu1  ;;  %v4767_v32 = vadd.f32 %v3396_v24, %v2534_v22  ;;  %v4739_v8 = vpop.f32.mrb[22].mxu0 }
 0x271   : > { %v3516_v14 = vadd.f32 %v4766_v61, %v6366_v11  ;;  %v2537_v52 = vpop.f32.mrb[19].mxu1  ;;  %v4768_v54 = vadd.f32 %v4735_v16, %v4599_v37  ;;  %v3415_v6 = vpop.f32.mrb[23].mxu0 }
 0x272   : > { %v3514_v44 = vadd.f32 %v4767_v32, %v6366_v11  ;;  %v4769_v51 = vadd.f32 %v3399_v56, %v2537_v52 }
 0x273   : > { %v3517_v0 = vadd.f32 %v4768_v54, %v6366_v11  ;;  %v3548_v7 = vmax.f32 %v3516_v14, 0.0 }
 0x274   : > { %v3515_v29 = vadd.f32 %v4769_v51, %v6366_v11  ;;  %v3546_v50 = vmax.f32 %v3514_v44, 0.0 }
 0x275   : > { %v3549_v27 = vmax.f32 %v3517_v0, 0.0 }
 0x276   : > { %v3547_v5 = vmax.f32 %v3515_v29, 0.0  ;;  %v4602_v40 = vpop.f32.mrb[20].mxu1  ;;  %v4742_v47 = vpop.f32.mrb[24].mxu0 }
 0x277   : > { %v4242_v26 = vpack.c.bf16 %v3549_v27, %v3548_v7  ;;  %v2550_v31 = vpop.f32.mrb[21].mxu1  ;;  %v4770_v19 = vadd.f32 %v4738_v12, %v4602_v40  ;;  %v3428_v39 = vpop.f32.mrb[25].mxu0 }
 0x278   : > { %v4237_v25 = vpack.c.bf16 %v3547_v5, %v3546_v50  ;;  %v4603_v34 = vpop.f32.mrb[22].mxu1  ;;  %v4771_v49 = vadd.f32 %v3412_v42, %v2550_v31  ;;  %v4743_v45 = vpop.f32.mrb[26].mxu0 }
 0x279   : > { %4282 = vst [vmem:[%s6383_s30 + $0x48] sm:$0xff] %v4242_v26   ;;  %v3520_v59 = vadd.f32 %v4770_v19, %v6366_v11  ;;  %v2553_v4 = vpop.f32.mrb[23].mxu1  ;;  %v4772_v38 = vadd.f32 %v4739_v8, %v4603_v34  ;;  %v3431_v48 = vpop.f32.mrb[27].mxu0 }
 0x27a   : > { %4281 = vst [vmem:[%s6383_s30 + $0x40] sm:$0xff] %v4237_v25   ;;  %v3518_v62 = vadd.f32 %v4771_v49, %v6366_v11  ;;  %v4773_v18 = vadd.f32 %v3415_v6, %v2553_v4 }
 0x27b   : > { %v3521_v33 = vadd.f32 %v4772_v38, %v6366_v11  ;;  %v3552_v13 = vmax.f32 %v3520_v59, 0.0 }
 0x27c   : > { %v3519_v55 = vadd.f32 %v4773_v18, %v6366_v11  ;;  %v3550_v10 = vmax.f32 %v3518_v62, 0.0 }
 0x27d   : > { %v3553_v58 = vmax.f32 %v3521_v33, 0.0 }
 0x27e   : > { %v3551_v20 = vmax.f32 %v3519_v55, 0.0  ;;  %v4606_v23 = vpop.f32.mrb[24].mxu1  ;;  %v4746_v17 = vpop.f32.mrb[28].mxu0 }
 0x27f   : > { %v4252_v57 = vpack.c.bf16 %v3553_v58, %v3552_v13  ;;  %v2566_v53 = vpop.f32.mrb[25].mxu1  ;;  %v4774_v21 = vadd.f32 %v4742_v47, %v4606_v23  ;;  %v3444_v2 = vpop.f32.mrb[29].mxu0 }
 0x280   : > { %v4247_v35 = vpack.c.bf16 %v3551_v20, %v3550_v10  ;;  %v4607_v46 = vpop.f32.mrb[26].mxu1  ;;  %v4775_v9 = vadd.f32 %v3428_v39, %v2566_v53  ;;  %v4747_v30 = vpop.f32.mrb[30].mxu0 }
 0x281   : > { %4284 = vst [vmem:[%s6383_s30 + $0x58] sm:$0xff] %v4252_v57   ;;  %v3524_v3 = vadd.f32 %v4774_v21, %v6366_v11  ;;  %v2569_v1 = vpop.f32.mrb[27].mxu1  ;;  %v4776_v28 = vadd.f32 %v4743_v45, %v4607_v46  ;;  %v3447_v15 = vpop.f32.mrb[31].mxu0 }
 0x282   : > { %4283 = vst [vmem:[%s6383_s30 + $0x50] sm:$0xff] %v4247_v35   ;;  %v3522_v41 = vadd.f32 %v4775_v9, %v6366_v11  ;;  %v4777_v63 = vadd.f32 %v3431_v48, %v2569_v1 }
 0x283   : > { %v3525_v36 = vadd.f32 %v4776_v28, %v6366_v11  ;;  %v3556_v60 = vmax.f32 %v3524_v3, 0.0 }
 0x284   : > { %v3523_v24 = vadd.f32 %v4777_v63, %v6366_v11  ;;  %v3554_v56 = vmax.f32 %v3522_v41, 0.0 }
 0x285   : > { %v3557_v16 = vmax.f32 %v3525_v36, 0.0 }
 0x286   : > { %v3555_v43 = vmax.f32 %v3523_v24, 0.0  ;;  %v4610_v12 = vpop.f32.mrb[28].mxu1 }
 0x287   : > { %v4262_v22 = vpack.c.bf16 %v3557_v16, %v3556_v60  ;;  %v2582_v61 = vpop.f32.mrb[29].mxu1  ;;  %v4778_v42 = vadd.f32 %v4746_v17, %v4610_v12 }
 0x288   : > { %v4257_v37 = vpack.c.bf16 %v3555_v43, %v3554_v56  ;;  %v4611_v32 = vpop.f32.mrb[30].mxu1  ;;  %v4779_v8 = vadd.f32 %v3444_v2, %v2582_v61 }
 0x289   : > { %4286 = vst [vmem:[%s6383_s30 + $0x68] sm:$0xff] %v4262_v22   ;;  %v3528_v14 = vadd.f32 %v4778_v42, %v6366_v11  ;;  %v2585_v52 = vpop.f32.mrb[31].mxu1  ;;  %v4780_v54 = vadd.f32 %v4747_v30, %v4611_v32 }
 0x28a   : > { %4285 = vst [vmem:[%s6383_s30 + $0x60] sm:$0xff] %v4257_v37   ;;  %v3526_v6 = vadd.f32 %v4779_v8, %v6366_v11  ;;  %v4781_v44 = vadd.f32 %v3447_v15, %v2585_v52 }
 0x28b   : > { %v3529_v51 = vadd.f32 %v4780_v54, %v6366_v11  ;;  %v3560_v29 = vmax.f32 %v3528_v14, 0.0 }
 0x28c   : > { %v3527_v0 = vadd.f32 %v4781_v44, %v6366_v11  ;;  %v3558_v27 = vmax.f32 %v3526_v6, 0.0 }
 0x28d   : > { %v3561_v7 = vmax.f32 %v3529_v51, 0.0 }
 0x28e   : > { %v3559_v50 = vmax.f32 %v3527_v0, 0.0 }
 0x28f   : > { %v4272_v5 = vpack.c.bf16 %v3561_v7, %v3560_v29 }
 0x290   : > { %v4267_v40 = vpack.c.bf16 %v3559_v50, %v3558_v27 }
 0x291   : > { %4288 = vst [vmem:[%s6383_s30 + $0x78] sm:$0xff] %v4272_v5  }
 0x292   : > { %4287 = vst [vmem:[%s6383_s30 + $0x70] sm:$0xff] %v4267_v40  }
 0x293 PF: > { %s15_s14 = sadd.s32 1, %s5180_s14   ;;  %s6509_s12 = smov %s5176_s13 }
 0x294   : > { %p12_p3 = scmp.ge.s32.totalorder %s15_s14, 4   ;;  %s6510_s13 = smov %s6512_s16 }
 0x296   :  { %14 = sbr.rel (!%p12_p3) target bundleno = 3 (0x3), region = 77 }
 0x29d   :  { %3749 = vsyncpa [#allocation4], 1 }
 0x29e   :  { %3751 = vsyncpa [#allocation4 + $0x1], 1 }
 0x29f   :  { %3752 = vsyncpa [#allocation6], 1 }

// kernel: basic_block_forward.3
= control target key start
LH: loop header
LB: loop body
LE: loop exit
PB: predicated region body
PF: predicated region fallthrough
CT: control target
= control target key end

     0   :  { %s6164_s21 = smov 0   ;;  %s6166_s22 = smov 0   ;;  %s7320_s0 = inlined_call_operand.vmem [shape: bf16[2,16,16,128], index: 0, kind: input, shape index: {}]   ;;  %s7321_s1 = inlined_call_operand.vmem [shape: bf16[1152,128], index: 1, kind: input, shape index: {}]   ;;  %s7322_s2 = inlined_call_operand.vmem [shape: f32[1,128], index: 2, kind: input, shape index: {}]   ;;  %s7323_s3 = inlined_call_operand.vmem [shape: bf16[2,16,16,4], index: 3, kind: input, shape index: {}]   ;;  %s7324_s4 = inlined_call_operand.vmem [shape: bf16[4,128], index: 4, kind: input, shape index: {}]   ;;  %s7325_s5 = inlined_call_operand.vmem [shape: f32[1,128], index: 5, kind: input, shape index: {}]   ;;  %s7326_s6 = inlined_call_operand.vmem [shape: f32[2,16,16,128], index: 6, kind: output, shape index: {}]  }
   0x1   :  { %s6168_s23 = smov 0  }
   0x2 LB: > { %s28_s24 = sadd.s32 1, %s6122_s22  ;;  %p4677_p0 = scmp.ge.s32.totalorder %s6126_s23, 1  ;;  %s6126_s23 = sphi %s6168_s23, %s16_s23   ;;  %s6122_s22 = sphi %s6166_s22, %s7374_s22   ;;  %s6118_s21 = sphi %s6164_s21, %s7373_s21  }
   0x3   : > { %p30_p1 = scmp.ge.s32.totalorder %s28_s24, 2  ;;  %p270_p2 = scmp.lt.s32.totalorder %s6126_s23, 3 }
   0x5   : > { %s7376_s24 = smov (%p30_p1, %s28_s24), 0  ;;  %p271_p3 = pnand %p4677_p0, %p270_p2 }
   0x7   : > { %274 = sbr.rel (%p271_p3) target bundleno = 651 (0x28b), region = 44 }
   0xe   : > { %v5978_v0 = vld [vmem:[%s7321_s1 + $0x140] sm:$0xff]   ;;  %v5980_v2 = vld [vmem:[%s7321_s1 + $0x148] sm:$0xff]   ;;  %p322_p4 = scmp.lt.s32.totalorder %s6118_s21, 1  ;;  %v5982_v4 = vld [vmem:[%s7321_s1 + $0x150] sm:$0xff]   ;;  %v6128_v6 = vmov 0   ;;  %vm615_vm0 = vcmask 1040384  }
   0xf   : > { %v5979_v1 = vld [vmem:[%s7321_s1 + $0x40] sm:$0xff]   ;;  %5406 = vmatprep.subr.bf16.mxu0 %v5978_v0  ;;  %v5981_v3 = vld [vmem:[%s7321_s1 + $0x48] sm:$0xff]   ;;  %v5983_v5 = vld [vmem:[%s7321_s1 + $0x50] sm:$0xff]   ;;  %v4700_v7 = vcombine.low %v6128_v6, %v6128_v6  ;;  %v4701_v8 = vcombine.high %v6128_v6, %v6128_v6  ;;  %vm616_vm1 = vsmask.f32 256  ;;  %vm1954_vm5 = vcmask 1042432  }
  0x10   : > { %5166 = vmatprep.subr.bf16.mxu1 %v5979_v1  ;;  %5407 = vmatpush3.bf16.msra.mxu0 %v5978_v0  ;;  %s7378_s21 = smov (!%p322_p4, %s6118_s21), 1  ;;  %v5984_v9 = vld [vmem:[%s7321_s1 + $0x158] sm:$0xff]   ;;  %v5986_v11 = vld [vmem:[%s7321_s1 + $0x160] sm:$0xff]   ;;  %v5988_v13 = vld [vmem:[%s7321_s1 + $0x168] sm:$0xff]   ;;  %vm957_vm2 = vsmask.f32 3328 }
  0x11   : > { %5167 = vmatpush3.bf16.msra.mxu1 %v5979_v1  ;;  %5408 = vmatprep.subr.bf16.mxu0 %v5980_v2  ;;  %v5985_v10 = vld [vmem:[%s7321_s1 + $0x58] sm:$0xff]   ;;  %833 = vst [vmem:[#allocation2] sm:$0xf] %v4700_v7  ;;  %834 = vst [vmem:[#allocation2 + $0x4] sm:$0xf] %v4701_v8  ;;  %s4930_s17 = sshll.u32 %s7378_s21, 7 }
  0x12   : > { %5168 = vmatprep.subr.bf16.mxu1 %v5981_v3  ;;  %835 = vst [vmem:[#allocation2 + $0x8] sm:$0x1] %v4700_v7  ;;  %884 = vst [vmem:[#allocation2 + $0xcc] sm:$0xf] %v4700_v7  ;;  %v5987_v12 = vld [vmem:[%s7321_s1 + $0x60] sm:$0xff]   ;;  %s6220_s28 = scalar_lea.vmem %s7320_s0, %s4930_s17  ;;  %v5989_v14 = vld [vmem:[%s7321_s1 + $0x68] sm:$0xff]   ;;  %s7003_s19 = scalar_lea.vmem %s7323_s3, %s4930_s17 }
  0x13   : > { %885 = vst [vmem:[#allocation2 + $0xd0] sm:$0xf] %v4701_v8  ;;  %886 = vst [vmem:[#allocation2 + $0xd4] sm:$0x1] %v4700_v7  ;;  %v5994_v15 = vld [vmem:[%s6220_s28] sm:$0xff]   ;;  %v5990_v16 = vld [vmem:[%s7321_s1 + $0x170] sm:$0xff]  }
  0x14   : > { %5409 = vmatpush3.bf16.msra.mxu0 %v5980_v2  ;;  %v472_v17 = vshrl.u32 %v5994_v15, 16  ;;  %v475_v18 = vshll.u32 %v5994_v15, 16  ;;  %v5995_v19 = vld [vmem:[%s6220_s28 + $0x8] sm:$0xff]   ;;  %v5991_v23 = vld [vmem:[%s7321_s1 + $0x70] sm:$0xff]   ;;  %vm958_vm3 = vsmask.f32 7440  ;;  %vm6238_vm4 = vmand %vm615_vm0, %vm616_vm1 }
  0x15   : > { %5169 = vmatpush3.bf16.msra.mxu1 %v5981_v3  ;;  %5410 = vmatprep.subr.bf16.mxu0 %v5982_v4  ;;  %v479_v25 = vshrl.u32 %v5995_v19, 16  ;;  %v482_v26 = vshll.u32 %v5995_v19, 16  ;;  %v5992_v32 = vld [vmem:[%s7321_s1 + $0x178] sm:$0xff]   ;;  %v5998_v42 = vld [vmem:[%s6220_s28 + $0x10] sm:$0xff]   ;;  %vm1955_vm6 = vcmask 1046532   ;;  %vm6262_vm7 = vmor %vm957_vm2, %vm958_vm3  ;;  %vm4225_vm9 = vcmask 1041408  }
  0x16   : > { %5170 = vmatprep.subr.bf16.mxu1 %v5983_v5  ;;  %v474_v24 = vrot.slane %v472_v17, 7  ;;  %v5993_v37 = vld [vmem:[%s7321_s1 + $0x78] sm:$0xff]   ;;  %v486_v59 = vshrl.u32 %v5998_v42, 16  ;;  %v6269_v61 = vld [vmem:[%s7321_s1 + $0x180] sm:$0xff]   ;;  %v489_v62 = vshll.u32 %v5998_v42, 16  ;;  %vm6293_vm8 = vmor %vm1954_vm5, %vm1955_vm6  ;;  %vm4176_vm10 = vcmask 31744  }
  0x17   : > { %v481_v35 = vrot.slane %v479_v25, 7  ;;  %v6256_v47 = vld [vmem:[%s6220_s28 + $0x18] sm:$0xff]   ;;  %v6277_v1 = vld [vmem:[%s7321_s1] sm:$0xff]   ;;  %v6076_v53 = vld [vmem:[%s7321_s1 + $0x108] sm:$0xff]   ;;  %s4932_s9 = sshll.u32 %s7378_s21, 8 }
  0x18   : > { %5411 = vmatpush3.bf16.msra.mxu0 %v5982_v4  ;;  %v887_v20 = vld [vmem:[#allocation2] sm:$0xf]  ;;  %v888_v21 = vld [vmem:[#allocation2 + $0x4] sm:$0xf]  ;;  %v477_v33 = vor.u32 %v475_v18, %v474_v24  ;;  %v634_v34 = vsel %vm6238_vm4, %v474_v24, 0  ;;  %v493_v63 = vshrl.u32 %v6256_v47, 16  ;;  %s7218_s12 = scalar_lea.vmem %s7326_s6, %s4932_s9 }
  0x19   : > { %5171 = vmatpush3.bf16.msra.mxu1 %v5983_v5  ;;  %5412 = vmatprep.subr.bf16.mxu0 %v5984_v9  ;;  %v889_v22 = vld [vmem:[#allocation2 + $0x8] sm:$0x1]  ;;  %v961_v28 = vshrl.u32 %v887_v20, 16  ;;  %v964_v29 = vshll.u32 %v887_v20, 16  ;;  %v970_v30 = vshll.u32 %v888_v21, 16  ;;  %v974_v31 = vshrl.u32 %v888_v21, 16 }
  0x1a   : > { %5172 = vmatprep.subr.bf16.mxu1 %v5985_v10  ;;  %v980_v36 = vshll.u32 %v889_v22, 16  ;;  %v4704_v38 = vcombine.low %v634_v34, %v634_v34  ;;  %v618_v43 = vsel %vm6238_vm4, 0, %v477_v33  ;;  %v484_v44 = vor.u32 %v482_v26, %v481_v35  ;;  %v6282_v5 = vld [vmem:[%s6220_s28 + $0x20] sm:$0xff]  }
  0x1b   : > { %v963_v39 = vrot.slane %v961_v28, 4  ;;  %v966_v40 = vrot.slane %v964_v29, 5  ;;  %v972_v41 = vrot.slane %v970_v30, 5  ;;  %v635_v45 = vsel %vm6238_vm4, %v481_v35, 0 }
  0x1c   : > { %5413 = vmatpush3.bf16.msra.mxu0 %v5984_v9  ;;  %v976_v46 = vrot.slane %v974_v31, 4  ;;  %v4702_v48 = vcombine.low %v618_v43, %v618_v43  ;;  %v4703_v49 = vcombine.high %v618_v43, %v618_v43  ;;  %838 = vst [vmem:[#allocation2 + $0x14] sm:$0x1] %v4704_v38  ;;  %v4707_v50 = vcombine.low %v635_v45, %v635_v45 }
  0x1d   : > { %5173 = vmatpush3.bf16.msra.mxu1 %v5985_v10  ;;  %5414 = vmatprep.subr.bf16.mxu0 %v5986_v11  ;;  %v967_v51 = vor.u32 %v966_v40, %v963_v39  ;;  %v619_v52 = vsel %vm6238_vm4, 0, %v484_v44  ;;  %v982_v55 = vrot.slane %v980_v36, 5  ;;  %v488_v2 = vrot.slane %v486_v59, 7 }
  0x1e   : > { %5174 = vmatprep.subr.bf16.mxu1 %v5987_v12  ;;  %v977_v54 = vor.u32 %v976_v46, %v972_v41  ;;  %836 = vst [vmem:[#allocation2 + $0xc] sm:$0xf] %v4702_v48  ;;  %837 = vst [vmem:[#allocation2 + $0x10] sm:$0xf] %v4703_v49  ;;  %v4705_v56 = vcombine.low %v619_v52, %v619_v52  ;;  %v4706_v57 = vcombine.high %v619_v52, %v619_v52 }
  0x1f   : > { %841 = vst [vmem:[#allocation2 + $0x20] sm:$0x1] %v4707_v50  ;;  %v968_v58 = vrot.slane %v967_v51, 4  ;;  %v495_v4 = vrot.slane %v493_v63, 7  ;;  %v491_v7 = vor.u32 %v489_v62, %v488_v2  ;;  %v636_v8 = vsel %vm6238_vm4, %v488_v2, 0 }
  0x20   : > { %5415 = vmatpush3.bf16.msra.mxu0 %v5986_v11  ;;  %v978_v60 = vrot.slane %v977_v54, 4  ;;  %839 = vst [vmem:[#allocation2 + $0x18] sm:$0xf] %v4705_v56  ;;  %840 = vst [vmem:[#allocation2 + $0x1c] sm:$0xf] %v4706_v57  ;;  %v496_v9 = vshll.u32 %v6256_v47, 16  ;;  %v4710_v11 = vcombine.low %v636_v8, %v636_v8 }
  0x21   : > { %5175 = vmatpush3.bf16.msra.mxu1 %v5987_v12  ;;  %5416 = vmatprep.subr.bf16.mxu0 %v5988_v13  ;;  %v973_v0 = vsel %vm6262_vm7, %v968_v58, %v972_v41  ;;  %v637_v12 = vsel %vm6238_vm4, %v495_v4, 0  ;;  %v620_v17 = vsel %vm6238_vm4, 0, %v491_v7  ;;  %v6001_v56 = vld [vmem:[%s7321_s1 + $0x188] sm:$0xff]  }
  0x22   : > { %5176 = vmatprep.subr.bf16.mxu1 %v5989_v14  ;;  %v983_v3 = vsel %vm6262_vm7, %v978_v60, %v982_v55  ;;  %v4713_v18 = vcombine.low %v637_v12, %v637_v12  ;;  %v4708_v22 = vcombine.low %v620_v17, %v620_v17  ;;  %844 = vst [vmem:[#allocation2 + $0x2c] sm:$0x1] %v4710_v11 }
  0x23   : > { %v4750_v6 = vcombine.low %v973_v0, %v983_v3  ;;  %v892_v10 = vld [vmem:[#allocation2 + $0x14] sm:$0x1]  ;;  %v498_v33 = vor.u32 %v496_v9, %v495_v4 }
  0x24   : > { %5417 = vmatpush3.bf16.msra.mxu0 %v5988_v13  ;;  %v500_v13 = vshrl.u32 %v6282_v5, 16  ;;  %847 = vst [vmem:[#allocation2 + $0x38] sm:$0x1] %v4713_v18  ;;  %842 = vst [vmem:[#allocation2 + $0x24] sm:$0xf] %v4708_v22 }
  0x25   : > { %5177 = vmatpush3.bf16.msra.mxu1 %v5989_v14  ;;  %5418 = vmatprep.subr.bf16.mxu0 %v5990_v16  ;;  %v1004_v14 = vshll.u32 %v892_v10, 16  ;;  %v6300_v19 = vld [vmem:[#allocation2 + $0xc] sm:$0xf]  ;;  %v6302_v20 = vld [vmem:[#allocation2 + $0x10] sm:$0xf]  ;;  %v621_v49 = vsel %vm6238_vm4, 0, %v498_v33 }
  0x26   : > { %5178 = vmatprep.subr.bf16.mxu1 %v5991_v23  ;;  %5182 = vmatprep.mubr.bf16.mxu1 %v4750_v6  ;;  %v6304_v21 = vld [vmem:[#allocation2 + $0x20] sm:$0x1]  ;;  %v4799_v24 = vrot.slane %v6300_v19, 9  ;;  %v1966_v25 = vrot.slane %v6302_v20, 5  ;;  %v985_v28 = vshrl.u32 %v6300_v19, 16  ;;  %v988_v31 = vshll.u32 %v6300_v19, 16 }
  0x27   : > { %v1976_v26 = vrot.slane %v6304_v21, 5  ;;  %v893_v29 = vld [vmem:[#allocation2 + $0x18] sm:$0xf]  ;;  %v894_v30 = vld [vmem:[#allocation2 + $0x1c] sm:$0xf]  ;;  %v998_v41 = vshrl.u32 %v6302_v20, 16  ;;  %v4711_v52 = vcombine.low %v621_v49, %v621_v49  ;;  %v4712_v54 = vcombine.high %v621_v49, %v621_v49 }
  0x28   : > { %5419 = vmatpush3.bf16.msra.mxu0 %v5990_v16  ;;  %v1969_v16 = vrot.slane %v892_v10, 5  ;;  %v1967_v34 = vsel %vm6293_vm8, %v4799_v24, %v1966_v25  ;;  %v1968_v35 = vrot.slane %v1966_v25, 4  ;;  %v4800_v36 = vrot.slane %v893_v29, 9 }
  0x29   : > { %5179 = vmatpush3.bf16.msra.mxu1 %v5991_v23  ;;  %5420 = vmatprep.subr.bf16.mxu0 %v5992_v32  ;;  %v4709_v23 = vcombine.high %v620_v17, %v620_v17  ;;  %v987_v38 = vrot.slane %v985_v28, 4  ;;  %v990_v39 = vrot.slane %v988_v31, 5  ;;  %v1006_v45 = vrot.slane %v1004_v14, 5  ;;  %v6325_v51 = vld [vmem:[#allocation2 + $0x2c] sm:$0x1] }
  0x2a   : > { %5180 = vmatprep.subr.bf16.mxu1 %v5993_v37  ;;  %v1970_v42 = vsel %vm6293_vm8, %v1968_v35, %v1969_v16  ;;  %v1000_v48 = vrot.slane %v998_v41, 4  ;;  %v1009_v55 = vshrl.u32 %v893_v29, 16  ;;  %v1983_v60 = vrot.slane %v6325_v51, 5  ;;  %845 = vst [vmem:[#allocation2 + $0x30] sm:$0xf] %v4711_v52 }
  0x2b   : > { %843 = vst [vmem:[#allocation2 + $0x28] sm:$0xf] %v4709_v23  ;;  %v6319_v46 = vcombine.low %v1967_v34, %v1970_v42  ;;  %v991_v47 = vor.u32 %v990_v39, %v987_v38  ;;  %v6334_v62 = vld [vmem:[#allocation2 + $0x38] sm:$0x1]  ;;  %v896_v63 = vld [vmem:[#allocation2 + $0x24] sm:$0xf]  ;;  %v6337_v4 = vcombine.low %v893_v29, %v894_v30 }
  0x2c   : > { %5421 = vmatpush3.bf16.msra.mxu0 %v5992_v32  ;;  %v994_v32 = vshll.u32 %v6302_v20, 16  ;;  %846 = vst [vmem:[#allocation2 + $0x34] sm:$0xf] %v4712_v54  ;;  %v1990_v2 = vrot.slane %v6334_v62, 5  ;;  %v1011_v3 = vrot.slane %v1009_v55, 4  ;;  %v4801_v8 = vrot.slane %v896_v63, 9 }
  0x2d   : > { %5181 = vmatpush3.bf16.msra.mxu1 %v5993_v37  ;;  %5454 = vmatprep.subr.bf16.mxu0 %v6269_v61  ;;  %v1973_v37 = vrot.slane %v894_v30, 5  ;;  %v992_v58 = vrot.slane %v991_v47, 4  ;;  %v1012_v10 = vshll.u32 %v893_v29, 16  ;;  %v1018_v11 = vshll.u32 %v894_v30, 16  ;;  %v6005_v23 = vld [vmem:[%s7321_s1 + $0x190] sm:$0xff]   ;;  %v6009_v38 = vld [vmem:[%s7321_s1 + $0x198] sm:$0xff]  }
  0x2e   : > { %5214 = vmatprep.subr.bf16.mxu1 %v6277_v1  ;;  %v996_v40 = vrot.slane %v994_v32, 5  ;;  %5422 = vmatprep.mubr.bf16.mxu0 %v6319_v46  ;;  %v1022_v12 = vshrl.u32 %v894_v30, 16  ;;  %v1028_v14 = vshll.u32 %v6304_v21, 16  ;;  %v1033_v22 = vshrl.u32 %v896_v63, 16  ;;  %v6000_v21 = vld [vmem:[%s7321_s1 + $0x8] sm:$0xff]  }
  0x2f   : > { %v1974_v43 = vsel %vm6293_vm8, %v4800_v36, %v1973_v37  ;;  %v1975_v44 = vrot.slane %v1973_v37, 4  ;;  %v1014_v24 = vrot.slane %v1012_v10, 5  ;;  %v1020_v25 = vrot.slane %v1018_v11, 5  ;;  %v6003_v36 = vld [vmem:[%s6220_s28 + $0x28] sm:$0xff]   ;;  %v6004_v37 = vld [vmem:[%s7321_s1 + $0x10] sm:$0xff]  }
  0x30   : > { %v1001_v59 = vor.u32 %v1000_v48, %v996_v40  ;;  %v997_v6 = vsel %vm6262_vm7, %v992_v58, %v996_v40  ;;  %v1030_v29 = vrot.slane %v1028_v14, 5  ;;  %v1035_v30 = vrot.slane %v1033_v22, 4  ;;  %v6008_v58 = vld [vmem:[%s7321_s1 + $0x18] sm:$0xff]   ;;  %v6017_v22 = vld [vmem:[%s7321_s1 + $0x1a8] sm:$0xff]  }
  0x31   : > { %v1977_v50 = vsel %vm6293_vm8, %v1975_v44, %v1976_v26  ;;  %v1024_v26 = vrot.slane %v1022_v12, 4  ;;  %v1036_v31 = vshll.u32 %v896_v63, 16  ;;  %v1015_v33 = vor.u32 %v1014_v24, %v1011_v3  ;;  %v6369_v39 = vld [vmem:[#allocation2 + $0x30] sm:$0xf] }
  0x32   : > { %v6331_v57 = vcombine.low %v1974_v43, %v1977_v50  ;;  %v897_v0 = vld [vmem:[#allocation2 + $0x28] sm:$0xf]  ;;  %v1002_v7 = vrot.slane %v1001_v59, 4  ;;  %v6377_v44 = vcombine.low %v6300_v19, %v6302_v20  ;;  %v1052_v54 = vshll.u32 %v6325_v51, 16  ;;  %v6006_v12 = vld [vmem:[%s6220_s28 + $0x30] sm:$0xff]  }
  0x33   : > { %v1980_v9 = vrot.slane %v897_v0, 5  ;;  %v1025_v34 = vor.u32 %v1024_v26, %v1020_v25  ;;  %v1042_v35 = vshll.u32 %v897_v0, 16  ;;  %v6371_v40 = vld [vmem:[#allocation2 + $0x34] sm:$0xf]  ;;  %v1038_v41 = vrot.slane %v1036_v31, 5 }
  0x34   : > { %5423 = vmatmul.mubr.bf16.vlgmr.msra.gmra.mrb[0].mxu0 %v6331_v57  ;;  %v1007_v16 = vsel %vm6262_vm7, %v1002_v7, %v1006_v45  ;;  %v1046_v42 = vshrl.u32 %v897_v0, 16  ;;  %v6373_v43 = vcombine.low %v896_v63, %v897_v0  ;;  %v4802_v45 = vrot.slane %v6369_v39, 9 }
  0x35   : > { %5455 = vmatpush3.bf16.msra.mxu0 %v6269_v61  ;;  %v1981_v17 = vsel %vm6293_vm8, %v4801_v8, %v1980_v9  ;;  %v1982_v18 = vrot.slane %v1980_v9, 4  ;;  %v6351_v61 = vcombine.low %v997_v6, %v1007_v16  ;;  %v1987_v47 = vrot.slane %v6371_v40, 5  ;;  %v6013_v8 = vld [vmem:[%s7321_s1 + $0x1a0] sm:$0xff]  }
  0x36   : > { %5456 = vmatprep.subr.bf16.mxu0 %v6001_v56  ;;  %v1026_v48 = vrot.slane %v1025_v34, 4  ;;  %v1039_v49 = vor.u32 %v1038_v41, %v1035_v30  ;;  %v1044_v50 = vrot.slane %v1042_v35, 5  ;;  %v1048_v52 = vrot.slane %v1046_v42, 4 }
  0x37   : > { %7352 = vst [vmem:[#allocation3_spill] sm:$0xff] %v6351_v61  ;;  %v1984_v28 = vsel %vm6293_vm8, %v1982_v18, %v1983_v60  ;;  %5183 = vmatmul.mubr.bf16.vlgmr.msra.gmra.mrb[0].mxu1 %v6351_v61  ;;  %v1988_v55 = vsel %vm6293_vm8, %v4802_v45, %v1987_v47  ;;  %v1054_v63 = vrot.slane %v1052_v54, 5  ;;  %v502_v3 = vrot.slane %v500_v13, 7  ;;  %v6012_v18 = vld [vmem:[%s7321_s1 + $0x20] sm:$0xff]   ;;  %v6441_v45 = vld [vmem:[%s6220_s28 + $0x48] sm:$0xff]  }
  0x38   : > { %v6359_v32 = vcombine.low %v1981_v17, %v1984_v28  ;;  %5215 = vmatpush3.bf16.msra.mxu1 %v6277_v1  ;;  %v1016_v1 = vrot.slane %v1015_v33, 4  ;;  %v1031_v20 = vsel %vm6262_vm7, %v1026_v48, %v1030_v29  ;;  %v1040_v60 = vrot.slane %v1039_v49, 4  ;;  %v6414_v17 = vld [vmem:[%s6220_s28 + $0x38] sm:$0xff]  }
  0x39   : > { %5457 = vmatpush3.bf16.msra.mxu0 %v6001_v56  ;;  %5216 = vmatprep.subr.bf16.mxu1 %v6000_v21  ;;  %v1989_v56 = vrot.slane %v1987_v47, 4  ;;  %v1049_v51 = vor.u32 %v1048_v52, %v1044_v50  ;;  %v503_v6 = vshll.u32 %v6282_v5, 16  ;;  %v507_v7 = vshrl.u32 %v6003_v36, 16  ;;  %v6021_v47 = vld [vmem:[%s7321_s1 + $0x1b0] sm:$0xff]  }
  0x3a   : > { %5458 = vmatprep.subr.bf16.mxu0 %v6005_v23  ;;  %5426 = vmatprep.mubr.bf16.mxu0 %v6359_v32  ;;  %v1021_v19 = vsel %vm6262_vm7, %v1016_v1, %v1020_v25  ;;  %v1045_v10 = vsel %vm6262_vm7, %v1040_v60, %v1044_v50  ;;  %v510_v11 = vshll.u32 %v6003_v36, 16  ;;  %v638_v5 = vsel %vm6238_vm4, %v502_v3, 0  ;;  %v6434_v36 = vld [vmem:[%s6220_s28 + $0x40] sm:$0xff]  }
  0x3b   : > { %v6392_v59 = vcombine.low %v1021_v19, %v1031_v20  ;;  %v1991_v0 = vsel %vm6293_vm8, %v1989_v56, %v1990_v2  ;;  %v1050_v2 = vrot.slane %v1049_v51, 4  ;;  %v505_v14 = vor.u32 %v503_v6, %v502_v3  ;;  %v6016_v19 = vld [vmem:[%s7321_s1 + $0x28] sm:$0xff]  }
  0x3c   : > { %5217 = vmatpush3.bf16.msra.mxu1 %v6000_v21  ;;  %v6404_v9 = vcombine.low %v1988_v55, %v1991_v0  ;;  %v509_v13 = vrot.slane %v507_v7, 7  ;;  %v1057_v16 = vshrl.u32 %v6369_v39, 16  ;;  %v4716_v24 = vcombine.low %v638_v5, %v638_v5 }
  0x3d   : > { %5459 = vmatpush3.bf16.msra.mxu0 %v6005_v23  ;;  %5218 = vmatprep.subr.bf16.mxu1 %v6004_v37  ;;  %v1055_v23 = vsel %vm6262_vm7, %v1050_v2, %v1054_v63  ;;  %v1060_v25 = vshll.u32 %v6369_v39, 16  ;;  %v1066_v26 = vshll.u32 %v6371_v40, 16  ;;  %v622_v28 = vsel %vm6238_vm4, 0, %v505_v14  ;;  %v6020_v2 = vld [vmem:[%s7321_s1 + $0x30] sm:$0xff]  }
  0x3e   : > { %5460 = vmatprep.subr.bf16.mxu0 %v6009_v38  ;;  %5186 = vmatprep.mubr.bf16.mxu1 %v6392_v59  ;;  %v6427_v21 = vcombine.low %v1045_v10, %v1055_v23  ;;  %v512_v29 = vor.u32 %v510_v11, %v509_v13  ;;  %v639_v30 = vsel %vm6238_vm4, %v509_v13, 0  ;;  %v4714_v31 = vcombine.low %v622_v28, %v622_v28  ;;  %v7372_v15 = vld [vmem:[#allocation3_spill] sm:$0xff] }
  0x3f   : > { %5427 = vmatmul.mubr.bf16.gmra.mrb[4].mxu0 %v6404_v9  ;;  %v4715_v33 = vcombine.high %v622_v28, %v622_v28  ;;  %850 = vst [vmem:[#allocation2 + $0x44] sm:$0x1] %v4716_v24  ;;  %v4719_v34 = vcombine.low %v639_v30, %v639_v30  ;;  %v1059_v35 = vrot.slane %v1057_v16, 4  ;;  %v1068_v41 = vrot.slane %v1066_v26, 5  ;;  %v6025_v16 = vld [vmem:[%s7321_s1 + $0x1b8] sm:$0xff]  }
  0x40   : > { %5219 = vmatpush3.bf16.msra.mxu1 %v6004_v37  ;;  %v623_v37 = vsel %vm6238_vm4, 0, %v512_v29  ;;  %v1070_v42 = vshrl.u32 %v6371_v40, 16  ;;  %848 = vst [vmem:[#allocation2 + $0x3c] sm:$0xf] %v4714_v31  ;;  %v1076_v49 = vshll.u32 %v6334_v62, 16  ;;  %v514_v50 = vshrl.u32 %v6006_v12, 16 }
  0x41   : > { %5461 = vmatpush3.bf16.msra.mxu0 %v6009_v38  ;;  %5220 = vmatprep.subr.bf16.mxu1 %v6008_v58  ;;  %v1062_v38 = vrot.slane %v1060_v25, 5  ;;  %849 = vst [vmem:[#allocation2 + $0x40] sm:$0xf] %v4715_v33  ;;  %v4717_v1 = vcombine.low %v623_v37, %v623_v37  ;;  %v4718_v48 = vcombine.high %v623_v37, %v623_v37  ;;  %853 = vst [vmem:[#allocation2 + $0x50] sm:$0x1] %v4719_v34  ;;  %v6024_v37 = vld [vmem:[%s7321_s1 + $0x38] sm:$0xff]  }
  0x42   : > { %5462 = vmatprep.subr.bf16.mxu0 %v6013_v8  ;;  %5187 = vmatmul.mubr.bf16.gmra.mrb[4].mxu1 %v6427_v21  ;;  %v1072_v54 = vrot.slane %v1070_v42, 4  ;;  %v517_v55 = vshll.u32 %v6006_v12, 16  ;;  %v521_v56 = vshrl.u32 %v6414_v17, 16  ;;  %v1078_v20 = vrot.slane %v1076_v49, 5 }
  0x43   : > { %v1063_v52 = vor.u32 %v1062_v38, %v1059_v35  ;;  %851 = vst [vmem:[#allocation2 + $0x48] sm:$0xf] %v4717_v1  ;;  %852 = vst [vmem:[#allocation2 + $0x4c] sm:$0xf] %v4718_v48  ;;  %v516_v60 = vrot.slane %v514_v50, 7  ;;  %v524_v51 = vshll.u32 %v6414_v17, 16  ;;  %v6496_v48 = vcombine.low %v6369_v39, %v6371_v40 }
  0x44   : > { %5221 = vmatpush3.bf16.msra.mxu1 %v6008_v58  ;;  %v528_v62 = vshrl.u32 %v6434_v36, 16  ;;  %v1073_v63 = vor.u32 %v1072_v54, %v1068_v41  ;;  %v523_v0 = vrot.slane %v521_v56, 7  ;;  %v531_v3 = vshll.u32 %v6434_v36, 16  ;;  %v6029_v40 = vld [vmem:[%s7321_s1 + $0x80] sm:$0xff]  }
  0x45   : > { %5463 = vmatpush3.bf16.msra.mxu0 %v6013_v8  ;;  %5222 = vmatprep.subr.bf16.mxu1 %v6012_v18  ;;  %v1064_v58 = vrot.slane %v1063_v52, 4  ;;  %v519_v6 = vor.u32 %v517_v55, %v516_v60  ;;  %v640_v7 = vsel %vm6238_vm4, %v516_v60, 0  ;;  %v535_v10 = vshrl.u32 %v6441_v45, 16  ;;  %v6030_v55 = vld [vmem:[%s7321_s1 + $0x1c0] sm:$0xff]  }
  0x46   : > { %5464 = vmatprep.subr.bf16.mxu0 %v6017_v22  ;;  %v6456_v8 = vrot.slane %v528_v62, 7  ;;  %v904_v11 = vld [vmem:[#allocation2 + $0x44] sm:$0x1]  ;;  %v1074_v14 = vrot.slane %v1073_v63, 4  ;;  %v4722_v5 = vcombine.low %v640_v7, %v640_v7  ;;  %v526_v13 = vor.u32 %v524_v51, %v523_v0 }
  0x47   : > { %v1069_v12 = vsel %vm6262_vm7, %v1064_v58, %v1068_v41  ;;  %v1997_v17 = vrot.slane %v904_v11, 5  ;;  %v641_v23 = vsel %vm6238_vm4, %v523_v0, 0  ;;  %v6471_v24 = vld [vmem:[#allocation2 + $0x3c] sm:$0xf] }
  0x48   : > { %5223 = vmatpush3.bf16.msra.mxu1 %v6012_v18  ;;  %v624_v18 = vsel %vm6238_vm4, 0, %v519_v6  ;;  %v6473_v25 = vld [vmem:[#allocation2 + $0x40] sm:$0xf]  ;;  %v6475_v26 = vld [vmem:[#allocation2 + $0x50] sm:$0x1]  ;;  %v1079_v28 = vsel %vm6262_vm7, %v1074_v14, %v1078_v20  ;;  %v4725_v31 = vcombine.low %v641_v23, %v641_v23  ;;  %v4803_v33 = vrot.slane %v6471_v24, 9 }
  0x49   : > { %5465 = vmatpush3.bf16.msra.mxu0 %v6017_v22  ;;  %5224 = vmatprep.subr.bf16.mxu1 %v6016_v19  ;;  %v1100_v22 = vshll.u32 %v904_v11, 16  ;;  %v4720_v29 = vcombine.low %v624_v18, %v624_v18  ;;  %v4721_v30 = vcombine.high %v624_v18, %v624_v18  ;;  %856 = vst [vmem:[#allocation2 + $0x5c] sm:$0x1] %v4722_v5  ;;  %v1994_v34 = vrot.slane %v6473_v25, 5 }
  0x4a   : > { %5466 = vmatprep.subr.bf16.mxu0 %v6021_v47  ;;  %v2004_v35 = vrot.slane %v6475_v26, 5  ;;  %v6482_v36 = vcombine.low %v1069_v12, %v1079_v28  ;;  %v905_v38 = vld [vmem:[#allocation2 + $0x48] sm:$0xf]  ;;  %v6487_v41 = vld [vmem:[#allocation2 + $0x4c] sm:$0xf]  ;;  %v1081_v42 = vshrl.u32 %v6471_v24, 16  ;;  %v6492_v1 = vor.u32 %v531_v3, %v6456_v8 }
  0x4b   : > { %854 = vst [vmem:[#allocation2 + $0x54] sm:$0xf] %v4720_v29  ;;  %855 = vst [vmem:[#allocation2 + $0x58] sm:$0xf] %v4721_v30  ;;  %v1995_v49 = vsel %vm6293_vm8, %v4803_v33, %v1994_v34  ;;  %v1996_v50 = vrot.slane %v1994_v34, 4  ;;  %v4804_v52 = vrot.slane %v905_v38, 9 }
  0x4c   : > { %5225 = vmatpush3.bf16.msra.mxu1 %v6016_v19  ;;  %859 = vst [vmem:[#allocation2 + $0x68] sm:$0x1] %v4725_v31  ;;  %v2001_v54 = vrot.slane %v6487_v41, 5  ;;  %5190 = vmatprep.mubr.bf16.mxu1 %v6482_v36  ;;  %v1083_v56 = vrot.slane %v1081_v42, 4  ;;  %v1090_v20 = vshll.u32 %v6473_v25, 16  ;;  %v1094_v39 = vshrl.u32 %v6473_v25, 16 }
  0x4d   : > { %5467 = vmatpush3.bf16.msra.mxu0 %v6021_v47  ;;  %v1084_v47 = vshll.u32 %v6471_v24, 16  ;;  %5226 = vmatprep.subr.bf16.mxu1 %v6020_v2  ;;  %v1998_v60 = vsel %vm6293_vm8, %v1996_v50, %v1997_v17  ;;  %v1102_v58 = vrot.slane %v1100_v22, 5  ;;  %v625_v12 = vsel %vm6238_vm4, 0, %v526_v13 }
  0x4e   : > { %5468 = vmatprep.subr.bf16.mxu0 %v6025_v16  ;;  %v2002_v51 = vsel %vm6293_vm8, %v4804_v52, %v2001_v54  ;;  %v2003_v62 = vrot.slane %v2001_v54, 4  ;;  %v6514_v63 = vcombine.low %v1995_v49, %v1998_v60  ;;  %v1092_v3 = vrot.slane %v1090_v20, 5 }
  0x4f   : > { %v1086_v19 = vrot.slane %v1084_v47, 5  ;;  %v1096_v6 = vrot.slane %v1094_v39, 4  ;;  %v1105_v14 = vshrl.u32 %v905_v38, 16  ;;  %v1108_v5 = vshll.u32 %v905_v38, 16 }
  0x50   : > { %5227 = vmatpush3.bf16.msra.mxu1 %v6020_v2  ;;  %v2005_v7 = vsel %vm6293_vm8, %v2003_v62, %v2004_v35  ;;  %v6518_v11 = vld [vmem:[#allocation2 + $0x5c] sm:$0x1]  ;;  %5430 = vmatprep.mubr.bf16.mxu0 %v6514_v63  ;;  %v4723_v28 = vcombine.low %v625_v12, %v625_v12  ;;  %v4724_v29 = vcombine.high %v625_v12, %v625_v12  ;;  %v1118_v52 = vshrl.u32 %v6487_v41, 16 }
  0x51   : > { %5469 = vmatpush3.bf16.msra.mxu0 %v6025_v16  ;;  %v1087_v0 = vor.u32 %v1086_v19, %v1083_v56  ;;  %5228 = vmatprep.subr.bf16.mxu1 %v6024_v37  ;;  %v6523_v2 = vcombine.low %v2002_v51, %v2005_v7  ;;  %v1097_v17 = vor.u32 %v1096_v6, %v1092_v3  ;;  %v2011_v22 = vrot.slane %v6518_v11, 5 }
  0x52   : > { %5502 = vmatprep.subr.bf16.mxu0 %v6030_v55  ;;  %v6526_v18 = vld [vmem:[#allocation2 + $0x54] sm:$0xf]  ;;  %v6528_v23 = vld [vmem:[#allocation2 + $0x58] sm:$0xf]  ;;  %v6534_v13 = vcombine.low %v6471_v24, %v6473_v25  ;;  %v6537_v31 = vcombine.low %v905_v38, %v6487_v41  ;;  %857 = vst [vmem:[#allocation2 + $0x60] sm:$0xf] %v4723_v28 }
  0x53   : > { %7353 = vst [vmem:[#allocation4_spill] sm:$0xff] %v6523_v2  ;;  %v1088_v16 = vrot.slane %v1087_v0, 4  ;;  %v6530_v30 = vld [vmem:[#allocation2 + $0x68] sm:$0x1]  ;;  %5431 = vmatmul.mubr.bf16.gmra.mrb[8].mxu0 %v6523_v2  ;;  %v1098_v34 = vrot.slane %v1097_v17, 4  ;;  %v4805_v35 = vrot.slane %v6526_v18, 9 }
  0x54   : > { %5229 = vmatpush3.bf16.msra.mxu1 %v6024_v37  ;;  %v2008_v42 = vrot.slane %v6528_v23, 5  ;;  %858 = vst [vmem:[#allocation2 + $0x64] sm:$0xf] %v4724_v29  ;;  %v2018_v37 = vrot.slane %v6530_v30, 5  ;;  %v1107_v24 = vrot.slane %v1105_v14, 4  ;;  %v1110_v25 = vrot.slane %v1108_v5, 5 }
  0x55   : > { %v1093_v33 = vsel %vm6262_vm7, %v1088_v16, %v1092_v3  ;;  %5262 = vmatprep.subr.bf16.mxu1 %v6029_v40  ;;  %v1114_v38 = vshll.u32 %v6487_v41, 16  ;;  %v1103_v47 = vsel %vm6262_vm7, %v1098_v34, %v1102_v58  ;;  %v1124_v19 = vshll.u32 %v6475_v26, 16 }
  0x56   : > { %v2009_v49 = vsel %vm6293_vm8, %v4805_v35, %v2008_v42  ;;  %v2010_v50 = vrot.slane %v2008_v42, 4  ;;  %v6551_v54 = vcombine.low %v1093_v33, %v1103_v47  ;;  %v1111_v55 = vor.u32 %v1110_v25, %v1107_v24 }
  0x57   : > { %v1116_v56 = vrot.slane %v1114_v38, 5  ;;  %v1120_v39 = vrot.slane %v1118_v52, 4  ;;  %v1129_v40 = vshrl.u32 %v6526_v18, 16  ;;  %v1132_v60 = vshll.u32 %v6526_v18, 16 }
  0x58   : > { %v2012_v20 = vsel %vm6293_vm8, %v2010_v50, %v2011_v22  ;;  %5191 = vmatmul.mubr.bf16.gmra.mrb[8].mxu1 %v6551_v54  ;;  %v1112_v62 = vrot.slane %v1111_v55, 4  ;;  %v1126_v41 = vrot.slane %v1124_v19, 5  ;;  %v1138_v58 = vshll.u32 %v6528_v23, 16 }
  0x59   : > { %v6559_v51 = vcombine.low %v2009_v49, %v2012_v20  ;;  %v1121_v0 = vor.u32 %v1120_v39, %v1116_v56  ;;  %v1131_v3 = vrot.slane %v1129_v40, 4  ;;  %v1134_v6 = vrot.slane %v1132_v60, 5  ;;  %v6570_v16 = vld [vmem:[#allocation2 + $0x60] sm:$0xf] }
  0x5a   : > { %v1142_v26 = vshrl.u32 %v6528_v23, 16  ;;  %v1117_v7 = vsel %vm6262_vm7, %v1112_v62, %v1116_v56  ;;  %v1140_v12 = vrot.slane %v1138_v58, 5  ;;  %v1148_v14 = vshll.u32 %v6518_v11, 16  ;;  %v6014_v62 = vld [vmem:[%s6220_s28 + $0x50] sm:$0xff]  }
  0x5b   : > { %7354 = vst [vmem:[#allocation5_spill] sm:$0xff] %v6559_v51  ;;  %5434 = vmatprep.mubr.bf16.mxu0 %v6559_v51  ;;  %v626_v5 = vsel %vm6238_vm4, 0, %v6492_v1  ;;  %v6572_v17 = vld [vmem:[#allocation2 + $0x64] sm:$0xf]  ;;  %v1122_v22 = vrot.slane %v1121_v0, 4  ;;  %v1135_v28 = vor.u32 %v1134_v6, %v1131_v3  ;;  %v4806_v34 = vrot.slane %v6570_v16, 9 }
  0x5c   : > { %v1144_v29 = vrot.slane %v1142_v26, 4  ;;  %v4726_v33 = vcombine.low %v626_v5, %v626_v5  ;;  %v2015_v35 = vrot.slane %v6572_v17, 5  ;;  %v1150_v42 = vrot.slane %v1148_v14, 5 }
  0x5d   : > { %v642_v11 = vsel %vm6238_vm4, %v6456_v8, 0  ;;  %v1127_v1 = vsel %vm6262_vm7, %v1122_v22, %v1126_v41  ;;  %v1136_v24 = vrot.slane %v1135_v28, 4  ;;  %v4727_v38 = vcombine.high %v626_v5, %v626_v5 }
  0x5e   : > { %v1145_v25 = vor.u32 %v1144_v29, %v1140_v12  ;;  %860 = vst [vmem:[#allocation2 + $0x6c] sm:$0xf] %v4726_v33  ;;  %v2016_v47 = vsel %vm6293_vm8, %v4806_v34, %v2015_v35  ;;  %v2017_v49 = vrot.slane %v2015_v35, 4  ;;  %v6583_v50 = vcombine.low %v1117_v7, %v1127_v1 }
  0x5f   : > { %v4728_v52 = vcombine.low %v642_v11, %v642_v11  ;;  %v1141_v55 = vsel %vm6262_vm7, %v1136_v24, %v1140_v12  ;;  %861 = vst [vmem:[#allocation2 + $0x70] sm:$0xf] %v4727_v38  ;;  %v537_v8 = vrot.slane %v535_v10, 7  ;;  %v538_v19 = vshll.u32 %v6441_v45, 16 }
  0x60   : > { %v1146_v56 = vrot.slane %v1145_v25, 4  ;;  %v2019_v20 = vsel %vm6293_vm8, %v2017_v49, %v2018_v37  ;;  %5194 = vmatprep.mubr.bf16.mxu1 %v6583_v50  ;;  %v1153_v39 = vshrl.u32 %v6570_v16, 16  ;;  %v1156_v40 = vshll.u32 %v6570_v16, 16 }
  0x61   : > { %862 = vst [vmem:[#allocation2 + $0x74] sm:$0x1] %v4728_v52  ;;  %v1162_v60 = vshll.u32 %v6572_v17, 16  ;;  %v6597_v41 = vcombine.low %v2016_v47, %v2019_v20  ;;  %v540_v58 = vor.u32 %v538_v19, %v537_v8  ;;  %v643_v45 = vsel %vm6238_vm4, %v537_v8, 0  ;;  %v6015_v8 = vld [vmem:[%s6220_s28 + $0x58] sm:$0xff]  }
  0x62   : > { %v1151_v10 = vsel %vm6262_vm7, %v1146_v56, %v1150_v42  ;;  %v4731_v0 = vcombine.low %v643_v45, %v643_v45  ;;  %v1155_v3 = vrot.slane %v1153_v39, 4  ;;  %v1158_v6 = vrot.slane %v1156_v40, 5 }
  0x63   : > { %7355 = vst [vmem:[#allocation6_spill] sm:$0xff] %v6597_v41  ;;  %v6603_v37 = vcombine.low %v1141_v55, %v1151_v10  ;;  %5435 = vmatmul.mubr.bf16.gmra.mrb[12].mxu0 %v6597_v41  ;;  %v627_v26 = vsel %vm6238_vm4, 0, %v540_v58  ;;  %v1164_v7 = vrot.slane %v1162_v60, 5  ;;  %v1166_v12 = vshrl.u32 %v6572_v17, 16 }
  0x64   : > { %v1172_v14 = vshll.u32 %v6530_v30, 16  ;;  %v4729_v22 = vcombine.low %v627_v26, %v627_v26  ;;  %v4730_v28 = vcombine.high %v627_v26, %v627_v26  ;;  %865 = vst [vmem:[#allocation2 + $0x80] sm:$0x1] %v4731_v0  ;;  %v1159_v29 = vor.u32 %v1158_v6, %v1155_v3 }
  0x65   : > { %5195 = vmatmul.mubr.bf16.gmra.mrb[12].mxu1 %v6603_v37  ;;  %v6611_v5 = vld [vmem:[#allocation2 + $0x6c] sm:$0xf]  ;;  %v542_v33 = vshrl.u32 %v6014_v62, 16  ;;  %v1168_v35 = vrot.slane %v1166_v12, 4  ;;  %v545_v38 = vshll.u32 %v6014_v62, 16 }
  0x66   : > { %v4807_v34 = vrot.slane %v6611_v5, 9  ;;  %v1174_v42 = vrot.slane %v1172_v14, 5  ;;  %v1177_v11 = vshrl.u32 %v6611_v5, 16  ;;  %v6615_v1 = vld [vmem:[#allocation2 + $0x70] sm:$0xf]  ;;  %v1160_v30 = vrot.slane %v1159_v29, 4 }
  0x67   : > { %863 = vst [vmem:[#allocation2 + $0x78] sm:$0xf] %v4729_v22  ;;  %864 = vst [vmem:[#allocation2 + $0x7c] sm:$0xf] %v4730_v28  ;;  %v1180_v24 = vshll.u32 %v6611_v5, 16  ;;  %v544_v25 = vrot.slane %v542_v33, 7  ;;  %v1169_v52 = vor.u32 %v1168_v35, %v1164_v7 }
  0x68   : > { %v916_v47 = vld [vmem:[#allocation2 + $0x74] sm:$0x1]  ;;  %v2022_v49 = vrot.slane %v6615_v1, 5  ;;  %v1179_v55 = vrot.slane %v1177_v11, 4  ;;  %v1186_v56 = vshll.u32 %v6615_v1, 16  ;;  %v1165_v20 = vsel %vm6262_vm7, %v1160_v30, %v1164_v7 }
  0x69   : > { %v2025_v19 = vrot.slane %v916_v47, 5  ;;  %v1182_v39 = vrot.slane %v1180_v24, 5  ;;  %v1190_v40 = vshrl.u32 %v6615_v1, 16  ;;  %v1170_v62 = vrot.slane %v1169_v52, 4 }
  0x6a   : > { %v2023_v60 = vsel %vm6293_vm8, %v4807_v34, %v2022_v49  ;;  %v2024_v10 = vrot.slane %v2022_v49, 4  ;;  %v1188_v58 = vrot.slane %v1186_v56, 5  ;;  %v1196_v3 = vshll.u32 %v916_v47, 16 }
  0x6b   : > { %v1183_v45 = vor.u32 %v1182_v39, %v1179_v55  ;;  %v1192_v0 = vrot.slane %v1190_v40, 4  ;;  %v547_v6 = vor.u32 %v545_v38, %v544_v25  ;;  %v919_v12 = vld [vmem:[#allocation2 + $0x80] sm:$0x1]  ;;  %v1175_v7 = vsel %vm6262_vm7, %v1170_v62, %v1174_v42 }
  0x6c   : > { %v2026_v26 = vsel %vm6293_vm8, %v2024_v10, %v2025_v19  ;;  %v644_v14 = vsel %vm6238_vm4, %v544_v25, 0  ;;  %v549_v22 = vshrl.u32 %v6015_v8, 16  ;;  %v2032_v29 = vrot.slane %v919_v12, 5  ;;  %v6649_v39 = vld [vmem:[%s6220_s28 + $0x60] sm:$0xff]  }
  0x6d   : > { %v6632_v28 = vcombine.low %v2023_v60, %v2026_v26  ;;  %v6634_v33 = vcombine.low %v1165_v20, %v1175_v7  ;;  %v1184_v34 = vrot.slane %v1183_v45, 4  ;;  %v1193_v30 = vor.u32 %v1192_v0, %v1188_v58  ;;  %v6656_v45 = vld [vmem:[%s6220_s28 + $0x68] sm:$0xff]  }
  0x6e   : > { %v6636_v35 = vld [vmem:[#allocation2 + $0x78] sm:$0xf]  ;;  %v6638_v11 = vld [vmem:[#allocation2 + $0x7c] sm:$0xf]  ;;  %v1198_v24 = vrot.slane %v1196_v3, 5  ;;  %v628_v42 = vsel %vm6238_vm4, 0, %v547_v6  ;;  %v4734_v38 = vcombine.low %v644_v14, %v644_v14 }
  0x6f   : > { %7356 = vst [vmem:[#allocation7_spill] sm:$0xff] %v6632_v28  ;;  %5438 = vmatprep.mubr.bf16.mxu0 %v6632_v28  ;;  %v4808_v25 = vrot.slane %v6636_v35, 9  ;;  %v2029_v47 = vrot.slane %v6638_v11, 5  ;;  %5198 = vmatprep.mubr.bf16.mxu1 %v6634_v33  ;;  %v1189_v49 = vsel %vm6262_vm7, %v1184_v34, %v1188_v58  ;;  %v4732_v52 = vcombine.low %v628_v42, %v628_v42 }
  0x70   : > { %v1194_v55 = vrot.slane %v1193_v30, 4  ;;  %v4733_v56 = vcombine.high %v628_v42, %v628_v42  ;;  %868 = vst [vmem:[#allocation2 + $0x8c] sm:$0x1] %v4734_v38  ;;  %v551_v19 = vrot.slane %v549_v22, 7  ;;  %v552_v20 = vshll.u32 %v6015_v8, 16  ;;  %v6668_v22 = vld [vmem:[%s6220_s28 + $0x70] sm:$0xff]  }
  0x71   : > { %v2030_v40 = vsel %vm6293_vm8, %v4808_v25, %v2029_v47  ;;  %v2031_v60 = vrot.slane %v2029_v47, 4  ;;  %866 = vst [vmem:[#allocation2 + $0x84] sm:$0xf] %v4732_v52  ;;  %v1201_v10 = vshrl.u32 %v6636_v35, 16  ;;  %v1204_v62 = vshll.u32 %v6636_v35, 16 }
  0x72   : > { %v1199_v58 = vsel %vm6262_vm7, %v1194_v55, %v1198_v24  ;;  %867 = vst [vmem:[#allocation2 + $0x88] sm:$0xf] %v4733_v56  ;;  %v554_v0 = vor.u32 %v552_v20, %v551_v19  ;;  %v645_v8 = vsel %vm6238_vm4, %v551_v19, 0  ;;  %v1210_v3 = vshll.u32 %v6638_v11, 16 }
  0x73   : > { %v2033_v6 = vsel %vm6293_vm8, %v2031_v60, %v2032_v29  ;;  %v6665_v26 = vcombine.low %v1189_v49, %v1199_v58  ;;  %v4737_v7 = vcombine.low %v645_v8, %v645_v8  ;;  %v1203_v14 = vrot.slane %v1201_v10, 4 }
  0x74   : > { %v6670_v34 = vcombine.low %v2030_v40, %v2033_v6  ;;  %v629_v30 = vsel %vm6238_vm4, 0, %v554_v0  ;;  %v1206_v24 = vrot.slane %v1204_v62, 5  ;;  %v1212_v42 = vrot.slane %v1210_v3, 5 }
  0x75   : > { %5199 = vmatmul.mubr.bf16.gmra.mrb[16].mxu1 %v6665_v26  ;;  %v4735_v38 = vcombine.low %v629_v30, %v629_v30  ;;  %v4736_v25 = vcombine.high %v629_v30, %v629_v30  ;;  %871 = vst [vmem:[#allocation2 + $0x98] sm:$0x1] %v4737_v7  ;;  %v1214_v29 = vshrl.u32 %v6638_v11, 16  ;;  %v1220_v47 = vshll.u32 %v919_v12, 16 }
  0x76   : > { %7357 = vst [vmem:[#allocation8_spill] sm:$0xff] %v6670_v34  ;;  %5439 = vmatmul.mubr.bf16.gmra.mrb[16].mxu0 %v6670_v34  ;;  %v1207_v49 = vor.u32 %v1206_v24, %v1203_v14  ;;  %v556_v52 = vshrl.u32 %v6649_v39, 16  ;;  %v559_v55 = vshll.u32 %v6649_v39, 16  ;;  %v563_v56 = vshrl.u32 %v6656_v45, 16 }
  0x77   : > { %v922_v19 = vld [vmem:[#allocation2 + $0x8c] sm:$0x1]  ;;  %869 = vst [vmem:[#allocation2 + $0x90] sm:$0xf] %v4735_v38  ;;  %870 = vst [vmem:[#allocation2 + $0x94] sm:$0xf] %v4736_v25 }
  0x78   : > { %v1216_v20 = vrot.slane %v1214_v29, 4  ;;  %v1222_v40 = vrot.slane %v1220_v47, 5  ;;  %v566_v60 = vshll.u32 %v6656_v45, 16  ;;  %v6682_v62 = vld [vmem:[#allocation2 + $0x84] sm:$0xf]  ;;  %v2039_v12 = vrot.slane %v922_v19, 5 }
  0x79   : > { %v1208_v58 = vrot.slane %v1207_v49, 4  ;;  %v1244_v0 = vshll.u32 %v922_v19, 16  ;;  %v558_v8 = vrot.slane %v556_v52, 7  ;;  %v6684_v3 = vld [vmem:[#allocation2 + $0x88] sm:$0xf]  ;;  %v4809_v39 = vrot.slane %v6682_v62, 9 }
  0x7a   : > { %v1217_v6 = vor.u32 %v1216_v20, %v1212_v42  ;;  %v1225_v7 = vshrl.u32 %v6682_v62, 16  ;;  %v1228_v14 = vshll.u32 %v6682_v62, 16  ;;  %v2036_v30 = vrot.slane %v6684_v3, 5 }
  0x7b   : > { %v1213_v45 = vsel %vm6262_vm7, %v1208_v58, %v1212_v42  ;;  %v1234_v24 = vshll.u32 %v6684_v3, 16  ;;  %v1238_v38 = vshrl.u32 %v6684_v3, 16  ;;  %v1246_v49 = vrot.slane %v1244_v0, 5 }
  0x7c   : > { %v1218_v25 = vrot.slane %v1217_v6, 4  ;;  %v1227_v29 = vrot.slane %v1225_v7, 4  ;;  %v1230_v47 = vrot.slane %v1228_v14, 5  ;;  %v2037_v52 = vsel %vm6293_vm8, %v4809_v39, %v2036_v30  ;;  %v925_v20 = vld [vmem:[#allocation2 + $0x98] sm:$0x1] }
  0x7d   : > { %v2038_v19 = vrot.slane %v2036_v30, 4  ;;  %v1236_v10 = vrot.slane %v1234_v24, 5  ;;  %v1240_v61 = vrot.slane %v1238_v38, 4  ;;  %v2046_v34 = vrot.slane %v925_v20, 5 }
  0x7e   : > { %v1223_v28 = vsel %vm6262_vm7, %v1218_v25, %v1222_v40  ;;  %v1231_v42 = vor.u32 %v1230_v47, %v1227_v29  ;;  %v561_v58 = vor.u32 %v559_v55, %v558_v8  ;;  %v6700_v6 = vld [vmem:[#allocation2 + $0x90] sm:$0xf]  ;;  %v6702_v7 = vld [vmem:[#allocation2 + $0x94] sm:$0xf]  ;;  %v646_v14 = vsel %vm6238_vm4, %v558_v8, 0 }
  0x7f   : > { %v2040_v41 = vsel %vm6293_vm8, %v2038_v19, %v2039_v12  ;;  %v6704_v0 = vcombine.low %v1213_v45, %v1223_v28  ;;  %v1241_v39 = vor.u32 %v1240_v61, %v1236_v10  ;;  %v4810_v24 = vrot.slane %v6700_v6, 9 }
  0x80   : > { %v6708_v30 = vcombine.low %v2037_v52, %v2040_v41  ;;  %v2043_v40 = vrot.slane %v6702_v7, 5  ;;  %v1232_v55 = vrot.slane %v1231_v42, 4  ;;  %v630_v38 = vsel %vm6238_vm4, 0, %v561_v58 }
  0x81   : > { %7358 = vst [vmem:[#allocation9_spill] sm:$0xff] %v6704_v0  ;;  %5202 = vmatprep.mubr.bf16.mxu1 %v6704_v0  ;;  %v1242_v12 = vrot.slane %v1241_v39, 4  ;;  %v4740_v25 = vcombine.low %v646_v14, %v646_v14  ;;  %v565_v28 = vrot.slane %v563_v56, 7  ;;  %v4738_v45 = vcombine.low %v630_v38, %v630_v38 }
  0x82   : > { %7359 = vst [vmem:[#allocation10_spill] sm:$0xff] %v6708_v30  ;;  %5442 = vmatprep.mubr.bf16.mxu0 %v6708_v30  ;;  %v2044_v61 = vsel %vm6293_vm8, %v4810_v24, %v2043_v40  ;;  %v2045_v41 = vrot.slane %v2043_v40, 4  ;;  %v1237_v8 = vsel %vm6262_vm7, %v1232_v55, %v1236_v10  ;;  %v4739_v47 = vcombine.high %v630_v38, %v630_v38  ;;  %v6730_v10 = vld [vmem:[%s6220_s28 + $0x78] sm:$0xff]  }
  0x83   : > { %v1247_v29 = vsel %vm6262_vm7, %v1242_v12, %v1246_v49  ;;  %874 = vst [vmem:[#allocation2 + $0xa4] sm:$0x1] %v4740_v25  ;;  %v568_v52 = vor.u32 %v566_v60, %v565_v28  ;;  %v647_v56 = vsel %vm6238_vm4, %v565_v28, 0  ;;  %872 = vst [vmem:[#allocation2 + $0x9c] sm:$0xf] %v4738_v45  ;;  %v1249_v39 = vshrl.u32 %v6700_v6, 16 }
  0x84   : > { %v2047_v19 = vsel %vm6293_vm8, %v2045_v41, %v2046_v34  ;;  %v6726_v42 = vcombine.low %v1237_v8, %v1247_v29  ;;  %v4743_v58 = vcombine.low %v647_v56, %v647_v56  ;;  %873 = vst [vmem:[#allocation2 + $0xa0] sm:$0xf] %v4739_v47  ;;  %v1252_v49 = vshll.u32 %v6700_v6, 16 }
  0x85   : > { %v6732_v14 = vcombine.low %v2044_v61, %v2047_v19  ;;  %v631_v60 = vsel %vm6238_vm4, 0, %v568_v52  ;;  %v1258_v24 = vshll.u32 %v6702_v7, 16  ;;  %v1251_v55 = vrot.slane %v1249_v39, 4 }
  0x86   : > { %7360 = vst [vmem:[#allocation11_spill] sm:$0xff] %v6726_v42  ;;  %5203 = vmatmul.mubr.bf16.gmra.mrb[20].mxu1 %v6726_v42  ;;  %v4741_v34 = vcombine.low %v631_v60, %v631_v60  ;;  %v4742_v40 = vcombine.high %v631_v60, %v631_v60  ;;  %877 = vst [vmem:[#allocation2 + $0xb0] sm:$0x1] %v4743_v58  ;;  %v1262_v12 = vshrl.u32 %v6702_v7, 16  ;;  %v1254_v38 = vrot.slane %v1252_v49, 5 }
  0x87   : > { %7361 = vst [vmem:[#allocation12_spill] sm:$0xff] %v6732_v14  ;;  %5443 = vmatmul.mubr.bf16.gmra.mrb[20].mxu0 %v6732_v14  ;;  %v1260_v25 = vrot.slane %v1258_v24, 5  ;;  %v1268_v28 = vshll.u32 %v925_v20, 16  ;;  %v7362_v61 = vshrl.u32 %v6668_v22, 16  ;;  %v573_v45 = vshll.u32 %v6668_v22, 16 }
  0x88   : > { %875 = vst [vmem:[#allocation2 + $0xa8] sm:$0xf] %v4741_v34  ;;  %876 = vst [vmem:[#allocation2 + $0xac] sm:$0xf] %v4742_v40  ;;  %v1264_v8 = vrot.slane %v1262_v12, 4  ;;  %v577_v29 = vshrl.u32 %v6730_v10, 16  ;;  %v1255_v52 = vor.u32 %v1254_v38, %v1251_v55  ;;  %v6750_v20 = vcombine.low %v6526_v18, %v6528_v23 }
  0x89   : > { %v572_v41 = vrot.slane %v7362_v61, 7  ;;  %v580_v47 = vshll.u32 %v6730_v10, 16  ;;  %v1270_v56 = vrot.slane %v1268_v28, 5  ;;  %v6756_v10 = vcombine.low %v6570_v16, %v6572_v17 }
  0x8a   : > { %v928_v58 = vld [vmem:[#allocation2 + $0xa4] sm:$0x1]  ;;  %v1265_v39 = vor.u32 %v1264_v8, %v1260_v25  ;;  %v579_v24 = vrot.slane %v577_v29, 7  ;;  %v6752_v34 = vld [vmem:[#allocation2 + $0x9c] sm:$0xf]  ;;  %v1256_v40 = vrot.slane %v1255_v52, 4 }
  0x8b   : > { %v648_v19 = vsel %vm6238_vm4, %v572_v41, 0  ;;  %v575_v60 = vor.u32 %v573_v45, %v572_v41  ;;  %v2053_v22 = vrot.slane %v928_v58, 5  ;;  %v1292_v12 = vshll.u32 %v928_v58, 16  ;;  %v6758_v55 = vld [vmem:[#allocation2 + $0xa0] sm:$0xf] }
  0x8c   : > { %v4746_v49 = vcombine.low %v648_v19, %v648_v19  ;;  %v4811_v38 = vrot.slane %v6752_v34, 9  ;;  %v1266_v18 = vrot.slane %v1265_v39, 4  ;;  %v1273_v23 = vshrl.u32 %v6752_v34, 16 }
  0x8d   : > { %v1276_v28 = vshll.u32 %v6752_v34, 16  ;;  %v2050_v61 = vrot.slane %v6758_v55, 5  ;;  %v6764_v41 = vld [vmem:[#allocation2 + $0xb0] sm:$0x1]  ;;  %v1261_v8 = vsel %vm6262_vm7, %v1256_v40, %v1260_v25  ;;  %v1282_v16 = vshll.u32 %v6758_v55, 16 }
  0x8e   : > { %880 = vst [vmem:[#allocation2 + $0xbc] sm:$0x1] %v4746_v49  ;;  %v1286_v17 = vshrl.u32 %v6758_v55, 16  ;;  %v2060_v45 = vrot.slane %v6764_v41, 5  ;;  %v1271_v29 = vsel %vm6262_vm7, %v1266_v18, %v1270_v56  ;;  %v1275_v52 = vrot.slane %v1273_v23, 4 }
  0x8f   : > { %v1278_v19 = vrot.slane %v1276_v28, 5  ;;  %v2051_v58 = vsel %vm6293_vm8, %v4811_v38, %v2050_v61  ;;  %v2052_v39 = vrot.slane %v2050_v61, 4  ;;  %v929_v49 = vld [vmem:[#allocation2 + $0xa8] sm:$0xf]  ;;  %v930_v14 = vld [vmem:[#allocation2 + $0xac] sm:$0xf]  ;;  %v6775_v30 = vcombine.low %v1261_v8, %v1271_v29 }
  0x90   : > { %v1284_v25 = vrot.slane %v1282_v16, 5  ;;  %v4812_v40 = vrot.slane %v929_v49, 9  ;;  %v2057_v42 = vrot.slane %v930_v14, 5  ;;  %v1288_v0 = vrot.slane %v1286_v17, 4 }
  0x91   : > { %v1279_v51 = vor.u32 %v1278_v19, %v1275_v52  ;;  %v2054_v2 = vsel %vm6293_vm8, %v2052_v39, %v2053_v22  ;;  %5206 = vmatprep.mubr.bf16.mxu1 %v6775_v30  ;;  %v1294_v56 = vrot.slane %v1292_v12, 5  ;;  %v632_v18 = vsel %vm6238_vm4, 0, %v575_v60 }
  0x92   : > { %v582_v38 = vor.u32 %v580_v47, %v579_v24  ;;  %v6782_v23 = vcombine.low %v2051_v58, %v2054_v2  ;;  %v2058_v28 = vsel %vm6293_vm8, %v4812_v40, %v2057_v42  ;;  %v2059_v61 = vrot.slane %v2057_v42, 4 }
  0x93   : > { %v1280_v8 = vrot.slane %v1279_v51, 4  ;;  %v1289_v16 = vor.u32 %v1288_v0, %v1284_v25  ;;  %v4744_v29 = vcombine.low %v632_v18, %v632_v18  ;;  %v4745_v17 = vcombine.high %v632_v18, %v632_v18 }
  0x94   : > { %v633_v22 = vsel %vm6238_vm4, 0, %v582_v38  ;;  %5446 = vmatprep.mubr.bf16.mxu0 %v6782_v23  ;;  %v2061_v12 = vsel %vm6293_vm8, %v2059_v61, %v2060_v45  ;;  %v649_v42 = vsel %vm6238_vm4, %v579_v24, 0  ;;  %v1297_v58 = vshrl.u32 %v929_v49, 16 }
  0x95   : > { %v1285_v2 = vsel %vm6262_vm7, %v1280_v8, %v1284_v25  ;;  %v6793_v47 = vld [vmem:[#allocation2 + $0xbc] sm:$0x1]  ;;  %v6797_v51 = vcombine.low %v2058_v28, %v2061_v12  ;;  %v1290_v0 = vrot.slane %v1289_v16, 4  ;;  %878 = vst [vmem:[#allocation2 + $0xb4] sm:$0xf] %v4744_v29  ;;  %v4747_v60 = vcombine.low %v633_v22, %v633_v22 }
  0x96   : > { %879 = vst [vmem:[#allocation2 + $0xb8] sm:$0xf] %v4745_v17  ;;  %v4748_v52 = vcombine.high %v633_v22, %v633_v22  ;;  %v4749_v19 = vcombine.low %v649_v42, %v649_v42  ;;  %v1300_v39 = vshll.u32 %v929_v49, 16  ;;  %v1306_v40 = vshll.u32 %v930_v14, 16 }
  0x97   : > { %5447 = vmatmul.mubr.bf16.gmra.mrb[24].mxu0 %v6797_v51  ;;  %v1295_v45 = vsel %vm6262_vm7, %v1290_v0, %v1294_v56  ;;  %881 = vst [vmem:[#allocation2 + $0xc0] sm:$0xf] %v4747_v60  ;;  %v1310_v27 = vshrl.u32 %v930_v14, 16  ;;  %v1316_v24 = vshll.u32 %v6764_v41, 16  ;;  %v1299_v18 = vrot.slane %v1297_v58, 4 }
  0x98   : > { %882 = vst [vmem:[#allocation2 + $0xc4] sm:$0xf] %v4748_v52  ;;  %v6803_v25 = vcombine.low %v1285_v2, %v1295_v45  ;;  %883 = vst [vmem:[#allocation2 + $0xc8] sm:$0x1] %v4749_v19  ;;  %v1302_v38 = vrot.slane %v1300_v39, 5  ;;  %v1308_v28 = vrot.slane %v1306_v40, 5  ;;  %v6808_v16 = vcombine.low %v6611_v5, %v6615_v1 }
  0x99   : > { %v2067_v61 = vrot.slane %v6793_v47, 5  ;;  %v1312_v8 = vrot.slane %v1310_v27, 4  ;;  %v6813_v29 = vcombine.low %v6636_v35, %v6638_v11  ;;  %v6817_v41 = vcombine.low %v6682_v62, %v6684_v3 }
  0x9a   : > { %5207 = vmatmul.mubr.bf16.gmra.mrb[24].mxu1 %v6803_v25  ;;  %v1303_v56 = vor.u32 %v1302_v38, %v1299_v18  ;;  %v6821_v17 = vcombine.low %v6700_v6, %v6702_v7  ;;  %v1340_v12 = vshll.u32 %v6793_v47, 16  ;;  %v6826_v5 = vcombine.low %v6752_v34, %v6758_v55 }
  0x9b   : > { %v1313_v22 = vor.u32 %v1312_v8, %v1308_v28  ;;  %v6828_v1 = vcombine.low %v929_v49, %v930_v14  ;;  %v1318_v62 = vrot.slane %v1316_v24, 5 }
  0x9c   : > { %v6830_v2 = vld [vmem:[#allocation2 + $0xb4] sm:$0xf]  ;;  %v1304_v11 = vrot.slane %v1303_v56, 4 }
  0x9d   : > { %v6832_v35 = vld [vmem:[#allocation2 + $0xb8] sm:$0xf]  ;;  %v4813_v3 = vrot.slane %v6830_v2, 9  ;;  %v1314_v7 = vrot.slane %v1313_v22, 4  ;;  %v1321_v42 = vshrl.u32 %v6830_v2, 16  ;;  %v1324_v34 = vshll.u32 %v6830_v2, 16 }
  0x9e   : > { %v2064_v6 = vrot.slane %v6832_v35, 5  ;;  %v6837_v47 = vld [vmem:[#allocation2 + $0xc0] sm:$0xf]  ;;  %v1309_v14 = vsel %vm6262_vm7, %v1304_v11, %v1308_v28  ;;  %v1330_v55 = vshll.u32 %v6832_v35, 16  ;;  %v1334_v11 = vshrl.u32 %v6832_v35, 16 }
  0x9f   : > { %v6839_v0 = vld [vmem:[#allocation2 + $0xc4] sm:$0xf]  ;;  %v937_v52 = vld [vmem:[#allocation2 + $0xc8] sm:$0x1]  ;;  %v4856_v19 = vrot.slane %v6837_v47, 9  ;;  %v1319_v40 = vsel %vm6262_vm7, %v1314_v7, %v1318_v62  ;;  %v1323_v45 = vrot.slane %v1321_v42, 4 }
  0xa0   : > { %v2065_v49 = vsel %vm6293_vm8, %v4813_v3, %v2064_v6  ;;  %v2066_v60 = vrot.slane %v2064_v6, 4  ;;  %v2941_v58 = vrot.slane %v6839_v0, 5  ;;  %v2944_v39 = vrot.slane %v937_v52, 5 }
  0xa1   : > { %v1326_v27 = vrot.slane %v1324_v34, 5  ;;  %v6855_v28 = vcombine.low %v1309_v14, %v1319_v40  ;;  %v1332_v22 = vrot.slane %v1330_v55, 5  ;;  %v1336_v6 = vrot.slane %v1334_v11, 4 }
  0xa2   : > { %v2068_v24 = vsel %vm6293_vm8, %v2066_v60, %v2067_v61  ;;  %v2942_v18 = vsel %vm6293_vm8, %v4856_v19, %v2941_v58  ;;  %v2943_v38 = vrot.slane %v2941_v58, 4  ;;  %v2654_v7 = vshrl.u32 %v6837_v47, 16 }
  0xa3   : > { %v6857_v8 = vcombine.low %v2065_v49, %v2068_v24  ;;  %v1327_v56 = vor.u32 %v1326_v27, %v1323_v45  ;;  %5210 = vmatprep.mubr.bf16.mxu1 %v6855_v28  ;;  %v2657_v42 = vshll.u32 %v6837_v47, 16  ;;  %v2663_v14 = vshll.u32 %v6839_v0, 16 }
  0xa4   : > { %v2945_v62 = vsel %vm6293_vm8, %v2943_v38, %v2944_v39  ;;  %v1337_v34 = vor.u32 %v1336_v6, %v1332_v22  ;;  %v1342_v55 = vrot.slane %v1340_v12, 5  ;;  %v2667_v49 = vshrl.u32 %v6839_v0, 16  ;;  %v6876_v38 = vld [vmem:[#allocation2] sm:$0xf]  ;;  %v6878_v12 = vld [vmem:[#allocation2 + $0x4] sm:$0xf] }
  0xa5   : > { %5450 = vmatprep.mubr.bf16.mxu0 %v6857_v8  ;;  %v6864_v61 = vcombine.low %v2942_v18, %v2945_v62  ;;  %v1328_v3 = vrot.slane %v1327_v56, 4  ;;  %v2673_v60 = vshll.u32 %v937_v52, 16  ;;  %v2656_v19 = vrot.slane %v2654_v7, 4 }
  0xa6   : > { %v2659_v58 = vrot.slane %v2657_v42, 5  ;;  %v1338_v40 = vrot.slane %v1337_v34, 4  ;;  %v2665_v45 = vrot.slane %v2663_v14, 5  ;;  %v2669_v27 = vrot.slane %v2667_v49, 4  ;;  %v6101_v14 = vld [vmem:[%s7321_s1 + $0x1c0] sm:$0xff]   ;;  %v6033_v49 = vld [vmem:[%s7321_s1 + $0x88] sm:$0xff]  }
  0xa7   : > { %5451 = vmatmul.mubr.bf16.gmra.mrb[28].mxu0 %v6864_v61  ;;  %v1333_v39 = vsel %vm6262_vm7, %v1328_v3, %v1332_v22  ;;  %v4774_v52 = vcombine.low %v6876_v38, %v6878_v12  ;;  %v2675_v11 = vrot.slane %v2673_v60, 5  ;;  %v6034_v22 = vld [vmem:[%s7321_s1 + $0x1c8] sm:$0xff]   ;;  %v6042_v60 = vld [vmem:[%s7321_s1 + $0x1d8] sm:$0xff]  }
  0xa8   : > { %5470 = vmatprep.mubr.bf16.mxu0 %v6337_v4  ;;  %v2660_v24 = vor.u32 %v2659_v58, %v2656_v19  ;;  %v1343_v18 = vsel %vm6262_vm7, %v1338_v40, %v1342_v55  ;;  %v2670_v56 = vor.u32 %v2669_v27, %v2665_v45  ;;  %v6038_v55 = vld [vmem:[%s7321_s1 + $0x1d0] sm:$0xff]   ;;  %v6102_v19 = vld [vmem:[%s7321_s1 + $0x80] sm:$0xff]   ;;  %v6041_v40 = vld [vmem:[%s7321_s1 + $0x98] sm:$0xff]  }
  0xa9   : > { %v6882_v62 = vcombine.low %v1333_v39, %v1343_v18  ;;  %v6037_v58 = vld [vmem:[%s7321_s1 + $0x90] sm:$0xff]   ;;  %v6046_v39 = vld [vmem:[%s7321_s1 + $0x1e0] sm:$0xff]   ;;  %v6049_v18 = vld [vmem:[%s7321_s1 + $0xa8] sm:$0xff]  }
  0xaa   : > { %v2661_v6 = vrot.slane %v2660_v24, 4  ;;  %v2671_v3 = vrot.slane %v2670_v56, 4  ;;  %v6045_v27 = vld [vmem:[%s7321_s1 + $0xa0] sm:$0xff]   ;;  %v6054_v24 = vld [vmem:[%s7321_s1 + $0x1f0] sm:$0xff]  }
  0xab   : > { %5211 = vmatmul.mubr.bf16.gmra.mrb[28].mxu1 %v6882_v62  ;;  %v6053_v56 = vld [vmem:[%s7321_s1 + $0xb0] sm:$0xff]  }
  0xac   : > { %v2666_v7 = vsel %vm6262_vm7, %v2661_v6, %v2665_v45  ;;  %5230 = vmatprep.mubr.bf16.mxu1 %v4774_v52  ;;  %v2676_v42 = vsel %vm6262_vm7, %v2671_v3, %v2675_v11  ;;  %v6050_v45 = vld [vmem:[%s7321_s1 + $0x1e8] sm:$0xff]   ;;  %v6058_v52 = vld [vmem:[%s7321_s1 + $0x1f8] sm:$0xff]   ;;  %v6060_v11 = vld [vmem:[%s7321_s1 + $0x200] sm:$0xff]   ;;  %v6969_v3 = vcombine.low %v6830_v2, %v6832_v35  ;;  %v1959_v2 = vrot.slane %v6878_v12, 5 }
  0xad   : > { %v6897_v34 = vcombine.low %v2666_v7, %v2676_v42  ;;  %v6057_v6 = vld [vmem:[%s7321_s1 + $0xb8] sm:$0xff]   ;;  %v6973_v7 = vcombine.low %v6837_v47, %v6839_v0  ;;  %v6979_v42 = vld [vmem:[#allocation2 + $0xcc] sm:$0xf]  ;;  %v6103_v47 = vld [vmem:[#allocation2 + $0x8] sm:$0x1] }
  0xae   : > { %v1962_v0 = vrot.slane %v6103_v47, 5  ;;  %v6073_v47 = vld [vmem:[%s7321_s1 + $0xf8] sm:$0xff]  }
  0xaf   : > { %5471 = vmatmul.mubr.bf16.vlgmr.msra.gmra.mrb[0].mxu0 %v6373_v43 }
  0xb0   : > { %5503 = vmatpush3.bf16.msra.mxu0 %v6101_v14  ;;  %5474 = vmatprep.mubr.bf16.mxu0 %v6496_v48  ;;  %v6981_v14 = vld [vmem:[#allocation2 + $0xd0] sm:$0xf] }
  0xb1   : > { %5504 = vmatprep.subr.bf16.mxu0 %v6034_v22  ;;  %v4866_v35 = vcombine.low %v6979_v42, %v6981_v14 }
  0xb3   : > { %5231 = vmatmul.mubr.bf16.vlgmr.msra.gmra.mrb[0].mxu1 %v6377_v44 }
  0xb4   : > { %5505 = vmatpush3.bf16.msra.mxu0 %v6034_v22  ;;  %5263 = vmatpush3.bf16.msra.mxu1 %v6102_v19  ;;  %v6059_v22 = vld [vmem:[%s7321_s1 + $0xc0] sm:$0xff]  }
  0xb5   : > { %5506 = vmatprep.subr.bf16.mxu0 %v6038_v55  ;;  %5234 = vmatprep.mubr.bf16.mxu1 %v6337_v4 }
  0xb6   : > { %5264 = vmatprep.subr.bf16.mxu1 %v6033_v49 }
  0xb7   : > { %5475 = vmatmul.mubr.bf16.gmra.mrb[4].mxu0 %v6534_v13 }
  0xb8   : > { %5478 = vmatprep.mubr.bf16.mxu0 %v6537_v31  ;;  %5507 = vmatpush3.bf16.msra.mxu0 %v6038_v55  ;;  %v4798_v55 = vrot.slane %v6876_v38, 9  ;;  %v6064_v38 = vld [vmem:[%s7321_s1 + $0x210] sm:$0xff]  }
  0xb9   : > { %5508 = vmatprep.subr.bf16.mxu0 %v6042_v60  ;;  %5265 = vmatpush3.bf16.msra.mxu1 %v6033_v49  ;;  %v1961_v49 = vrot.slane %v1959_v2, 4 }
  0xba   : > { %5266 = vmatprep.subr.bf16.mxu1 %v6037_v58 }
  0xbb   : > { %5235 = vmatmul.mubr.bf16.gmra.mrb[4].mxu1 %v6373_v43  ;;  %v1963_v12 = vsel %vm6293_vm8, %v1961_v49, %v1962_v0  ;;  %v7365_v0 = vld [vmem:[#allocation5_spill] sm:$0xff]  ;;  %v7367_v49 = vld [vmem:[#allocation6_spill] sm:$0xff] }
  0xbc   : > { %5509 = vmatpush3.bf16.msra.mxu0 %v6042_v60  ;;  %5238 = vmatprep.mubr.bf16.mxu1 %v6496_v48  ;;  %v1960_v60 = vsel %vm6293_vm8, %v4798_v55, %v1959_v2  ;;  %v6071_v2 = vld [vmem:[%s7321_s1 + $0xf0] sm:$0xff]   ;;  %v7366_v55 = vld [vmem:[#allocation11_spill] sm:$0xff] }
  0xbd   : > { %5510 = vmatprep.subr.bf16.mxu0 %v6046_v39  ;;  %5267 = vmatpush3.bf16.msra.mxu1 %v6037_v58  ;;  %v4814_v19 = vcombine.low %v1960_v60, %v1963_v12  ;;  %v6062_v58 = vld [vmem:[%s7321_s1 + $0x208] sm:$0xff]   ;;  %v3471_v60 = vshrl.u32 %v6979_v42, 16  ;;  %v3474_v12 = vshll.u32 %v6979_v42, 16 }
  0xbe   : > { %5268 = vmatprep.subr.bf16.mxu1 %v6041_v40 }
  0xbf   : > { %5479 = vmatmul.mubr.bf16.gmra.mrb[8].mxu0 %v6750_v20 }
  0xc0   : > { %5482 = vmatprep.mubr.bf16.mxu0 %v6756_v10  ;;  %5511 = vmatpush3.bf16.msra.mxu0 %v6046_v39  ;;  %v6061_v39 = vld [vmem:[%s7321_s1 + $0xc8] sm:$0xff]  }
  0xc1   : > { %5512 = vmatprep.subr.bf16.mxu0 %v6050_v45  ;;  %5269 = vmatpush3.bf16.msra.mxu1 %v6041_v40  ;;  %v6063_v40 = vld [vmem:[%s7321_s1 + $0xd0] sm:$0xff]  }
  0xc2   : > { %5270 = vmatprep.subr.bf16.mxu1 %v6045_v27 }
  0xc3   : > { %5239 = vmatmul.mubr.bf16.gmra.mrb[8].mxu1 %v6534_v13 }
  0xc4   : > { %5513 = vmatpush3.bf16.msra.mxu0 %v6050_v45  ;;  %5242 = vmatprep.mubr.bf16.mxu1 %v6537_v31  ;;  %v6066_v45 = vld [vmem:[%s7321_s1 + $0x218] sm:$0xff]  }
  0xc5   : > { %5514 = vmatprep.subr.bf16.mxu0 %v6054_v24  ;;  %5271 = vmatpush3.bf16.msra.mxu1 %v6045_v27  ;;  %v6068_v27 = vld [vmem:[%s7321_s1 + $0x220] sm:$0xff]  }
  0xc6   : > { %5272 = vmatprep.subr.bf16.mxu1 %v6049_v18 }
  0xc7   : > { %5483 = vmatmul.mubr.bf16.gmra.mrb[12].mxu0 %v6808_v16 }
  0xc8   : > { %5486 = vmatprep.mubr.bf16.mxu0 %v6813_v29  ;;  %5515 = vmatpush3.bf16.msra.mxu0 %v6054_v24  ;;  %v6070_v24 = vld [vmem:[%s7321_s1 + $0x228] sm:$0xff]  }
  0xc9   : > { %5516 = vmatprep.subr.bf16.mxu0 %v6058_v52  ;;  %5273 = vmatpush3.bf16.msra.mxu1 %v6049_v18  ;;  %v6067_v18 = vld [vmem:[%s7321_s1 + $0xe0] sm:$0xff]  }
  0xca   : > { %5274 = vmatprep.subr.bf16.mxu1 %v6053_v56 }
  0xcb   : > { %5243 = vmatmul.mubr.bf16.gmra.mrb[12].mxu1 %v6750_v20 }
  0xcc   : > { %5517 = vmatpush3.bf16.msra.mxu0 %v6058_v52  ;;  %5246 = vmatprep.mubr.bf16.mxu1 %v6756_v10  ;;  %v6072_v52 = vld [vmem:[%s7321_s1 + $0x230] sm:$0xff]  }
  0xcd   : > { %5550 = vmatprep.subr.bf16.mxu0 %v6060_v11  ;;  %5275 = vmatpush3.bf16.msra.mxu1 %v6053_v56  ;;  %v6069_v56 = vld [vmem:[%s7321_s1 + $0xe8] sm:$0xff]  }
  0xce   : > { %5276 = vmatprep.subr.bf16.mxu1 %v6057_v6 }
  0xcf   : > { %5487 = vmatmul.mubr.bf16.gmra.mrb[16].mxu0 %v6817_v41 }
  0xd0   : > { %5490 = vmatprep.mubr.bf16.mxu0 %v6821_v17 }
  0xd1   : > { %5277 = vmatpush3.bf16.msra.mxu1 %v6057_v6  ;;  %v7363_v6 = vld [vmem:[#allocation4_spill] sm:$0xff] }
  0xd2   : > { %5310 = vmatprep.subr.bf16.mxu1 %v6059_v22 }
  0xd3   : > { %5247 = vmatmul.mubr.bf16.gmra.mrb[16].mxu1 %v6808_v16 }
  0xd4   : > { %5250 = vmatprep.mubr.bf16.mxu1 %v6813_v29 }
  0xd7   : > { %5491 = vmatmul.mubr.bf16.gmra.mrb[20].mxu0 %v6826_v5 }
  0xd8   : > { %5494 = vmatprep.mubr.bf16.mxu0 %v6828_v1 }
  0xdb   : > { %5251 = vmatmul.mubr.bf16.gmra.mrb[20].mxu1 %v6817_v41 }
  0xdc   : > { %5254 = vmatprep.mubr.bf16.mxu1 %v6821_v17 }
  0xdf   : > { %5495 = vmatmul.mubr.bf16.gmra.mrb[24].mxu0 %v6969_v3 }
  0xe0   : > { %5498 = vmatprep.mubr.bf16.mxu0 %v6973_v7 }
  0xe3   : > { %5255 = vmatmul.mubr.bf16.gmra.mrb[24].mxu1 %v6826_v5 }
  0xe4   : > { %5258 = vmatprep.mubr.bf16.mxu1 %v6828_v1 }
  0xe7   : > { %5499 = vmatmul.mubr.bf16.gmra.mrb[28].mxu0 %v4866_v35  ;;  %v4095_v35 = vld [vmem:[%s7324_s4] sm:$0x3] }
  0xe8   : > { %5518 = vmatprep.mubr.bf16.mxu0 %v6392_v59 }
  0xeb   : > { %5259 = vmatmul.mubr.bf16.gmra.mrb[28].mxu1 %v6969_v3 }
  0xec   : > { %5278 = vmatprep.mubr.bf16.mxu1 %v4814_v19  ;;  %v3484_v19 = vshrl.u32 %v6981_v14, 16 }
  0xef   : > { %5519 = vmatmul.mubr.bf16.vlgmr.msra.gmra.mrb[0].mxu0 %v6427_v21 }
  0xf0   : > { %5551 = vmatpush3.bf16.msra.mxu0 %v6060_v11  ;;  %5522 = vmatprep.mubr.bf16.mxu0 %v6482_v36  ;;  %v6074_v11 = vld [vmem:[%s7321_s1 + $0x238] sm:$0xff]  }
  0xf1   : > { %5552 = vmatprep.subr.bf16.mxu0 %v6062_v58 }
  0xf3   : > { %5279 = vmatmul.mubr.bf16.vlgmr.msra.gmra.mrb[0].mxu1 %v6319_v46  ;;  %v6065_v46 = vld [vmem:[%s7321_s1 + $0xd8] sm:$0xff]  }
  0xf4   : > { %5553 = vmatpush3.bf16.msra.mxu0 %v6062_v58  ;;  %5311 = vmatpush3.bf16.msra.mxu1 %v6059_v22  ;;  %v7364_v22 = vld [vmem:[#allocation9_spill] sm:$0xff]  ;;  %v3480_v58 = vshll.u32 %v6981_v14, 16 }
  0xf5   : > { %5554 = vmatprep.subr.bf16.mxu0 %v6064_v38  ;;  %5282 = vmatprep.mubr.bf16.mxu1 %v6331_v57 }
  0xf6   : > { %5312 = vmatprep.subr.bf16.mxu1 %v6061_v39 }
  0xf7   : > { %5523 = vmatmul.mubr.bf16.gmra.mrb[4].mxu0 %v6551_v54 }
  0xf8   : > { %5526 = vmatprep.mubr.bf16.mxu0 %v6583_v50  ;;  %5555 = vmatpush3.bf16.msra.mxu0 %v6064_v38  ;;  %v6075_v38 = vld [vmem:[%s7321_s1 + $0x100] sm:$0xff]  }
  0xf9   : > { %5556 = vmatprep.subr.bf16.mxu0 %v6066_v45  ;;  %5313 = vmatpush3.bf16.msra.mxu1 %v6061_v39  ;;  %v3473_v39 = vrot.slane %v3471_v60, 4 }
  0xfa   : > { %5314 = vmatprep.subr.bf16.mxu1 %v6063_v40 }
  0xfb   : > { %5283 = vmatmul.mubr.bf16.gmra.mrb[4].mxu1 %v6359_v32 }
  0xfc   : > { %5557 = vmatpush3.bf16.msra.mxu0 %v6066_v45  ;;  %5286 = vmatprep.mubr.bf16.mxu1 %v6404_v9  ;;  %v3482_v45 = vrot.slane %v3480_v58, 5 }
  0xfd   : > { %5558 = vmatprep.subr.bf16.mxu0 %v6068_v27  ;;  %5315 = vmatpush3.bf16.msra.mxu1 %v6063_v40  ;;  %v3476_v40 = vrot.slane %v3474_v12, 5 }
  0xfe   : > { %5316 = vmatprep.subr.bf16.mxu1 %v6065_v46 }
  0xff   : > { %5527 = vmatmul.mubr.bf16.gmra.mrb[8].mxu0 %v6603_v37 }
 0x100   : > { %5530 = vmatprep.mubr.bf16.mxu0 %v6634_v33  ;;  %5559 = vmatpush3.bf16.msra.mxu0 %v6068_v27  ;;  %v3486_v27 = vrot.slane %v3484_v19, 4  ;;  %v7370_v19 = vld [vmem:[#allocation10_spill] sm:$0xff] }
 0x101   : > { %5560 = vmatprep.subr.bf16.mxu0 %v6070_v24  ;;  %5317 = vmatpush3.bf16.msra.mxu1 %v6065_v46  ;;  %v7073_v46 = vld [vmem:[#allocation2 + $0xd4] sm:$0x1] }
 0x102   : > { %5318 = vmatprep.subr.bf16.mxu1 %v6067_v18 }
 0x103   : > { %5287 = vmatmul.mubr.bf16.gmra.mrb[8].mxu1 %v6514_v63 }
 0x104   : > { %5561 = vmatpush3.bf16.msra.mxu0 %v6070_v24  ;;  %5290 = vmatprep.mubr.bf16.mxu1 %v7363_v6  ;;  %v7368_v24 = vld [vmem:[#allocation7_spill] sm:$0xff] }
 0x105   : > { %5562 = vmatprep.subr.bf16.mxu0 %v6072_v52  ;;  %5319 = vmatpush3.bf16.msra.mxu1 %v6067_v18  ;;  %v7369_v18 = vld [vmem:[#allocation8_spill] sm:$0xff] }
 0x106   : > { %5320 = vmatprep.subr.bf16.mxu1 %v6069_v56 }
 0x107   : > { %5531 = vmatmul.mubr.bf16.gmra.mrb[12].mxu0 %v6665_v26 }
 0x108   : > { %5534 = vmatprep.mubr.bf16.mxu0 %v7364_v22  ;;  %5563 = vmatpush3.bf16.msra.mxu0 %v6072_v52  ;;  %v3477_v52 = vor.u32 %v3476_v40, %v3473_v39 }
 0x109   : > { %5564 = vmatprep.subr.bf16.mxu0 %v6074_v11  ;;  %5321 = vmatpush3.bf16.msra.mxu1 %v6069_v56  ;;  %v3487_v56 = vor.u32 %v3486_v27, %v3482_v45  ;;  %v4227_v27 = vsel %vm4225_vm9, %v4095_v35, 0 }
 0x10a   : > { %5322 = vmatprep.subr.bf16.mxu1 %v6071_v2 }
 0x10b   : > { %5291 = vmatmul.mubr.bf16.gmra.mrb[12].mxu1 %v7365_v0  ;;  %v3488_v60 = vrot.slane %v3487_v56, 4 }
 0x10c   : > { %5565 = vmatpush3.bf16.msra.mxu0 %v6074_v11  ;;  %5294 = vmatprep.mubr.bf16.mxu1 %v7367_v49  ;;  %v3490_v11 = vshll.u32 %v7073_v46, 16 }
 0x10d   : > { %5952 = vmatprep.subr.msk.bf16.mxu0 %vm4225_vm9, %v4095_v35  ;;  %5323 = vmatpush3.bf16.msra.mxu1 %v6071_v2  ;;  %v3478_v2 = vrot.slane %v3477_v52, 4 }
 0x10e   : > { %5324 = vmatprep.subr.bf16.mxu1 %v6073_v47  ;;  %v3492_v12 = vrot.slane %v3490_v11, 5 }
 0x10f   : > { %5535 = vmatmul.mubr.bf16.gmra.mrb[16].mxu0 %v7366_v55  ;;  %v3483_v58 = vsel %vm6262_vm7, %v3478_v2, %v3482_v45 }
 0x110   : > { %5538 = vmatprep.mubr.bf16.mxu0 %v6775_v30  ;;  %v3493_v39 = vsel %vm6262_vm7, %v3488_v60, %v3492_v12 }
 0x111   : > { %5325 = vmatpush3.bf16.msra.mxu1 %v6073_v47  ;;  %v7371_v47 = vld [vmem:[#allocation12_spill] sm:$0xff]  ;;  %v4875_v40 = vcombine.low %v3483_v58, %v3493_v39 }
 0x112   : > { %5358 = vmatprep.subr.bf16.mxu1 %v6075_v38 }
 0x113   : > { %5295 = vmatmul.mubr.bf16.gmra.mrb[16].mxu1 %v7368_v24 }
 0x114   : > { %5298 = vmatprep.mubr.bf16.mxu1 %v7369_v18 }
 0x117   : > { %5539 = vmatmul.mubr.bf16.gmra.mrb[20].mxu0 %v6803_v25 }
 0x118   : > { %5542 = vmatprep.mubr.bf16.mxu0 %v6855_v28 }
 0x11b   : > { %5299 = vmatmul.mubr.bf16.gmra.mrb[20].mxu1 %v7370_v19 }
 0x11c   : > { %5302 = vmatprep.mubr.bf16.mxu1 %v7371_v47 }
 0x11f   : > { %5543 = vmatmul.mubr.bf16.gmra.mrb[24].mxu0 %v6882_v62 }
 0x120   : > { %5546 = vmatprep.mubr.bf16.mxu0 %v6897_v34 }
 0x123   : > { %5303 = vmatmul.mubr.bf16.gmra.mrb[24].mxu1 %v6782_v23 }
 0x124   : > { %5306 = vmatprep.mubr.bf16.mxu1 %v6797_v51 }
 0x127   : > { %5547 = vmatmul.mubr.bf16.gmra.mrb[28].mxu0 %v4875_v40 }
 0x128   : > { %5566 = vmatprep.mubr.bf16.mxu0 %v6331_v57  ;;  %v6077_v57 = vld [vmem:[%s7321_s1 + $0x110] sm:$0xff]  }
 0x12b   : > { %5307 = vmatmul.mubr.bf16.gmra.mrb[28].mxu1 %v6857_v8 }
 0x12c   : > { %5326 = vmatprep.mubr.bf16.mxu1 %v6377_v44  ;;  %v6081_v44 = vld [vmem:[%s7321_s1 + $0x130] sm:$0xff]  }
 0x12f   : > { %5567 = vmatmul.mubr.bf16.vlgmr.msra.gmra.mrb[0].mxu0 %v6359_v32  ;;  %v6078_v32 = vld [vmem:[%s7321_s1 + $0x118] sm:$0xff]  }
 0x130   : > { %5599 = vmatpush3.bf16.msra.mxu0 %v4227_v27  ;;  %5570 = vmatprep.mubr.bf16.mxu0 %v6404_v9  ;;  %v6082_v9 = vld [vmem:[%s7321_s1 + $0x138] sm:$0xff]  }
 0x133   : > { %5327 = vmatmul.mubr.bf16.vlgmr.msra.gmra.mrb[0].mxu1 %v6337_v4  ;;  %v6079_v4 = vld [vmem:[%s7321_s1 + $0x120] sm:$0xff]  }
 0x134   : > { %5359 = vmatpush3.bf16.msra.mxu1 %v6075_v38  ;;  %5330 = vmatprep.mubr.bf16.mxu1 %v6373_v43  ;;  %v6080_v43 = vld [vmem:[%s7321_s1 + $0x128] sm:$0xff]  }
 0x135   : > { %5360 = vmatprep.subr.bf16.mxu1 %v6076_v53 }
 0x137   : > { %5571 = vmatmul.mubr.bf16.gmra.mrb[4].mxu0 %v6514_v63  ;;  %v4884_v63 = vrot.slane %v6979_v42, 9 }
 0x138   : > { %5574 = vmatprep.mubr.bf16.mxu0 %v7363_v6  ;;  %5361 = vmatpush3.bf16.msra.mxu1 %v6076_v53 }
 0x139   : > { %5362 = vmatprep.subr.bf16.mxu1 %v6077_v57 }
 0x13b   : > { %5331 = vmatmul.mubr.bf16.gmra.mrb[4].mxu1 %v6496_v48  ;;  %v3758_v48 = vrot.slane %v6981_v14, 5 }
 0x13c   : > { %5334 = vmatprep.mubr.bf16.mxu1 %v6534_v13  ;;  %5363 = vmatpush3.bf16.msra.mxu1 %v6077_v57 }
 0x13d   : > { %5364 = vmatprep.subr.bf16.mxu1 %v6078_v32  ;;  %v3760_v13 = vrot.slane %v3758_v48, 4 }
 0x13f   : > { %5575 = vmatmul.mubr.bf16.gmra.mrb[8].mxu0 %v7365_v0 }
 0x140   : > { %5578 = vmatprep.mubr.bf16.mxu0 %v7367_v49  ;;  %5365 = vmatpush3.bf16.msra.mxu1 %v6078_v32 }
 0x141   : > { %5366 = vmatprep.subr.bf16.mxu1 %v6079_v4 }
 0x143   : > { %5335 = vmatmul.mubr.bf16.gmra.mrb[8].mxu1 %v6537_v31  ;;  %v3761_v31 = vrot.slane %v7073_v46, 5 }
 0x144   : > { %5338 = vmatprep.mubr.bf16.mxu1 %v6750_v20  ;;  %5367 = vmatpush3.bf16.msra.mxu1 %v6079_v4  ;;  %v3759_v20 = vsel %vm6293_vm8, %v4884_v63, %v3758_v48 }
 0x145   : > { %5368 = vmatprep.subr.bf16.mxu1 %v6080_v43 }
 0x147   : > { %5579 = vmatmul.mubr.bf16.gmra.mrb[12].mxu0 %v7368_v24 }
 0x148   : > { %5582 = vmatprep.mubr.bf16.mxu0 %v7369_v18  ;;  %5369 = vmatpush3.bf16.msra.mxu1 %v6080_v43 }
 0x149   : > { %5370 = vmatprep.subr.bf16.mxu1 %v6081_v44 }
 0x14b   : > { %5339 = vmatmul.mubr.bf16.gmra.mrb[12].mxu1 %v6756_v10  ;;  %v3762_v10 = vsel %vm6293_vm8, %v3760_v13, %v3761_v31 }
 0x14c   : > { %5342 = vmatprep.mubr.bf16.mxu1 %v6808_v16  ;;  %5371 = vmatpush3.bf16.msra.mxu1 %v6081_v44  ;;  %v6084_v16 = vld [vmem:[%s7003_s19 + $0x8] sm:$0xff]  }
 0x14d   : > { %5372 = vmatprep.subr.bf16.mxu1 %v6082_v9 }
 0x14f   : > { %5583 = vmatmul.mubr.bf16.gmra.mrb[16].mxu0 %v7370_v19 }
 0x150   : > { %5586 = vmatprep.mubr.bf16.mxu0 %v7371_v47  ;;  %5373 = vmatpush3.bf16.msra.mxu1 %v6082_v9 }
 0x153   : > { %5343 = vmatmul.mubr.bf16.gmra.mrb[16].mxu1 %v6813_v29  ;;  %v6085_v29 = vld [vmem:[%s7003_s19 + $0x10] sm:$0xff]  }
 0x154   : > { %5346 = vmatprep.mubr.bf16.mxu1 %v6817_v41  ;;  %v6086_v41 = vld [vmem:[%s7003_s19 + $0x18] sm:$0xff]  }
 0x157   : > { %5587 = vmatmul.mubr.bf16.gmra.mrb[20].mxu0 %v6782_v23  ;;  %v4885_v23 = vcombine.low %v3759_v20, %v3762_v10 }
 0x158   : > { %5590 = vmatprep.mubr.bf16.mxu0 %v6797_v51  ;;  %v6083_v51 = vld [vmem:[%s7003_s19] sm:$0xff]  }
 0x15b   : > { %5347 = vmatmul.mubr.bf16.gmra.mrb[20].mxu1 %v6821_v17  ;;  %v6087_v17 = vld [vmem:[%s7003_s19 + $0x20] sm:$0xff]  }
 0x15c   : > { %5350 = vmatprep.mubr.bf16.mxu1 %v6826_v5  ;;  %v6088_v5 = vld [vmem:[%s7003_s19 + $0x28] sm:$0xff]  }
 0x15f   : > { %5591 = vmatmul.mubr.bf16.gmra.mrb[24].mxu0 %v6857_v8  ;;  %v6091_v8 = vld [vmem:[%s7003_s19 + $0x40] sm:$0xff]  }
 0x160   : > { %5594 = vmatprep.mubr.bf16.mxu0 %v6864_v61  ;;  %v6097_v61 = vld [vmem:[%s7003_s19 + $0x70] sm:$0xff]  }
 0x163   : > { %5351 = vmatmul.mubr.bf16.gmra.mrb[24].mxu1 %v6828_v1  ;;  %v6089_v1 = vld [vmem:[%s7003_s19 + $0x30] sm:$0xff]  }
 0x164   : > { %5354 = vmatprep.mubr.bf16.mxu1 %v6969_v3 }
 0x167   : > { %5595 = vmatmul.mubr.bf16.gmra.mrb[28].mxu0 %v4885_v23 }
 0x168   : > { %5600 = vmatprep.mubr.msk.bf16.mxu0 %vm4176_vm10, %v6083_v51 }
 0x16b   : > { %5355 = vmatmul.mubr.bf16.gmra.mrb[28].mxu1 %v6973_v7 }
 0x16c   : > { %5374 = vmatprep.mubr.bf16.mxu1 %v7372_v15 }
 0x16f   : > { %5601 = vmatmul.mubr.msk.bf16.vlgmr.msra.gmra.mrb[0].mxu0 %vm4176_vm10, %v6084_v16 }
 0x170   : > { %5604 = vmatprep.mubr.msk.bf16.mxu0 %vm4176_vm10, %v6085_v29 }
 0x173   : > { %5375 = vmatmul.mubr.bf16.vlgmr.msra.gmra.mrb[0].mxu1 %v6392_v59  ;;  %v6090_v59 = vld [vmem:[%s7003_s19 + $0x38] sm:$0xff]  }
 0x174   : > { %5378 = vmatprep.mubr.bf16.mxu1 %v6427_v21  ;;  %v6092_v21 = vld [vmem:[%s7003_s19 + $0x48] sm:$0xff]  }
 0x177   : > { %5605 = vmatmul.mubr.msk.bf16.gmra.mrb[4].mxu0 %vm4176_vm10, %v6086_v41 }
 0x178   : > { %5608 = vmatprep.mubr.msk.bf16.mxu0 %vm4176_vm10, %v6087_v17 }
 0x17b   : > { %5379 = vmatmul.mubr.bf16.gmra.mrb[4].mxu1 %v6482_v36  ;;  %v6093_v36 = vld [vmem:[%s7003_s19 + $0x50] sm:$0xff]  }
 0x17c   : > { %5382 = vmatprep.mubr.bf16.mxu1 %v6551_v54  ;;  %v6094_v54 = vld [vmem:[%s7003_s19 + $0x58] sm:$0xff]  }
 0x17f   : > { %5609 = vmatmul.mubr.msk.bf16.gmra.mrb[8].mxu0 %vm4176_vm10, %v6088_v5 }
 0x180   : > { %5612 = vmatprep.mubr.msk.bf16.mxu0 %vm4176_vm10, %v6089_v1 }
 0x183   : > { %5383 = vmatmul.mubr.bf16.gmra.mrb[8].mxu1 %v6583_v50  ;;  %v6095_v50 = vld [vmem:[%s7003_s19 + $0x60] sm:$0xff]  }
 0x184   : > { %5386 = vmatprep.mubr.bf16.mxu1 %v6603_v37  ;;  %v6096_v37 = vld [vmem:[%s7003_s19 + $0x68] sm:$0xff]  }
 0x187   : > { %5613 = vmatmul.mubr.msk.bf16.gmra.mrb[12].mxu0 %vm4176_vm10, %v6090_v59 }
 0x188   : > { %5616 = vmatprep.mubr.msk.bf16.mxu0 %vm4176_vm10, %v6091_v8 }
 0x18b   : > { %5387 = vmatmul.mubr.bf16.gmra.mrb[12].mxu1 %v6634_v33  ;;  %v6098_v33 = vld [vmem:[%s7003_s19 + $0x78] sm:$0xff]  }
 0x18c   : > { %5390 = vmatprep.mubr.bf16.mxu1 %v6665_v26 }
 0x18f   : > { %5617 = vmatmul.mubr.msk.bf16.gmra.mrb[16].mxu0 %vm4176_vm10, %v6092_v21 }
 0x190   : > { %5620 = vmatprep.mubr.msk.bf16.mxu0 %vm4176_vm10, %v6093_v36 }
 0x193   : > { %5391 = vmatmul.mubr.bf16.gmra.mrb[16].mxu1 %v7364_v22 }
 0x194   : > { %5394 = vmatprep.mubr.bf16.mxu1 %v7366_v55 }
 0x197   : > { %5621 = vmatmul.mubr.msk.bf16.gmra.mrb[20].mxu0 %vm4176_vm10, %v6094_v54 }
 0x198   : > { %5624 = vmatprep.mubr.msk.bf16.mxu0 %vm4176_vm10, %v6095_v50 }
 0x19b   : > { %5395 = vmatmul.mubr.bf16.gmra.mrb[20].mxu1 %v6775_v30 }
 0x19c   : > { %5398 = vmatprep.mubr.bf16.mxu1 %v6803_v25  ;;  %v7202_v25 = vld [vmem:[%s7322_s2] ss:$0 sm:$0xff] }
 0x19f   : > { %5625 = vmatmul.mubr.msk.bf16.gmra.mrb[24].mxu0 %vm4176_vm10, %v6096_v37 }
 0x1a0   : > { %5628 = vmatprep.mubr.msk.bf16.mxu0 %vm4176_vm10, %v6097_v61 }
 0x1a3   : > { %5399 = vmatmul.mubr.bf16.gmra.mrb[24].mxu1 %v6855_v28 }
 0x1a4   : > { %5402 = vmatprep.mubr.bf16.mxu1 %v6882_v62  ;;  %v7208_v62 = vld [vmem:[%s7325_s5] ss:$0 sm:$0xff] }
 0x1a7   : > { %5629 = vmatmul.mubr.msk.bf16.gmra.mrb[28].mxu0 %vm4176_vm10, %v6098_v33 }
 0x1ab   : > { %5403 = vmatmul.mubr.bf16.gmra.mrb[28].mxu1 %v6897_v34 }
 0x242   : > { %v5602_v26 = vpop.f32.mrb[0].mxu0 }
 0x243   : > { %v4263_v3 = vpop.f32.mrb[1].mxu0 }
 0x244   : > { %v5603_v7 = vpop.f32.mrb[2].mxu0 }
 0x245   : > { %v4266_v30 = vpop.f32.mrb[3].mxu0 }
 0x246   : > { %v5376_v42 = vpop.f32.mrb[0].mxu1 }
 0x247   : > { %v5632_v14 = vadd.f32 %v5376_v42, %v7202_v25  ;;  %v2779_v28 = vpop.f32.mrb[1].mxu1 }
 0x248   : > { %v5634_v34 = vadd.f32 %v7202_v25, %v2779_v28  ;;  %v5377_v22 = vpop.f32.mrb[2].mxu1 }
 0x249   : > { %v5633_v0 = vadd.f32 %v5632_v14, %v5602_v26  ;;  %v5636_v55 = vadd.f32 %v5377_v22, %v7202_v25  ;;  %v2782_v49 = vpop.f32.mrb[3].mxu1 }
 0x24a   : > { %v5606_v6 = vpop.f32.mrb[4].mxu0  ;;  %v5635_v45 = vadd.f32 %v5634_v34, %v4263_v3  ;;  %v5638_v46 = vadd.f32 %v7202_v25, %v2782_v49 }
 0x24b   : > { %v4279_v35 = vpop.f32.mrb[5].mxu0  ;;  %v4431_v18 = vadd.f32 %v5633_v0, %v7208_v62  ;;  %v5637_v52 = vadd.f32 %v5636_v55, %v5603_v7 }
 0x24c   : > { %v5607_v38 = vpop.f32.mrb[6].mxu0  ;;  %v4429_v56 = vadd.f32 %v5635_v45, %v7208_v62  ;;  %v5639_v11 = vadd.f32 %v5638_v46, %v4266_v30 }
 0x24d   : > { %v4282_v24 = vpop.f32.mrb[7].mxu0  ;;  %v4463_v2 = vmax.f32 %v4431_v18, 0.0  ;;  %v4432_v60 = vadd.f32 %v5637_v52, %v7208_v62 }
 0x24e   : > { %v4461_v12 = vmax.f32 %v4429_v56, 0.0  ;;  %v4430_v19 = vadd.f32 %v5639_v11, %v7208_v62  ;;  %v5380_v47 = vpop.f32.mrb[4].mxu1 }
 0x24f   : > { %4495 = vst [vmem:[%s7218_s12 + $0x10] sm:$0xff] %v4463_v2  ;;  %v4464_v58 = vmax.f32 %v4432_v60, 0.0  ;;  %v5640_v39 = vadd.f32 %v5380_v47, %v7202_v25  ;;  %v2795_v40 = vpop.f32.mrb[5].mxu1 }
 0x250   : > { %4493 = vst [vmem:[%s7218_s12] sm:$0xff] %v4461_v12  ;;  %v4462_v53 = vmax.f32 %v4430_v19, 0.0  ;;  %v5642_v57 = vadd.f32 %v7202_v25, %v2795_v40  ;;  %v5381_v32 = vpop.f32.mrb[6].mxu1 }
 0x251   : > { %4496 = vst [vmem:[%s7218_s12 + $0x18] sm:$0xff] %v4464_v58  ;;  %v5641_v43 = vadd.f32 %v5640_v39, %v5606_v6  ;;  %v5644_v44 = vadd.f32 %v5381_v32, %v7202_v25  ;;  %v2798_v9 = vpop.f32.mrb[7].mxu1 }
 0x252   : > { %v5610_v27 = vpop.f32.mrb[8].mxu0  ;;  %4494 = vst [vmem:[%s7218_s12 + $0x8] sm:$0xff] %v4462_v53  ;;  %v5643_v63 = vadd.f32 %v5642_v57, %v4279_v35  ;;  %v5646_v13 = vadd.f32 %v7202_v25, %v2798_v9 }
 0x253   : > { %v4295_v4 = vpop.f32.mrb[9].mxu0  ;;  %v4435_v20 = vadd.f32 %v5641_v43, %v7208_v62  ;;  %v5645_v10 = vadd.f32 %v5644_v44, %v5607_v38 }
 0x254   : > { %v5611_v48 = vpop.f32.mrb[10].mxu0  ;;  %v4433_v23 = vadd.f32 %v5643_v63, %v7208_v62  ;;  %v5647_v51 = vadd.f32 %v5646_v13, %v4282_v24 }
 0x255   : > { %v4298_v31 = vpop.f32.mrb[11].mxu0  ;;  %v4467_v16 = vmax.f32 %v4435_v20, 0.0  ;;  %v4436_v29 = vadd.f32 %v5645_v10, %v7208_v62 }
 0x256   : > { %v4465_v15 = vmax.f32 %v4433_v23, 0.0  ;;  %v4434_v41 = vadd.f32 %v5647_v51, %v7208_v62  ;;  %v5384_v17 = vpop.f32.mrb[8].mxu1 }
 0x257   : > { %4499 = vst [vmem:[%s7218_s12 + $0x30] sm:$0xff] %v4467_v16  ;;  %v4468_v5 = vmax.f32 %v4436_v29, 0.0  ;;  %v5648_v1 = vadd.f32 %v5384_v17, %v7202_v25  ;;  %v2811_v59 = vpop.f32.mrb[9].mxu1 }
 0x258   : > { %4497 = vst [vmem:[%s7218_s12 + $0x20] sm:$0xff] %v4465_v15  ;;  %v4466_v21 = vmax.f32 %v4434_v41, 0.0  ;;  %v5650_v36 = vadd.f32 %v7202_v25, %v2811_v59  ;;  %v5385_v54 = vpop.f32.mrb[10].mxu1 }
 0x259   : > { %4500 = vst [vmem:[%s7218_s12 + $0x38] sm:$0xff] %v4468_v5  ;;  %v5649_v37 = vadd.f32 %v5648_v1, %v5610_v27  ;;  %v5652_v61 = vadd.f32 %v5385_v54, %v7202_v25  ;;  %v2814_v33 = vpop.f32.mrb[11].mxu1 }
 0x25a   : > { %v5614_v8 = vpop.f32.mrb[12].mxu0  ;;  %4498 = vst [vmem:[%s7218_s12 + $0x28] sm:$0xff] %v4466_v21  ;;  %v5651_v3 = vadd.f32 %v5650_v36, %v4295_v4  ;;  %v5654_v7 = vadd.f32 %v7202_v25, %v2814_v33 }
 0x25b   : > { %v4311_v50 = vpop.f32.mrb[13].mxu0  ;;  %v4439_v42 = vadd.f32 %v5649_v37, %v7208_v62  ;;  %v5653_v14 = vadd.f32 %v5652_v61, %v5611_v48 }
 0x25c   : > { %v5615_v26 = vpop.f32.mrb[14].mxu0  ;;  %v4437_v28 = vadd.f32 %v5651_v3, %v7208_v62  ;;  %v5655_v6 = vadd.f32 %v5654_v7, %v4298_v31 }
 0x25d   : > { %v4314_v30 = vpop.f32.mrb[15].mxu0  ;;  %v4471_v34 = vmax.f32 %v4439_v42, 0.0  ;;  %v4440_v22 = vadd.f32 %v5653_v14, %v7208_v62 }
 0x25e   : > { %v4469_v35 = vmax.f32 %v4437_v28, 0.0  ;;  %v4438_v0 = vadd.f32 %v5655_v6, %v7208_v62  ;;  %v5388_v55 = vpop.f32.mrb[12].mxu1 }
 0x25f   : > { %4503 = vst [vmem:[%s7218_s12 + $0x50] sm:$0xff] %v4471_v34  ;;  %v4472_v49 = vmax.f32 %v4440_v22, 0.0  ;;  %v5656_v38 = vadd.f32 %v5388_v55, %v7202_v25  ;;  %v2827_v45 = vpop.f32.mrb[13].mxu1 }
 0x260   : > { %4501 = vst [vmem:[%s7218_s12 + $0x40] sm:$0xff] %v4469_v35  ;;  %v4470_v24 = vmax.f32 %v4438_v0, 0.0  ;;  %v5658_v18 = vadd.f32 %v7202_v25, %v2827_v45  ;;  %v5389_v52 = vpop.f32.mrb[14].mxu1 }
 0x261   : > { %4504 = vst [vmem:[%s7218_s12 + $0x58] sm:$0xff] %v4472_v49  ;;  %v5657_v11 = vadd.f32 %v5656_v38, %v5614_v8  ;;  %v5660_v2 = vadd.f32 %v5389_v52, %v7202_v25  ;;  %v2830_v60 = vpop.f32.mrb[15].mxu1 }
 0x262   : > { %v5618_v46 = vpop.f32.mrb[16].mxu0  ;;  %4502 = vst [vmem:[%s7218_s12 + $0x48] sm:$0xff] %v4470_v24  ;;  %v5659_v19 = vadd.f32 %v5658_v18, %v4311_v50  ;;  %v5662_v47 = vadd.f32 %v7202_v25, %v2830_v60 }
 0x263   : > { %v4327_v56 = vpop.f32.mrb[17].mxu0  ;;  %v4443_v39 = vadd.f32 %v5657_v11, %v7208_v62  ;;  %v5661_v40 = vadd.f32 %v5660_v2, %v5615_v26 }
 0x264   : > { %v5619_v12 = vpop.f32.mrb[18].mxu0  ;;  %v4441_v27 = vadd.f32 %v5659_v19, %v7208_v62  ;;  %v5663_v53 = vadd.f32 %v5662_v47, %v4314_v30 }
 0x265   : > { %v4330_v58 = vpop.f32.mrb[19].mxu0  ;;  %v4475_v57 = vmax.f32 %v4443_v39, 0.0  ;;  %v4444_v32 = vadd.f32 %v5661_v40, %v7208_v62 }
 0x266   : > { %v4473_v4 = vmax.f32 %v4441_v27, 0.0  ;;  %v4442_v43 = vadd.f32 %v5663_v53, %v7208_v62  ;;  %v5392_v44 = vpop.f32.mrb[16].mxu1 }
 0x267   : > { %4507 = vst [vmem:[%s7218_s12 + $0x70] sm:$0xff] %v4475_v57  ;;  %v4476_v9 = vmax.f32 %v4444_v32, 0.0  ;;  %v5664_v48 = vadd.f32 %v5392_v44, %v7202_v25  ;;  %v2843_v63 = vpop.f32.mrb[17].mxu1 }
 0x268   : > { %4505 = vst [vmem:[%s7218_s12 + $0x60] sm:$0xff] %v4473_v4  ;;  %v4474_v31 = vmax.f32 %v4442_v43, 0.0  ;;  %v5666_v20 = vadd.f32 %v7202_v25, %v2843_v63  ;;  %v5393_v10 = vpop.f32.mrb[18].mxu1 }
 0x269   : > { %4508 = vst [vmem:[%s7218_s12 + $0x78] sm:$0xff] %v4476_v9  ;;  %v5665_v51 = vadd.f32 %v5664_v48, %v5618_v46  ;;  %v5668_v16 = vadd.f32 %v5393_v10, %v7202_v25  ;;  %v2846_v29 = vpop.f32.mrb[19].mxu1 }
 0x26a   : > { %v5622_v13 = vpop.f32.mrb[20].mxu0  ;;  %4506 = vst [vmem:[%s7218_s12 + $0x68] sm:$0xff] %v4474_v31  ;;  %v5667_v41 = vadd.f32 %v5666_v20, %v4327_v56  ;;  %v5670_v17 = vadd.f32 %v7202_v25, %v2846_v29 }
 0x26b   : > { %v4343_v23 = vpop.f32.mrb[21].mxu0  ;;  %v4447_v1 = vadd.f32 %v5665_v51, %v7208_v62  ;;  %v5669_v59 = vadd.f32 %v5668_v16, %v5619_v12 }
 0x26c   : > { %v5623_v15 = vpop.f32.mrb[22].mxu0  ;;  %v4445_v8 = vadd.f32 %v5667_v41, %v7208_v62  ;;  %v5671_v21 = vadd.f32 %v5670_v17, %v4330_v58 }
 0x26d   : > { %v4346_v5 = vpop.f32.mrb[23].mxu0  ;;  %v4479_v36 = vmax.f32 %v4447_v1, 0.0  ;;  %v4448_v54 = vadd.f32 %v5669_v59, %v7208_v62 }
 0x26e   : > { %v4477_v50 = vmax.f32 %v4445_v8, 0.0  ;;  %v4446_v37 = vadd.f32 %v5671_v21, %v7208_v62  ;;  %v5396_v61 = vpop.f32.mrb[20].mxu1 }
 0x26f   : > { %4511 = vst [vmem:[%s7218_s12 + $0x90] sm:$0xff] %v4479_v36  ;;  %v4480_v33 = vmax.f32 %v4448_v54, 0.0  ;;  %v5672_v26 = vadd.f32 %v5396_v61, %v7202_v25  ;;  %v2859_v3 = vpop.f32.mrb[21].mxu1 }
 0x270   : > { %4509 = vst [vmem:[%s7218_s12 + $0x80] sm:$0xff] %v4477_v50  ;;  %v4478_v30 = vmax.f32 %v4446_v37, 0.0  ;;  %v5674_v42 = vadd.f32 %v7202_v25, %v2859_v3  ;;  %v5397_v14 = vpop.f32.mrb[22].mxu1 }
 0x271   : > { %4512 = vst [vmem:[%s7218_s12 + $0x98] sm:$0xff] %v4480_v33  ;;  %v5673_v6 = vadd.f32 %v5672_v26, %v5622_v13  ;;  %v5676_v34 = vadd.f32 %v5397_v14, %v7202_v25  ;;  %v2862_v22 = vpop.f32.mrb[23].mxu1 }
 0x272   : > { %v5626_v7 = vpop.f32.mrb[24].mxu0  ;;  %4510 = vst [vmem:[%s7218_s12 + $0x88] sm:$0xff] %v4478_v30  ;;  %v5675_v0 = vadd.f32 %v5674_v42, %v4343_v23  ;;  %v5678_v55 = vadd.f32 %v7202_v25, %v2862_v22 }
 0x273   : > { %v4359_v28 = vpop.f32.mrb[25].mxu0  ;;  %v4451_v38 = vadd.f32 %v5673_v6, %v7208_v62  ;;  %v5677_v45 = vadd.f32 %v5676_v34, %v5623_v15 }
 0x274   : > { %v5627_v35 = vpop.f32.mrb[26].mxu0  ;;  %v4449_v46 = vadd.f32 %v5675_v0, %v7208_v62  ;;  %v5679_v24 = vadd.f32 %v5678_v55, %v4346_v5 }
 0x275   : > { %v4362_v49 = vpop.f32.mrb[27].mxu0  ;;  %v4483_v18 = vmax.f32 %v4451_v38, 0.0  ;;  %v4452_v52 = vadd.f32 %v5677_v45, %v7208_v62 }
 0x276   : > { %v4481_v56 = vmax.f32 %v4449_v46, 0.0  ;;  %v4450_v11 = vadd.f32 %v5679_v24, %v7208_v62  ;;  %v5400_v2 = vpop.f32.mrb[24].mxu1 }
 0x277   : > { %4515 = vst [vmem:[%s7218_s12 + $0xb0] sm:$0xff] %v4483_v18  ;;  %v4484_v60 = vmax.f32 %v4452_v52, 0.0  ;;  %v5680_v12 = vadd.f32 %v5400_v2, %v7202_v25  ;;  %v2875_v19 = vpop.f32.mrb[25].mxu1 }
 0x278   : > { %4513 = vst [vmem:[%s7218_s12 + $0xa0] sm:$0xff] %v4481_v56  ;;  %v4482_v58 = vmax.f32 %v4450_v11, 0.0  ;;  %v5682_v39 = vadd.f32 %v7202_v25, %v2875_v19  ;;  %v5401_v40 = vpop.f32.mrb[26].mxu1 }
 0x279   : > { %4516 = vst [vmem:[%s7218_s12 + $0xb8] sm:$0xff] %v4484_v60  ;;  %v5681_v53 = vadd.f32 %v5680_v12, %v5626_v7  ;;  %v5684_v57 = vadd.f32 %v5401_v40, %v7202_v25  ;;  %v2878_v32 = vpop.f32.mrb[27].mxu1 }
 0x27a   : > { %v5630_v47 = vpop.f32.mrb[28].mxu0  ;;  %4514 = vst [vmem:[%s7218_s12 + $0xa8] sm:$0xff] %v4482_v58  ;;  %v5683_v43 = vadd.f32 %v5682_v39, %v4359_v28  ;;  %v5686_v44 = vadd.f32 %v7202_v25, %v2878_v32 }
 0x27b   : > { %v4375_v27 = vpop.f32.mrb[29].mxu0  ;;  %v4455_v48 = vadd.f32 %v5681_v53, %v7208_v62  ;;  %v5685_v63 = vadd.f32 %v5684_v57, %v5627_v35 }
 0x27c   : > { %v5631_v4 = vpop.f32.mrb[30].mxu0  ;;  %v4453_v13 = vadd.f32 %v5683_v43, %v7208_v62  ;;  %v5687_v31 = vadd.f32 %v5686_v44, %v4362_v49 }
 0x27d   : > { %v4378_v9 = vpop.f32.mrb[31].mxu0  ;;  %v4487_v20 = vmax.f32 %v4455_v48, 0.0  ;;  %v4456_v10 = vadd.f32 %v5685_v63, %v7208_v62 }
 0x27e   : > { %v4485_v23 = vmax.f32 %v4453_v13, 0.0  ;;  %v4454_v51 = vadd.f32 %v5687_v31, %v7208_v62  ;;  %v5404_v16 = vpop.f32.mrb[28].mxu1 }
 0x27f   : > { %4519 = vst [vmem:[%s7218_s12 + $0xd0] sm:$0xff] %v4487_v20  ;;  %v4488_v29 = vmax.f32 %v4456_v10, 0.0  ;;  %v5688_v15 = vadd.f32 %v5404_v16, %v7202_v25  ;;  %v2891_v41 = vpop.f32.mrb[29].mxu1 }
 0x280   : > { %4517 = vst [vmem:[%s7218_s12 + $0xc0] sm:$0xff] %v4485_v23  ;;  %v4486_v17 = vmax.f32 %v4454_v51, 0.0  ;;  %v5690_v5 = vadd.f32 %v7202_v25, %v2891_v41  ;;  %v5405_v1 = vpop.f32.mrb[30].mxu1 }
 0x281   : > { %4520 = vst [vmem:[%s7218_s12 + $0xd8] sm:$0xff] %v4488_v29  ;;  %v5689_v59 = vadd.f32 %v5688_v15, %v5630_v47  ;;  %v5692_v8 = vadd.f32 %v5405_v1, %v7202_v25  ;;  %v2894_v21 = vpop.f32.mrb[31].mxu1 }
 0x282   : > { %4518 = vst [vmem:[%s7218_s12 + $0xc8] sm:$0xff] %v4486_v17  ;;  %v5691_v36 = vadd.f32 %v5690_v5, %v4375_v27  ;;  %v5694_v54 = vadd.f32 %v7202_v25, %v2894_v21 }
 0x283   : > { %v4459_v50 = vadd.f32 %v5689_v59, %v7208_v62  ;;  %v5693_v37 = vadd.f32 %v5692_v8, %v5631_v4 }
 0x284   : > { %v4457_v61 = vadd.f32 %v5691_v36, %v7208_v62  ;;  %v5695_v33 = vadd.f32 %v5694_v54, %v4378_v9 }
 0x285   : > { %v4491_v26 = vmax.f32 %v4459_v50, 0.0  ;;  %v4460_v3 = vadd.f32 %v5693_v37, %v7208_v62 }
 0x286   : > { %v4489_v7 = vmax.f32 %v4457_v61, 0.0  ;;  %v4458_v30 = vadd.f32 %v5695_v33, %v7208_v62 }
 0x287   : > { %4523 = vst [vmem:[%s7218_s12 + $0xf0] sm:$0xff] %v4491_v26  ;;  %v4492_v42 = vmax.f32 %v4460_v3, 0.0 }
 0x288   : > { %4521 = vst [vmem:[%s7218_s12 + $0xe0] sm:$0xff] %v4489_v7  ;;  %v4490_v14 = vmax.f32 %v4458_v30, 0.0 }
 0x289   : > { %4524 = vst [vmem:[%s7218_s12 + $0xf8] sm:$0xff] %v4492_v42 }
 0x28a   : > { %4522 = vst [vmem:[%s7218_s12 + $0xe8] sm:$0xff] %v4490_v14 }
 0x28b PF: > { %s16_s23 = sadd.s32 1, %s6126_s23   ;;  %s7373_s21 = smov %s6122_s22 }
 0x28c   : > { %p13_p5 = scmp.ge.s32.totalorder %s16_s23, 4   ;;  %s7374_s22 = smov %s7376_s24 }
 0x28e   :  { %15 = sbr.rel (!%p13_p5) target bundleno = 2 (0x2), region = 93 }

</bundles_post_ra>
